<compile_context>
chip_gen: v5e
topology: v5e:2x2
jax: 0.10.0
libtpu: 0.0.40
codegen_flags: <defaults>
</compile_context>

<pallas_src>
import jax
import jax.numpy as jnp
from jax.experimental import pallas as pl
from jax.experimental.pallas import tpu as pltpu


# ----------------------------------------------------------------------------
# Relative position index (same as timm's get_relative_position_index)
# ----------------------------------------------------------------------------
def get_relative_position_index(win_h: int, win_w: int) -> jnp.ndarray:
    coords = jnp.stack(
        jnp.meshgrid(jnp.arange(win_h), jnp.arange(win_w), indexing="ij")
    )                                                                        # (2, Wh, Ww)
    coords_flatten = coords.reshape(2, -1)                                   # (2, N)
    rel = coords_flatten[:, :, None] - coords_flatten[:, None, :]            # (2, N, N)
    rel = jnp.transpose(rel, (1, 2, 0))                                      # (N, N, 2)
    rel = rel.at[:, :, 0].add(win_h - 1)
    rel = rel.at[:, :, 1].add(win_w - 1)
    rel = rel.at[:, :, 0].multiply(2 * win_w - 1)
    return rel.sum(-1)                                                       # (N, N)


# ----------------------------------------------------------------------------
# Pallas kernel: one grid step handles `bw` windows; heads processed one at a time
# with per-head weight layouts (no in-kernel lane relayouts).
# ----------------------------------------------------------------------------
def window_attention_kernel(x_ref,      # (bw, N, C)      bf16
                            wqkv_ref,   # (3, H, C, hd)   bf16 (scale folded into Q)
                            bqkv_ref,   # (3, H, 1, hd)   f32  (scale folded into Q)
                            bias_ref,   # (H, N, N)       bf16 rel-pos bias
                            wproj_ref,  # (H, hd, C)      bf16
                            bproj_ref,  # (1, C)          f32
                            o_ref):     # (bw, N, C)      bf16
    bw, n, c = x_ref.shape
    _, num_heads, _, head_dim = wqkv_ref.shape
    mm_dtype = wqkv_ref.dtype          # MXU operand dtype (bf16); accumulate in f32

    # Flattened activation slab (leading-dim reshape only; x already bf16).
    x2 = x_ref[...].reshape(bw * n, c)

    # f32 output accumulator (bw*N, C).
    y = jnp.zeros((bw * n, c), jnp.float32)

    # Per-head loop: contains only MXU matmuls, single-batch einsums, leading-axis
    # ref indexing and leading-dim reshapes; scores die at the end of each head.
    for h in range(num_heads):
        q = jnp.dot(x2, wqkv_ref[0, h], preferred_element_type=jnp.float32) + bqkv_ref[0, h]
        k = jnp.dot(x2, wqkv_ref[1, h], preferred_element_type=jnp.float32) + bqkv_ref[1, h]
        v = jnp.dot(x2, wqkv_ref[2, h], preferred_element_type=jnp.float32) + bqkv_ref[2, h]

        q3 = q.reshape(bw, n, head_dim).astype(mm_dtype)
        k3 = k.reshape(bw, n, head_dim).astype(mm_dtype)
        v3 = v.reshape(bw, n, head_dim).astype(mm_dtype)

        # Scores for all windows of this head; head_dim contracted directly (no k.T).
        s = jnp.einsum("bqd,bkd->bqk", q3, k3, preferred_element_type=jnp.float32)
        s = s + bias_ref[h].astype(jnp.float32)[None]                        # (bw, N, N)
        # TODO(synk): shifted-window (SW-MSA) mask add would go here (mask=None only).

        # Softmax in f32; divide -> EUP reciprocal (approx).
        s = s - jnp.max(s, axis=-1, keepdims=True)
        p = jnp.exp(s)
        p = p * pl.reciprocal(jnp.sum(p, axis=-1, keepdims=True), approx=True)
        # TODO(synk): attn_drop is identity in eval mode; not implemented.

        o = jnp.einsum("bqk,bkd->bqd", p.astype(mm_dtype), v3,
                       preferred_element_type=jnp.float32)                   # (bw, N, hd)

        # Output projection: per-head matmul-accumulate against W_proj[h] (hd, C);
        # this is exactly the 'bqhd,hdc->bqc' contraction, with no head-merge concat.
        y = y + jnp.dot(o.reshape(bw * n, head_dim).astype(mm_dtype), wproj_ref[h],
                        preferred_element_type=jnp.float32)

    y = y + bproj_ref[0]
    o_ref[...] = y.reshape(bw, n, c).astype(o_ref.dtype)
    # TODO(synk): proj_drop is identity in eval mode; not implemented.


# ----------------------------------------------------------------------------
# One-time parameter preparation: scale folding, per-head weight layout, bf16 cast
# ----------------------------------------------------------------------------
def prepare_params(w_qkv_t, b_qkv, w_proj_t, b_proj, rel_bias,
                   *, num_heads, head_dim, scale, matmul_dtype=jnp.bfloat16):
    """W_qkv^T (C, 3*attn_dim) -> (3, H, C, hd); b_qkv (1, 3*attn_dim) -> (3, H, 1, hd);
    W_proj^T (attn_dim, C) -> (H, hd, C).  Softmax scale folded into the Q projection.
    Matmul weights + rel-pos bias cast to bf16; biases stay f32."""
    attn_dim = num_heads * head_dim
    C = w_qkv_t.shape[0]
    w_qkv_t = w_qkv_t.astype(jnp.float32).at[:, :attn_dim].multiply(scale)
    b_qkv = b_qkv.astype(jnp.float32).at[:, :attn_dim].multiply(scale)

    wqkv4 = w_qkv_t.reshape(C, 3, num_heads, head_dim).transpose(1, 2, 0, 3)  # (3,H,C,hd)
    bqkv4 = b_qkv.reshape(3, num_heads, 1, head_dim)                          # (3,H,1,hd)
    wproj3 = w_proj_t.astype(jnp.float32).reshape(num_heads, head_dim, C)     # (H,hd,C)

    return (wqkv4.astype(matmul_dtype),
            bqkv4.astype(jnp.float32),
            rel_bias.astype(matmul_dtype),      # bf16 resident in VMEM, upcast at add
            wproj3.astype(matmul_dtype),
            b_proj.astype(jnp.float32))


# ----------------------------------------------------------------------------
# VMEM budget (padded to the (8,128) vreg tile) -> explicit vmem_limit_bytes
# ----------------------------------------------------------------------------
def _padded_bytes(shape, dtype, sublane=8, lane=128):
    shape = tuple(int(d) for d in shape)
    if len(shape) == 1:
        shape = (1,) + shape
    lead = 1
    for d in shape[:-2]:
        lead *= d
    r = -(-shape[-2] // sublane) * sublane
    c = -(-shape[-1] // lane) * lane
    return lead * r * c * jnp.dtype(dtype).itemsize


# ----------------------------------------------------------------------------
# Wrapper
# ----------------------------------------------------------------------------
def window_attention(x, params, *, block_windows=8, matmul_dtype=jnp.bfloat16):
    wqkv4, bqkv4, rel_bias, wproj3, bproj = params
    B_, N, C = x.shape
    _, num_heads, _, head_dim = wqkv4.shape
    assert rel_bias.shape == (num_heads, N, N)

    # Stream activations as bf16: halves the per-step HBM<->VMEM DMA and the
    # x/out double-buffer VMEM (the kernel computes on the MXU in bf16 anyway).
    x = x.astype(matmul_dtype)

    # Block several windows per grid step.  Demo default bw=8 -> 128 MXU rows per
    # projection matmul, grid=(1,) (v5e/v6e sizing).  On v7x pass block_windows=4
    # to keep the grid at >=2 "parallel" steps so both TensorCores get work.
    bw = max(1, min(block_windows, B_))
    while B_ % bw:
        bw -= 1
    grid = (B_ // bw,)

    # Explicit VMEM budget: single-buffered params + double-buffered x/out blocks
    # + one head's live f32 intermediates.  Cap below v7x's 64 MiB per-TC VMEM.
    est = (
        _padded_bytes(wqkv4.shape, wqkv4.dtype)
        + _padded_bytes(bqkv4.shape, bqkv4.dtype)
        + _padded_bytes(rel_bias.shape, rel_bias.dtype)
        + _padded_bytes(wproj3.shape, wproj3.dtype)
        + _padded_bytes(bproj.shape, bproj.dtype)
        + 2 * 2 * _padded_bytes((bw, N, C), matmul_dtype)       # double-buffered x + out
        + _padded_bytes((bw * N, C), jnp.float32)               # f32 output accumulator
        + 2 * _padded_bytes((bw, N, N), jnp.float32)            # one head's scores/probs
        + 6 * _padded_bytes((bw * N, head_dim), jnp.float32)    # one head's q/k/v
    )
    vmem_limit = int(min(48 * 1024 * 1024, max(2 * est, 16 * 1024 * 1024)))

    def const_spec(shape):
        zeros = (0,) * len(shape)
        # Grid-invariant parameters: single-buffered (double-buffering only costs VMEM).
        return pl.BlockSpec(shape, lambda b, _z=zeros: _z, pipeline_mode=pl.Buffered(1))

    return pl.pallas_call(
        window_attention_kernel,
        out_shape=jax.ShapeDtypeStruct((B_, N, C), matmul_dtype),
        grid=grid,
        in_specs=[
            pl.BlockSpec((bw, N, C), lambda b: (b, 0, 0)),      # x: block of windows
            const_spec(wqkv4.shape),                            # (3, H, C, hd) bf16
            const_spec(bqkv4.shape),                            # (3, H, 1, hd) f32
            const_spec(rel_bias.shape),                         # (H, N, N)     bf16
            const_spec(wproj3.shape),                           # (H, hd, C)    bf16
            const_spec(bproj.shape),                            # (1, C)        f32
        ],
        out_specs=pl.BlockSpec((bw, N, C), lambda b: (b, 0, 0)),
        compiler_params=pltpu.CompilerParams(
            dimension_semantics=("parallel",),
            vmem_limit_bytes=vmem_limit,
        ),
    )(x, wqkv4, bqkv4, rel_bias, wproj3, bproj)


# ----------------------------------------------------------------------------
# Pure-JAX reference (mirrors the PyTorch forward, mask=None, eval mode, f32)
# ----------------------------------------------------------------------------
def window_attention_ref(x, w_qkv_t, b_qkv, w_proj_t, b_proj, rel_bias,
                         *, num_heads, head_dim, scale):
    B_, N, C = x.shape
    attn_dim = num_heads * head_dim
    qkv = x @ w_qkv_t + b_qkv[0]                                             # (B_, N, 3*attn_dim)
    qkv = qkv.reshape(B_, N, 3, num_heads, head_dim).transpose(2, 0, 3, 1, 4)
    q, k, v = qkv[0], qkv[1], qkv[2]                                         # (B_, H, N, hd)
    q = q * scale
    attn = jnp.einsum("bhnd,bhmd->bhnm", q, k) + rel_bias[None]              # (B_, H, N, N)
    attn = jax.nn.softmax(attn, axis=-1)
    out = jnp.einsum("bhnm,bhmd->bhnd", attn, v)
    out = out.transpose(0, 2, 1, 3).reshape(B_, N, attn_dim)
    return out @ w_proj_t + b_proj[0]


# ----------------------------------------------------------------------------
# Main
# ----------------------------------------------------------------------------
if __name__ == "__main__":
    # Small but module-consistent hyper-parameters.
    dim = 32
    num_heads = 4
    head_dim = dim // num_heads            # 8
    attn_dim = head_dim * num_heads        # 32
    window_size = (4, 4)
    win_h, win_w = window_size
    N = win_h * win_w                      # 16 tokens per window
    batch = 2
    num_windows = 4
    B_ = batch * num_windows               # 8 windows total
    scale = head_dim ** (-0.5)

    key = jax.random.PRNGKey(0)
    k_x, k_tbl, k_wqkv, k_bqkv, k_wproj, k_bproj = jax.random.split(key, 6)

    # Input features (num_windows*B, N, C)
    x = jax.random.normal(k_x, (B_, N, dim), dtype=jnp.float32)

    # Deterministic synthetic parameters (shapes match nn.Module __init__)
    rel_pos_bias_table = 0.02 * jax.random.truncated_normal(
        k_tbl, -2.0, 2.0, ((2 * win_h - 1) * (2 * win_w - 1), num_heads), dtype=jnp.float32
    )
    w_qkv_t = 0.05 * jax.random.normal(k_wqkv, (dim, 3 * attn_dim), dtype=jnp.float32)
    b_qkv   = 0.05 * jax.random.normal(k_bqkv, (1, 3 * attn_dim), dtype=jnp.float32)
    w_proj_t = 0.05 * jax.random.normal(k_wproj, (attn_dim, dim), dtype=jnp.float32)
    b_proj   = 0.05 * jax.random.normal(k_bproj, (1, dim), dtype=jnp.float32)

    # _get_rel_pos_bias(): gather table by relative_position_index -> (H, N, N)
    rel_idx = get_relative_position_index(win_h, win_w)                      # (N, N)
    rel_bias = rel_pos_bias_table[rel_idx.reshape(-1)]                       # (N*N, H)
    rel_bias = rel_bias.reshape(N, N, num_heads).transpose(2, 0, 1)          # (H, N, N)

    # One-time param prep (scale folding + per-head layouts + bf16 MXU operands).
    params = prepare_params(
        w_qkv_t, b_qkv, w_proj_t, b_proj, rel_bias,
        num_heads=num_heads, head_dim=head_dim, scale=scale,
        matmul_dtype=jnp.bfloat16,
    )

    out = window_attention(x, params, block_windows=8)    # bw=8 -> 128 MXU rows, grid=(1,)
    out = jax.block_until_ready(out)

    ref = window_attention_ref(
        x, w_qkv_t, b_qkv, w_proj_t, b_proj, rel_bias,
        num_heads=num_heads, head_dim=head_dim, scale=scale,
    )
    ref = jax.block_until_ready(ref)

    assert out.shape == (B_, N, dim)
    assert out.dtype == jnp.bfloat16
    # bf16 activations + bf16 MXU operands (f32 accumulate / f32 softmax, approx
    # reciprocal) -> relaxed tolerance vs the f32 reference.
    assert jnp.allclose(out.astype(jnp.float32), ref, atol=5e-2, rtol=5e-2), \
        "Pallas output != JAX reference"

    print("KERNEL_OK")
</pallas_src>

<mosaic_0001>
module attributes {stable_mosaic.version = 11 : i64} {
  func.func @window_attention_kernel(%arg0: i32, %arg1: memref<8x16x32xbf16, #tpu.memory_space<vmem>>, %arg2: memref<3x4x32x8xbf16, #tpu.memory_space<vmem>>, %arg3: memref<3x4x1x8xf32, #tpu.memory_space<vmem>>, %arg4: memref<4x16x16xbf16, #tpu.memory_space<vmem>>, %arg5: memref<4x8x32xbf16, #tpu.memory_space<vmem>>, %arg6: memref<1x32xf32, #tpu.memory_space<vmem>>, %arg7: memref<8x16x32xbf16, #tpu.memory_space<vmem>>) attributes {dimension_semantics = [#tpu.dimension_semantics<parallel>], iteration_bounds = array<i64: 1>, scalar_prefetch = 0 : i64, scratch_operands = 0 : i64, tpu.core_type = #tpu.core_type<tc>, window_params = [{transform_indices = @transform_0, window_bounds = array<i64: 8, 16, 32>}, {pipeline_mode = #tpu.pipeline_mode<synchronous>, transform_indices = @transform_1, window_bounds = array<i64: 3, 4, 32, 8>}, {pipeline_mode = #tpu.pipeline_mode<synchronous>, transform_indices = @transform_2, window_bounds = array<i64: 3, 4, 1, 8>}, {pipeline_mode = #tpu.pipeline_mode<synchronous>, transform_indices = @transform_3, window_bounds = array<i64: 4, 16, 16>}, {pipeline_mode = #tpu.pipeline_mode<synchronous>, transform_indices = @transform_4, window_bounds = array<i64: 4, 8, 32>}, {pipeline_mode = #tpu.pipeline_mode<synchronous>, transform_indices = @transform_5, window_bounds = array<i64: 1, 32>}, {transform_indices = @transform_6, window_bounds = array<i64: 8, 16, 32>}]} {
    %c0 = arith.constant 0 : index
    %c0_0 = arith.constant 0 : index
    %c0_1 = arith.constant 0 : index
    %0 = vector.load %arg1[%c0, %c0_0, %c0_1] : memref<8x16x32xbf16, #tpu.memory_space<vmem>>, vector<8x16x32xbf16>
    %1 = vector.shape_cast %0 : vector<8x16x32xbf16> to vector<128x32xbf16>
    %cst = arith.constant 0.000000e+00 : f32
    %2 = vector.broadcast %cst : f32 to vector<128x32xf32>
    %c0_2 = arith.constant 0 : index
    %c0_3 = arith.constant 0 : index
    %c0_4 = arith.constant 0 : index
    %c0_5 = arith.constant 0 : index
    %3 = vector.load %arg2[%c0_2, %c0_3, %c0_4, %c0_5] : memref<3x4x32x8xbf16, #tpu.memory_space<vmem>>, vector<1x1x32x8xbf16>
    %4 = vector.shape_cast %3 : vector<1x1x32x8xbf16> to vector<32x8xbf16>
    %cst_6 = arith.constant dense<0.000000e+00> : vector<128x8xf32>
    %5 = tpu.matmul %1, %4, %cst_6 {dimension_numbers = #tpu.dot_dimension_numbers<[1], [0], [0], [1], [0, 0, 1, 1], [], []>} : vector<128x32xbf16>, vector<32x8xbf16>, vector<128x8xf32> -> vector<128x8xf32>
    %c0_7 = arith.constant 0 : index
    %c0_8 = arith.constant 0 : index
    %c0_9 = arith.constant 0 : index
    %c0_10 = arith.constant 0 : index
    %6 = vector.load %arg3[%c0_7, %c0_8, %c0_9, %c0_10] : memref<3x4x1x8xf32, #tpu.memory_space<vmem>>, vector<1x1x1x8xf32>
    %7 = vector.shape_cast %6 : vector<1x1x1x8xf32> to vector<1x8xf32>
    %8 = vector.broadcast %7 : vector<1x8xf32> to vector<128x8xf32>
    %9 = arith.addf %5, %8 : vector<128x8xf32>
    %c1 = arith.constant 1 : index
    %c0_11 = arith.constant 0 : index
    %c0_12 = arith.constant 0 : index
    %c0_13 = arith.constant 0 : index
    %10 = vector.load %arg2[%c1, %c0_11, %c0_12, %c0_13] : memref<3x4x32x8xbf16, #tpu.memory_space<vmem>>, vector<1x1x32x8xbf16>
    %11 = vector.shape_cast %10 : vector<1x1x32x8xbf16> to vector<32x8xbf16>
    %cst_14 = arith.constant dense<0.000000e+00> : vector<128x8xf32>
    %12 = tpu.matmul %1, %11, %cst_14 {dimension_numbers = #tpu.dot_dimension_numbers<[1], [0], [0], [1], [0, 0, 1, 1], [], []>} : vector<128x32xbf16>, vector<32x8xbf16>, vector<128x8xf32> -> vector<128x8xf32>
    %c1_15 = arith.constant 1 : index
    %c0_16 = arith.constant 0 : index
    %c0_17 = arith.constant 0 : index
    %c0_18 = arith.constant 0 : index
    %13 = vector.load %arg3[%c1_15, %c0_16, %c0_17, %c0_18] : memref<3x4x1x8xf32, #tpu.memory_space<vmem>>, vector<1x1x1x8xf32>
    %14 = vector.shape_cast %13 : vector<1x1x1x8xf32> to vector<1x8xf32>
    %15 = vector.broadcast %14 : vector<1x8xf32> to vector<128x8xf32>
    %16 = arith.addf %12, %15 : vector<128x8xf32>
    %c2 = arith.constant 2 : index
    %c0_19 = arith.constant 0 : index
    %c0_20 = arith.constant 0 : index
    %c0_21 = arith.constant 0 : index
    %17 = vector.load %arg2[%c2, %c0_19, %c0_20, %c0_21] : memref<3x4x32x8xbf16, #tpu.memory_space<vmem>>, vector<1x1x32x8xbf16>
    %18 = vector.shape_cast %17 : vector<1x1x32x8xbf16> to vector<32x8xbf16>
    %cst_22 = arith.constant dense<0.000000e+00> : vector<128x8xf32>
    %19 = tpu.matmul %1, %18, %cst_22 {dimension_numbers = #tpu.dot_dimension_numbers<[1], [0], [0], [1], [0, 0, 1, 1], [], []>} : vector<128x32xbf16>, vector<32x8xbf16>, vector<128x8xf32> -> vector<128x8xf32>
    %c2_23 = arith.constant 2 : index
    %c0_24 = arith.constant 0 : index
    %c0_25 = arith.constant 0 : index
    %c0_26 = arith.constant 0 : index
    %20 = vector.load %arg3[%c2_23, %c0_24, %c0_25, %c0_26] : memref<3x4x1x8xf32, #tpu.memory_space<vmem>>, vector<1x1x1x8xf32>
    %21 = vector.shape_cast %20 : vector<1x1x1x8xf32> to vector<1x8xf32>
    %22 = vector.broadcast %21 : vector<1x8xf32> to vector<128x8xf32>
    %23 = arith.addf %19, %22 : vector<128x8xf32>
    %24 = vector.shape_cast %9 : vector<128x8xf32> to vector<8x16x8xf32>
    %25 = arith.truncf %24 : vector<8x16x8xf32> to vector<8x16x8xbf16>
    %26 = vector.shape_cast %16 : vector<128x8xf32> to vector<8x16x8xf32>
    %27 = arith.truncf %26 : vector<8x16x8xf32> to vector<8x16x8xbf16>
    %28 = vector.shape_cast %23 : vector<128x8xf32> to vector<8x16x8xf32>
    %29 = arith.truncf %28 : vector<8x16x8xf32> to vector<8x16x8xbf16>
    "tpu.trace_start"() <{level = 10 : i32, message = "bqd,bkd->bqk"}> : () -> ()
    %cst_27 = arith.constant dense<0.000000e+00> : vector<8x16x16xf32>
    %30 = tpu.matmul %25, %27, %cst_27 {dimension_numbers = #tpu.dot_dimension_numbers<[2], [2], [1], [1], [0, 0, 0, 1, 1, 1], [0], [0]>} : vector<8x16x8xbf16>, vector<8x16x8xbf16>, vector<8x16x16xf32> -> vector<8x16x16xf32>
    "tpu.trace_stop"() : () -> ()
    %c0_28 = arith.constant 0 : index
    %c0_29 = arith.constant 0 : index
    %c0_30 = arith.constant 0 : index
    %31 = vector.load %arg4[%c0_28, %c0_29, %c0_30] : memref<4x16x16xbf16, #tpu.memory_space<vmem>>, vector<1x16x16xbf16>
    %32 = vector.shape_cast %31 : vector<1x16x16xbf16> to vector<16x16xbf16>
    %33 = arith.extf %32 : vector<16x16xbf16> to vector<16x16xf32>
    %34 = vector.shape_cast %33 : vector<16x16xf32> to vector<1x16x16xf32>
    %35 = vector.broadcast %34 : vector<1x16x16xf32> to vector<8x16x16xf32>
    %36 = arith.addf %30, %35 : vector<8x16x16xf32>
    %cst_31 = arith.constant dense<0xFF800000> : vector<8x16xf32>
    %37 = vector.multi_reduction <maximumf>, %36, %cst_31 [2] : vector<8x16x16xf32> to vector<8x16xf32>
    %38 = vector.shape_cast %37 : vector<8x16xf32> to vector<8x16x1xf32>
    %39 = vector.broadcast %38 : vector<8x16x1xf32> to vector<8x16x16xf32>
    %40 = arith.subf %36, %39 : vector<8x16x16xf32>
    %41 = math.exp %40 : vector<8x16x16xf32>
    %cst_32 = arith.constant dense<0.000000e+00> : vector<8x16xf32>
    %42 = vector.multi_reduction <add>, %41, %cst_32 [2] : vector<8x16x16xf32> to vector<8x16xf32>
    %43 = vector.shape_cast %42 : vector<8x16xf32> to vector<8x16x1xf32>
    %44 = tpu.reciprocal %43 {approx = true} : vector<8x16x1xf32> -> vector<8x16x1xf32>
    %45 = vector.broadcast %44 : vector<8x16x1xf32> to vector<8x16x16xf32>
    %46 = arith.mulf %41, %45 : vector<8x16x16xf32>
    %47 = arith.truncf %46 : vector<8x16x16xf32> to vector<8x16x16xbf16>
    "tpu.trace_start"() <{level = 10 : i32, message = "bqk,bkd->bqd"}> : () -> ()
    %cst_33 = arith.constant dense<0.000000e+00> : vector<8x16x8xf32>
    %48 = tpu.matmul %47, %29, %cst_33 {dimension_numbers = #tpu.dot_dimension_numbers<[2], [1], [1], [2], [0, 0, 0, 1, 1, 2], [0], [0]>} : vector<8x16x16xbf16>, vector<8x16x8xbf16>, vector<8x16x8xf32> -> vector<8x16x8xf32>
    "tpu.trace_stop"() : () -> ()
    %49 = vector.shape_cast %48 : vector<8x16x8xf32> to vector<128x8xf32>
    %50 = arith.truncf %49 : vector<128x8xf32> to vector<128x8xbf16>
    %c0_34 = arith.constant 0 : index
    %c0_35 = arith.constant 0 : index
    %c0_36 = arith.constant 0 : index
    %51 = vector.load %arg5[%c0_34, %c0_35, %c0_36] : memref<4x8x32xbf16, #tpu.memory_space<vmem>>, vector<1x8x32xbf16>
    %52 = vector.shape_cast %51 : vector<1x8x32xbf16> to vector<8x32xbf16>
    %cst_37 = arith.constant dense<0.000000e+00> : vector<128x32xf32>
    %53 = tpu.matmul %50, %52, %cst_37 {dimension_numbers = #tpu.dot_dimension_numbers<[1], [0], [0], [1], [0, 0, 1, 1], [], []>} : vector<128x8xbf16>, vector<8x32xbf16>, vector<128x32xf32> -> vector<128x32xf32>
    %54 = arith.addf %2, %53 : vector<128x32xf32>
    %c0_38 = arith.constant 0 : index
    %c1_39 = arith.constant 1 : index
    %c0_40 = arith.constant 0 : index
    %c0_41 = arith.constant 0 : index
    %55 = vector.load %arg2[%c0_38, %c1_39, %c0_40, %c0_41] : memref<3x4x32x8xbf16, #tpu.memory_space<vmem>>, vector<1x1x32x8xbf16>
    %56 = vector.shape_cast %55 : vector<1x1x32x8xbf16> to vector<32x8xbf16>
    %cst_42 = arith.constant dense<0.000000e+00> : vector<128x8xf32>
    %57 = tpu.matmul %1, %56, %cst_42 {dimension_numbers = #tpu.dot_dimension_numbers<[1], [0], [0], [1], [0, 0, 1, 1], [], []>} : vector<128x32xbf16>, vector<32x8xbf16>, vector<128x8xf32> -> vector<128x8xf32>
    %c0_43 = arith.constant 0 : index
    %c1_44 = arith.constant 1 : index
    %c0_45 = arith.constant 0 : index
    %c0_46 = arith.constant 0 : index
    %58 = vector.load %arg3[%c0_43, %c1_44, %c0_45, %c0_46] : memref<3x4x1x8xf32, #tpu.memory_space<vmem>>, vector<1x1x1x8xf32>
    %59 = vector.shape_cast %58 : vector<1x1x1x8xf32> to vector<1x8xf32>
    %60 = vector.broadcast %59 : vector<1x8xf32> to vector<128x8xf32>
    %61 = arith.addf %57, %60 : vector<128x8xf32>
    %c1_47 = arith.constant 1 : index
    %c1_48 = arith.constant 1 : index
    %c0_49 = arith.constant 0 : index
    %c0_50 = arith.constant 0 : index
    %62 = vector.load %arg2[%c1_47, %c1_48, %c0_49, %c0_50] : memref<3x4x32x8xbf16, #tpu.memory_space<vmem>>, vector<1x1x32x8xbf16>
    %63 = vector.shape_cast %62 : vector<1x1x32x8xbf16> to vector<32x8xbf16>
    %cst_51 = arith.constant dense<0.000000e+00> : vector<128x8xf32>
    %64 = tpu.matmul %1, %63, %cst_51 {dimension_numbers = #tpu.dot_dimension_numbers<[1], [0], [0], [1], [0, 0, 1, 1], [], []>} : vector<128x32xbf16>, vector<32x8xbf16>, vector<128x8xf32> -> vector<128x8xf32>
    %c1_52 = arith.constant 1 : index
    %c1_53 = arith.constant 1 : index
    %c0_54 = arith.constant 0 : index
    %c0_55 = arith.constant 0 : index
    %65 = vector.load %arg3[%c1_52, %c1_53, %c0_54, %c0_55] : memref<3x4x1x8xf32, #tpu.memory_space<vmem>>, vector<1x1x1x8xf32>
    %66 = vector.shape_cast %65 : vector<1x1x1x8xf32> to vector<1x8xf32>
    %67 = vector.broadcast %66 : vector<1x8xf32> to vector<128x8xf32>
    %68 = arith.addf %64, %67 : vector<128x8xf32>
    %c2_56 = arith.constant 2 : index
    %c1_57 = arith.constant 1 : index
    %c0_58 = arith.constant 0 : index
    %c0_59 = arith.constant 0 : index
    %69 = vector.load %arg2[%c2_56, %c1_57, %c0_58, %c0_59] : memref<3x4x32x8xbf16, #tpu.memory_space<vmem>>, vector<1x1x32x8xbf16>
    %70 = vector.shape_cast %69 : vector<1x1x32x8xbf16> to vector<32x8xbf16>
    %cst_60 = arith.constant dense<0.000000e+00> : vector<128x8xf32>
    %71 = tpu.matmul %1, %70, %cst_60 {dimension_numbers = #tpu.dot_dimension_numbers<[1], [0], [0], [1], [0, 0, 1, 1], [], []>} : vector<128x32xbf16>, vector<32x8xbf16>, vector<128x8xf32> -> vector<128x8xf32>
    %c2_61 = arith.constant 2 : index
    %c1_62 = arith.constant 1 : index
    %c0_63 = arith.constant 0 : index
    %c0_64 = arith.constant 0 : index
    %72 = vector.load %arg3[%c2_61, %c1_62, %c0_63, %c0_64] : memref<3x4x1x8xf32, #tpu.memory_space<vmem>>, vector<1x1x1x8xf32>
    %73 = vector.shape_cast %72 : vector<1x1x1x8xf32> to vector<1x8xf32>
    %74 = vector.broadcast %73 : vector<1x8xf32> to vector<128x8xf32>
    %75 = arith.addf %71, %74 : vector<128x8xf32>
    %76 = vector.shape_cast %61 : vector<128x8xf32> to vector<8x16x8xf32>
    %77 = arith.truncf %76 : vector<8x16x8xf32> to vector<8x16x8xbf16>
    %78 = vector.shape_cast %68 : vector<128x8xf32> to vector<8x16x8xf32>
    %79 = arith.truncf %78 : vector<8x16x8xf32> to vector<8x16x8xbf16>
    %80 = vector.shape_cast %75 : vector<128x8xf32> to vector<8x16x8xf32>
    %81 = arith.truncf %80 : vector<8x16x8xf32> to vector<8x16x8xbf16>
    "tpu.trace_start"() <{level = 10 : i32, message = "bqd,bkd->bqk"}> : () -> ()
    %cst_65 = arith.constant dense<0.000000e+00> : vector<8x16x16xf32>
    %82 = tpu.matmul %77, %79, %cst_65 {dimension_numbers = #tpu.dot_dimension_numbers<[2], [2], [1], [1], [0, 0, 0, 1, 1, 1], [0], [0]>} : vector<8x16x8xbf16>, vector<8x16x8xbf16>, vector<8x16x16xf32> -> vector<8x16x16xf32>
    "tpu.trace_stop"() : () -> ()
    %c1_66 = arith.constant 1 : index
    %c0_67 = arith.constant 0 : index
    %c0_68 = arith.constant 0 : index
    %83 = vector.load %arg4[%c1_66, %c0_67, %c0_68] : memref<4x16x16xbf16, #tpu.memory_space<vmem>>, vector<1x16x16xbf16>
    %84 = vector.shape_cast %83 : vector<1x16x16xbf16> to vector<16x16xbf16>
    %85 = arith.extf %84 : vector<16x16xbf16> to vector<16x16xf32>
    %86 = vector.shape_cast %85 : vector<16x16xf32> to vector<1x16x16xf32>
    %87 = vector.broadcast %86 : vector<1x16x16xf32> to vector<8x16x16xf32>
    %88 = arith.addf %82, %87 : vector<8x16x16xf32>
    %cst_69 = arith.constant dense<0xFF800000> : vector<8x16xf32>
    %89 = vector.multi_reduction <maximumf>, %88, %cst_69 [2] : vector<8x16x16xf32> to vector<8x16xf32>
    %90 = vector.shape_cast %89 : vector<8x16xf32> to vector<8x16x1xf32>
    %91 = vector.broadcast %90 : vector<8x16x1xf32> to vector<8x16x16xf32>
    %92 = arith.subf %88, %91 : vector<8x16x16xf32>
    %93 = math.exp %92 : vector<8x16x16xf32>
    %cst_70 = arith.constant dense<0.000000e+00> : vector<8x16xf32>
    %94 = vector.multi_reduction <add>, %93, %cst_70 [2] : vector<8x16x16xf32> to vector<8x16xf32>
    %95 = vector.shape_cast %94 : vector<8x16xf32> to vector<8x16x1xf32>
    %96 = tpu.reciprocal %95 {approx = true} : vector<8x16x1xf32> -> vector<8x16x1xf32>
    %97 = vector.broadcast %96 : vector<8x16x1xf32> to vector<8x16x16xf32>
    %98 = arith.mulf %93, %97 : vector<8x16x16xf32>
    %99 = arith.truncf %98 : vector<8x16x16xf32> to vector<8x16x16xbf16>
    "tpu.trace_start"() <{level = 10 : i32, message = "bqk,bkd->bqd"}> : () -> ()
    %cst_71 = arith.constant dense<0.000000e+00> : vector<8x16x8xf32>
    %100 = tpu.matmul %99, %81, %cst_71 {dimension_numbers = #tpu.dot_dimension_numbers<[2], [1], [1], [2], [0, 0, 0, 1, 1, 2], [0], [0]>} : vector<8x16x16xbf16>, vector<8x16x8xbf16>, vector<8x16x8xf32> -> vector<8x16x8xf32>
    "tpu.trace_stop"() : () -> ()
    %101 = vector.shape_cast %100 : vector<8x16x8xf32> to vector<128x8xf32>
    %102 = arith.truncf %101 : vector<128x8xf32> to vector<128x8xbf16>
    %c1_72 = arith.constant 1 : index
    %c0_73 = arith.constant 0 : index
    %c0_74 = arith.constant 0 : index
    %103 = vector.load %arg5[%c1_72, %c0_73, %c0_74] : memref<4x8x32xbf16, #tpu.memory_space<vmem>>, vector<1x8x32xbf16>
    %104 = vector.shape_cast %103 : vector<1x8x32xbf16> to vector<8x32xbf16>
    %cst_75 = arith.constant dense<0.000000e+00> : vector<128x32xf32>
    %105 = tpu.matmul %102, %104, %cst_75 {dimension_numbers = #tpu.dot_dimension_numbers<[1], [0], [0], [1], [0, 0, 1, 1], [], []>} : vector<128x8xbf16>, vector<8x32xbf16>, vector<128x32xf32> -> vector<128x32xf32>
    %106 = arith.addf %54, %105 : vector<128x32xf32>
    %c0_76 = arith.constant 0 : index
    %c2_77 = arith.constant 2 : index
    %c0_78 = arith.constant 0 : index
    %c0_79 = arith.constant 0 : index
    %107 = vector.load %arg2[%c0_76, %c2_77, %c0_78, %c0_79] : memref<3x4x32x8xbf16, #tpu.memory_space<vmem>>, vector<1x1x32x8xbf16>
    %108 = vector.shape_cast %107 : vector<1x1x32x8xbf16> to vector<32x8xbf16>
    %cst_80 = arith.constant dense<0.000000e+00> : vector<128x8xf32>
    %109 = tpu.matmul %1, %108, %cst_80 {dimension_numbers = #tpu.dot_dimension_numbers<[1], [0], [0], [1], [0, 0, 1, 1], [], []>} : vector<128x32xbf16>, vector<32x8xbf16>, vector<128x8xf32> -> vector<128x8xf32>
    %c0_81 = arith.constant 0 : index
    %c2_82 = arith.constant 2 : index
    %c0_83 = arith.constant 0 : index
    %c0_84 = arith.constant 0 : index
    %110 = vector.load %arg3[%c0_81, %c2_82, %c0_83, %c0_84] : memref<3x4x1x8xf32, #tpu.memory_space<vmem>>, vector<1x1x1x8xf32>
    %111 = vector.shape_cast %110 : vector<1x1x1x8xf32> to vector<1x8xf32>
    %112 = vector.broadcast %111 : vector<1x8xf32> to vector<128x8xf32>
    %113 = arith.addf %109, %112 : vector<128x8xf32>
    %c1_85 = arith.constant 1 : index
    %c2_86 = arith.constant 2 : index
    %c0_87 = arith.constant 0 : index
    %c0_88 = arith.constant 0 : index
    %114 = vector.load %arg2[%c1_85, %c2_86, %c0_87, %c0_88] : memref<3x4x32x8xbf16, #tpu.memory_space<vmem>>, vector<1x1x32x8xbf16>
    %115 = vector.shape_cast %114 : vector<1x1x32x8xbf16> to vector<32x8xbf16>
    %cst_89 = arith.constant dense<0.000000e+00> : vector<128x8xf32>
    %116 = tpu.matmul %1, %115, %cst_89 {dimension_numbers = #tpu.dot_dimension_numbers<[1], [0], [0], [1], [0, 0, 1, 1], [], []>} : vector<128x32xbf16>, vector<32x8xbf16>, vector<128x8xf32> -> vector<128x8xf32>
    %c1_90 = arith.constant 1 : index
    %c2_91 = arith.constant 2 : index
    %c0_92 = arith.constant 0 : index
    %c0_93 = arith.constant 0 : index
    %117 = vector.load %arg3[%c1_90, %c2_91, %c0_92, %c0_93] : memref<3x4x1x8xf32, #tpu.memory_space<vmem>>, vector<1x1x1x8xf32>
    %118 = vector.shape_cast %117 : vector<1x1x1x8xf32> to vector<1x8xf32>
    %119 = vector.broadcast %118 : vector<1x8xf32> to vector<128x8xf32>
    %120 = arith.addf %116, %119 : vector<128x8xf32>
    %c2_94 = arith.constant 2 : index
    %c2_95 = arith.constant 2 : index
    %c0_96 = arith.constant 0 : index
    %c0_97 = arith.constant 0 : index
    %121 = vector.load %arg2[%c2_94, %c2_95, %c0_96, %c0_97] : memref<3x4x32x8xbf16, #tpu.memory_space<vmem>>, vector<1x1x32x8xbf16>
    %122 = vector.shape_cast %121 : vector<1x1x32x8xbf16> to vector<32x8xbf16>
    %cst_98 = arith.constant dense<0.000000e+00> : vector<128x8xf32>
    %123 = tpu.matmul %1, %122, %cst_98 {dimension_numbers = #tpu.dot_dimension_numbers<[1], [0], [0], [1], [0, 0, 1, 1], [], []>} : vector<128x32xbf16>, vector<32x8xbf16>, vector<128x8xf32> -> vector<128x8xf32>
    %c2_99 = arith.constant 2 : index
    %c2_100 = arith.constant 2 : index
    %c0_101 = arith.constant 0 : index
    %c0_102 = arith.constant 0 : index
    %124 = vector.load %arg3[%c2_99, %c2_100, %c0_101, %c0_102] : memref<3x4x1x8xf32, #tpu.memory_space<vmem>>, vector<1x1x1x8xf32>
    %125 = vector.shape_cast %124 : vector<1x1x1x8xf32> to vector<1x8xf32>
    %126 = vector.broadcast %125 : vector<1x8xf32> to vector<128x8xf32>
    %127 = arith.addf %123, %126 : vector<128x8xf32>
    %128 = vector.shape_cast %113 : vector<128x8xf32> to vector<8x16x8xf32>
    %129 = arith.truncf %128 : vector<8x16x8xf32> to vector<8x16x8xbf16>
    %130 = vector.shape_cast %120 : vector<128x8xf32> to vector<8x16x8xf32>
    %131 = arith.truncf %130 : vector<8x16x8xf32> to vector<8x16x8xbf16>
    %132 = vector.shape_cast %127 : vector<128x8xf32> to vector<8x16x8xf32>
    %133 = arith.truncf %132 : vector<8x16x8xf32> to vector<8x16x8xbf16>
    "tpu.trace_start"() <{level = 10 : i32, message = "bqd,bkd->bqk"}> : () -> ()
    %cst_103 = arith.constant dense<0.000000e+00> : vector<8x16x16xf32>
    %134 = tpu.matmul %129, %131, %cst_103 {dimension_numbers = #tpu.dot_dimension_numbers<[2], [2], [1], [1], [0, 0, 0, 1, 1, 1], [0], [0]>} : vector<8x16x8xbf16>, vector<8x16x8xbf16>, vector<8x16x16xf32> -> vector<8x16x16xf32>
    "tpu.trace_stop"() : () -> ()
    %c2_104 = arith.constant 2 : index
    %c0_105 = arith.constant 0 : index
    %c0_106 = arith.constant 0 : index
    %135 = vector.load %arg4[%c2_104, %c0_105, %c0_106] : memref<4x16x16xbf16, #tpu.memory_space<vmem>>, vector<1x16x16xbf16>
    %136 = vector.shape_cast %135 : vector<1x16x16xbf16> to vector<16x16xbf16>
    %137 = arith.extf %136 : vector<16x16xbf16> to vector<16x16xf32>
    %138 = vector.shape_cast %137 : vector<16x16xf32> to vector<1x16x16xf32>
    %139 = vector.broadcast %138 : vector<1x16x16xf32> to vector<8x16x16xf32>
    %140 = arith.addf %134, %139 : vector<8x16x16xf32>
    %cst_107 = arith.constant dense<0xFF800000> : vector<8x16xf32>
    %141 = vector.multi_reduction <maximumf>, %140, %cst_107 [2] : vector<8x16x16xf32> to vector<8x16xf32>
    %142 = vector.shape_cast %141 : vector<8x16xf32> to vector<8x16x1xf32>
    %143 = vector.broadcast %142 : vector<8x16x1xf32> to vector<8x16x16xf32>
    %144 = arith.subf %140, %143 : vector<8x16x16xf32>
    %145 = math.exp %144 : vector<8x16x16xf32>
    %cst_108 = arith.constant dense<0.000000e+00> : vector<8x16xf32>
    %146 = vector.multi_reduction <add>, %145, %cst_108 [2] : vector<8x16x16xf32> to vector<8x16xf32>
    %147 = vector.shape_cast %146 : vector<8x16xf32> to vector<8x16x1xf32>
    %148 = tpu.reciprocal %147 {approx = true} : vector<8x16x1xf32> -> vector<8x16x1xf32>
    %149 = vector.broadcast %148 : vector<8x16x1xf32> to vector<8x16x16xf32>
    %150 = arith.mulf %145, %149 : vector<8x16x16xf32>
    %151 = arith.truncf %150 : vector<8x16x16xf32> to vector<8x16x16xbf16>
    "tpu.trace_start"() <{level = 10 : i32, message = "bqk,bkd->bqd"}> : () -> ()
    %cst_109 = arith.constant dense<0.000000e+00> : vector<8x16x8xf32>
    %152 = tpu.matmul %151, %133, %cst_109 {dimension_numbers = #tpu.dot_dimension_numbers<[2], [1], [1], [2], [0, 0, 0, 1, 1, 2], [0], [0]>} : vector<8x16x16xbf16>, vector<8x16x8xbf16>, vector<8x16x8xf32> -> vector<8x16x8xf32>
    "tpu.trace_stop"() : () -> ()
    %153 = vector.shape_cast %152 : vector<8x16x8xf32> to vector<128x8xf32>
    %154 = arith.truncf %153 : vector<128x8xf32> to vector<128x8xbf16>
    %c2_110 = arith.constant 2 : index
    %c0_111 = arith.constant 0 : index
    %c0_112 = arith.constant 0 : index
    %155 = vector.load %arg5[%c2_110, %c0_111, %c0_112] : memref<4x8x32xbf16, #tpu.memory_space<vmem>>, vector<1x8x32xbf16>
    %156 = vector.shape_cast %155 : vector<1x8x32xbf16> to vector<8x32xbf16>
    %cst_113 = arith.constant dense<0.000000e+00> : vector<128x32xf32>
    %157 = tpu.matmul %154, %156, %cst_113 {dimension_numbers = #tpu.dot_dimension_numbers<[1], [0], [0], [1], [0, 0, 1, 1], [], []>} : vector<128x8xbf16>, vector<8x32xbf16>, vector<128x32xf32> -> vector<128x32xf32>
    %158 = arith.addf %106, %157 : vector<128x32xf32>
    %c0_114 = arith.constant 0 : index
    %c3 = arith.constant 3 : index
    %c0_115 = arith.constant 0 : index
    %c0_116 = arith.constant 0 : index
    %159 = vector.load %arg2[%c0_114, %c3, %c0_115, %c0_116] : memref<3x4x32x8xbf16, #tpu.memory_space<vmem>>, vector<1x1x32x8xbf16>
    %160 = vector.shape_cast %159 : vector<1x1x32x8xbf16> to vector<32x8xbf16>
    %cst_117 = arith.constant dense<0.000000e+00> : vector<128x8xf32>
    %161 = tpu.matmul %1, %160, %cst_117 {dimension_numbers = #tpu.dot_dimension_numbers<[1], [0], [0], [1], [0, 0, 1, 1], [], []>} : vector<128x32xbf16>, vector<32x8xbf16>, vector<128x8xf32> -> vector<128x8xf32>
    %c0_118 = arith.constant 0 : index
    %c3_119 = arith.constant 3 : index
    %c0_120 = arith.constant 0 : index
    %c0_121 = arith.constant 0 : index
    %162 = vector.load %arg3[%c0_118, %c3_119, %c0_120, %c0_121] : memref<3x4x1x8xf32, #tpu.memory_space<vmem>>, vector<1x1x1x8xf32>
    %163 = vector.shape_cast %162 : vector<1x1x1x8xf32> to vector<1x8xf32>
    %164 = vector.broadcast %163 : vector<1x8xf32> to vector<128x8xf32>
    %165 = arith.addf %161, %164 : vector<128x8xf32>
    %c1_122 = arith.constant 1 : index
    %c3_123 = arith.constant 3 : index
    %c0_124 = arith.constant 0 : index
    %c0_125 = arith.constant 0 : index
    %166 = vector.load %arg2[%c1_122, %c3_123, %c0_124, %c0_125] : memref<3x4x32x8xbf16, #tpu.memory_space<vmem>>, vector<1x1x32x8xbf16>
    %167 = vector.shape_cast %166 : vector<1x1x32x8xbf16> to vector<32x8xbf16>
    %cst_126 = arith.constant dense<0.000000e+00> : vector<128x8xf32>
    %168 = tpu.matmul %1, %167, %cst_126 {dimension_numbers = #tpu.dot_dimension_numbers<[1], [0], [0], [1], [0, 0, 1, 1], [], []>} : vector<128x32xbf16>, vector<32x8xbf16>, vector<128x8xf32> -> vector<128x8xf32>
    %c1_127 = arith.constant 1 : index
    %c3_128 = arith.constant 3 : index
    %c0_129 = arith.constant 0 : index
    %c0_130 = arith.constant 0 : index
    %169 = vector.load %arg3[%c1_127, %c3_128, %c0_129, %c0_130] : memref<3x4x1x8xf32, #tpu.memory_space<vmem>>, vector<1x1x1x8xf32>
    %170 = vector.shape_cast %169 : vector<1x1x1x8xf32> to vector<1x8xf32>
    %171 = vector.broadcast %170 : vector<1x8xf32> to vector<128x8xf32>
    %172 = arith.addf %168, %171 : vector<128x8xf32>
    %c2_131 = arith.constant 2 : index
    %c3_132 = arith.constant 3 : index
    %c0_133 = arith.constant 0 : index
    %c0_134 = arith.constant 0 : index
    %173 = vector.load %arg2[%c2_131, %c3_132, %c0_133, %c0_134] : memref<3x4x32x8xbf16, #tpu.memory_space<vmem>>, vector<1x1x32x8xbf16>
    %174 = vector.shape_cast %173 : vector<1x1x32x8xbf16> to vector<32x8xbf16>
    %cst_135 = arith.constant dense<0.000000e+00> : vector<128x8xf32>
    %175 = tpu.matmul %1, %174, %cst_135 {dimension_numbers = #tpu.dot_dimension_numbers<[1], [0], [0], [1], [0, 0, 1, 1], [], []>} : vector<128x32xbf16>, vector<32x8xbf16>, vector<128x8xf32> -> vector<128x8xf32>
    %c2_136 = arith.constant 2 : index
    %c3_137 = arith.constant 3 : index
    %c0_138 = arith.constant 0 : index
    %c0_139 = arith.constant 0 : index
    %176 = vector.load %arg3[%c2_136, %c3_137, %c0_138, %c0_139] : memref<3x4x1x8xf32, #tpu.memory_space<vmem>>, vector<1x1x1x8xf32>
    %177 = vector.shape_cast %176 : vector<1x1x1x8xf32> to vector<1x8xf32>
    %178 = vector.broadcast %177 : vector<1x8xf32> to vector<128x8xf32>
    %179 = arith.addf %175, %178 : vector<128x8xf32>
    %180 = vector.shape_cast %165 : vector<128x8xf32> to vector<8x16x8xf32>
    %181 = arith.truncf %180 : vector<8x16x8xf32> to vector<8x16x8xbf16>
    %182 = vector.shape_cast %172 : vector<128x8xf32> to vector<8x16x8xf32>
    %183 = arith.truncf %182 : vector<8x16x8xf32> to vector<8x16x8xbf16>
    %184 = vector.shape_cast %179 : vector<128x8xf32> to vector<8x16x8xf32>
    %185 = arith.truncf %184 : vector<8x16x8xf32> to vector<8x16x8xbf16>
    "tpu.trace_start"() <{level = 10 : i32, message = "bqd,bkd->bqk"}> : () -> ()
    %cst_140 = arith.constant dense<0.000000e+00> : vector<8x16x16xf32>
    %186 = tpu.matmul %181, %183, %cst_140 {dimension_numbers = #tpu.dot_dimension_numbers<[2], [2], [1], [1], [0, 0, 0, 1, 1, 1], [0], [0]>} : vector<8x16x8xbf16>, vector<8x16x8xbf16>, vector<8x16x16xf32> -> vector<8x16x16xf32>
    "tpu.trace_stop"() : () -> ()
    %c3_141 = arith.constant 3 : index
    %c0_142 = arith.constant 0 : index
    %c0_143 = arith.constant 0 : index
    %187 = vector.load %arg4[%c3_141, %c0_142, %c0_143] : memref<4x16x16xbf16, #tpu.memory_space<vmem>>, vector<1x16x16xbf16>
    %188 = vector.shape_cast %187 : vector<1x16x16xbf16> to vector<16x16xbf16>
    %189 = arith.extf %188 : vector<16x16xbf16> to vector<16x16xf32>
    %190 = vector.shape_cast %189 : vector<16x16xf32> to vector<1x16x16xf32>
    %191 = vector.broadcast %190 : vector<1x16x16xf32> to vector<8x16x16xf32>
    %192 = arith.addf %186, %191 : vector<8x16x16xf32>
    %cst_144 = arith.constant dense<0xFF800000> : vector<8x16xf32>
    %193 = vector.multi_reduction <maximumf>, %192, %cst_144 [2] : vector<8x16x16xf32> to vector<8x16xf32>
    %194 = vector.shape_cast %193 : vector<8x16xf32> to vector<8x16x1xf32>
    %195 = vector.broadcast %194 : vector<8x16x1xf32> to vector<8x16x16xf32>
    %196 = arith.subf %192, %195 : vector<8x16x16xf32>
    %197 = math.exp %196 : vector<8x16x16xf32>
    %cst_145 = arith.constant dense<0.000000e+00> : vector<8x16xf32>
    %198 = vector.multi_reduction <add>, %197, %cst_145 [2] : vector<8x16x16xf32> to vector<8x16xf32>
    %199 = vector.shape_cast %198 : vector<8x16xf32> to vector<8x16x1xf32>
    %200 = tpu.reciprocal %199 {approx = true} : vector<8x16x1xf32> -> vector<8x16x1xf32>
    %201 = vector.broadcast %200 : vector<8x16x1xf32> to vector<8x16x16xf32>
    %202 = arith.mulf %197, %201 : vector<8x16x16xf32>
    %203 = arith.truncf %202 : vector<8x16x16xf32> to vector<8x16x16xbf16>
    "tpu.trace_start"() <{level = 10 : i32, message = "bqk,bkd->bqd"}> : () -> ()
    %cst_146 = arith.constant dense<0.000000e+00> : vector<8x16x8xf32>
    %204 = tpu.matmul %203, %185, %cst_146 {dimension_numbers = #tpu.dot_dimension_numbers<[2], [1], [1], [2], [0, 0, 0, 1, 1, 2], [0], [0]>} : vector<8x16x16xbf16>, vector<8x16x8xbf16>, vector<8x16x8xf32> -> vector<8x16x8xf32>
    "tpu.trace_stop"() : () -> ()
    %205 = vector.shape_cast %204 : vector<8x16x8xf32> to vector<128x8xf32>
    %206 = arith.truncf %205 : vector<128x8xf32> to vector<128x8xbf16>
    %c3_147 = arith.constant 3 : index
    %c0_148 = arith.constant 0 : index
    %c0_149 = arith.constant 0 : index
    %207 = vector.load %arg5[%c3_147, %c0_148, %c0_149] : memref<4x8x32xbf16, #tpu.memory_space<vmem>>, vector<1x8x32xbf16>
    %208 = vector.shape_cast %207 : vector<1x8x32xbf16> to vector<8x32xbf16>
    %cst_150 = arith.constant dense<0.000000e+00> : vector<128x32xf32>
    %209 = tpu.matmul %206, %208, %cst_150 {dimension_numbers = #tpu.dot_dimension_numbers<[1], [0], [0], [1], [0, 0, 1, 1], [], []>} : vector<128x8xbf16>, vector<8x32xbf16>, vector<128x32xf32> -> vector<128x32xf32>
    %210 = arith.addf %158, %209 : vector<128x32xf32>
    %c0_151 = arith.constant 0 : index
    %c0_152 = arith.constant 0 : index
    %211 = vector.load %arg6[%c0_151, %c0_152] : memref<1x32xf32, #tpu.memory_space<vmem>>, vector<1x32xf32>
    %212 = vector.shape_cast %211 : vector<1x32xf32> to vector<32xf32>
    %213 = vector.shape_cast %212 : vector<32xf32> to vector<1x32xf32>
    %214 = vector.broadcast %213 : vector<1x32xf32> to vector<128x32xf32>
    %215 = arith.addf %210, %214 : vector<128x32xf32>
    %216 = vector.shape_cast %215 : vector<128x32xf32> to vector<8x16x32xf32>
    %217 = arith.truncf %216 : vector<8x16x32xf32> to vector<8x16x32xbf16>
    %c0_153 = arith.constant 0 : index
    %c0_154 = arith.constant 0 : index
    %c0_155 = arith.constant 0 : index
    %218 = vector.load %arg7[%c0_153, %c0_154, %c0_155] : memref<8x16x32xbf16, #tpu.memory_space<vmem>>, vector<8x16x32xbf16>
    tpu.vector_store %arg7[%c0_153, %c0_154, %c0_155], %217 {strides = array<i32>} : memref<8x16x32xbf16, #tpu.memory_space<vmem>>, vector<8x16x32xbf16>,
    return
  }
  func.func @transform_0(%arg0: i32) -> (i32, i32, i32) {
    %c0_i32 = arith.constant 0 : i32
    %c0_i32_0 = arith.constant 0 : i32
    %c0_i32_1 = arith.constant 0 : i32
    return %arg0, %c0_i32, %c0_i32_0 : i32, i32, i32
  }
  func.func @transform_1(%arg0: i32) -> (i32, i32, i32, i32) {
    %c0_i32 = arith.constant 0 : i32
    %c0_i32_0 = arith.constant 0 : i32
    %c0_i32_1 = arith.constant 0 : i32
    %c0_i32_2 = arith.constant 0 : i32
    %c0_i32_3 = arith.constant 0 : i32
    return %c0_i32, %c0_i32_0, %c0_i32_1, %c0_i32_2 : i32, i32, i32, i32
  }
  func.func @transform_2(%arg0: i32) -> (i32, i32, i32, i32) {
    %c0_i32 = arith.constant 0 : i32
    %c0_i32_0 = arith.constant 0 : i32
    %c0_i32_1 = arith.constant 0 : i32
    %c0_i32_2 = arith.constant 0 : i32
    %c0_i32_3 = arith.constant 0 : i32
    return %c0_i32, %c0_i32_0, %c0_i32_1, %c0_i32_2 : i32, i32, i32, i32
  }
  func.func @transform_3(%arg0: i32) -> (i32, i32, i32) {
    %c0_i32 = arith.constant 0 : i32
    %c0_i32_0 = arith.constant 0 : i32
    %c0_i32_1 = arith.constant 0 : i32
    %c0_i32_2 = arith.constant 0 : i32
    return %c0_i32, %c0_i32_0, %c0_i32_1 : i32, i32, i32
  }
  func.func @transform_4(%arg0: i32) -> (i32, i32, i32) {
    %c0_i32 = arith.constant 0 : i32
    %c0_i32_0 = arith.constant 0 : i32
    %c0_i32_1 = arith.constant 0 : i32
    %c0_i32_2 = arith.constant 0 : i32
    return %c0_i32, %c0_i32_0, %c0_i32_1 : i32, i32, i32
  }
  func.func @transform_5(%arg0: i32) -> (i32, i32) {
    %c0_i32 = arith.constant 0 : i32
    %c0_i32_0 = arith.constant 0 : i32
    %c0_i32_1 = arith.constant 0 : i32
    return %c0_i32, %c0_i32_0 : i32, i32
  }
  func.func @transform_6(%arg0: i32) -> (i32, i32, i32) {
    %c0_i32 = arith.constant 0 : i32
    %c0_i32_0 = arith.constant 0 : i32
    %c0_i32_1 = arith.constant 0 : i32
    return %arg0, %c0_i32, %c0_i32_0 : i32, i32, i32
  }
}

</mosaic_0001>

<bundles_post_ra>
// kernel: tpu_custom_call.1
= control target key start
LH: loop header
LB: loop body
LE: loop exit
PB: predicated region body
PF: predicated region fallthrough
CT: control target
= control target key end

     0   :  { %vm101_vm0 = vcmask 261120   ;;  %s6817_s0 = inlined_call_operand.vmem [shape: bf16[8,16,32], index: 0, kind: input, shape index: {}]   ;;  %s6818_s1 = inlined_call_operand.vmem [shape: bf16[3,4,32,8], index: 1, kind: input, shape index: {}]   ;;  %s6819_s2 = inlined_call_operand.vmem [shape: f32[3,4,1,8], index: 2, kind: input, shape index: {}]   ;;  %s6820_s3 = inlined_call_operand.vmem [shape: bf16[4,16,16], index: 3, kind: input, shape index: {}]   ;;  %s6821_s4 = inlined_call_operand.vmem [shape: bf16[4,8,32], index: 4, kind: input, shape index: {}]   ;;  %s6822_s5 = inlined_call_operand.vmem [shape: f32[1,32], index: 5, kind: input, shape index: {}]   ;;  %s6823_s6 = inlined_call_operand.hbm [shape: bf16[8,16,32], index: 6, kind: output, shape index: {}]  }
   0x1   :  { %v4633_v0 = vld [vmem:[%s6818_s1 + $0x8] sm:$0xff]  ;;  %v4632_v1 = vld [vmem:[%s6818_s1] sm:$0xff]  ;;  %v5053_v3 = vld [vmem:[%s6817_s0 + $0x10] sm:$0xff] }
   0x2   :  { %4675 = vmatpush.bf16.msra.mxu1 %v4633_v0  ;;  %132 = vmatpush.bf16.msra.mxu0 %v4633_v0  ;;  %v4635_v2 = vld [vmem:[%s6818_s1 + $0x48] sm:$0xff]  ;;  %v5058_v4 = vld [vmem:[%s6817_s0] sm:$0xff] }
   0x3   :  { %4676 = vmatpush.bf16.msra.mxu2 %v4633_v0  ;;  %4677 = vmatpush.bf16.msra.mxu3 %v4633_v0 }
   0x6   :  { %4678 = vmatpush.bf16.msra.mxu1 %v4632_v1  ;;  %133 = vmatpush.bf16.msra.mxu0 %v4632_v1 }
   0x7   :  { %11 = vsyncpa [#allocation3], 0  ;;  %v4634_v5 = vld [vmem:[%s6818_s1 + $0x40] sm:$0xff]  ;;  %4679 = vmatpush.bf16.msra.mxu2 %v4632_v1  ;;  %4680 = vmatpush.bf16.msra.mxu3 %v4632_v1  ;;  %v5070_v6 = vld [vmem:[%s6817_s0 + $0x18] sm:$0xff]  ;;  %vm379_vm1 = vcmask 64512   ;;  %vm610_vm2 = vcmask 130048  }
   0x8   :  { %v5075_v7 = vld [vmem:[%s6817_s0 + $0x8] sm:$0xff]  ;;  %v5088_v8 = vld [vmem:[%s6817_s0 + $0x20] sm:$0xff]  ;;  %v5108_v10 = vld [vmem:[%s6817_s0 + $0x30] sm:$0xff]  ;;  %vm1992_vm3 = vcmask 1043456   ;;  %vm4205_vm4 = vcmask 257024   ;;  %s4228_s29 = sshll.u32 %s6823_s6, 4  ;;  %s4229_s29 = int_to_ptr.hbm [resolvable:$true] %s4228_s29 }
   0x9   :  { %4282 = vmatmul.msk.bf16.vlgmr.msra.gmra.mxu1 %vm101_vm0, %v5053_v3  ;;  %4280 = vmatmul.msk.bf16.vlgmr.msra.gmra.mxu0 %vm101_vm0, %v5058_v4  ;;  %v5097_v9 = vld [vmem:[%s6817_s0 + $0x28] sm:$0xff]  ;;  %v5117_v11 = vld [vmem:[%s6817_s0 + $0x38] sm:$0xff]  ;;  %v5132_v18 = vld [vmem:[%s6819_s2 + $0x4] ss:$0 sm:$0xff]  ;;  %s5004_s30 = smov 64  }
   0xa   :  { %203 = vmatpush.bf16.msrb.mxu1 %v4635_v2  ;;  %4284 = vmatmul.msk.bf16.vlgmr.msra.gmra.mxu2 %vm101_vm0, %v5088_v8  ;;  %v5138_v22 = vld [vmem:[%s6819_s2] ss:$0 sm:$0xff] }
   0xb   :  { %4286 = vmatmul.msk.bf16.vlgmr.msra.gmra.mxu3 %vm101_vm0, %v5108_v10 }
   0xe   :  { %204 = vmatpush.bf16.msrb.mxu1 %v4634_v5 }
  0x19   :  { %4283 = vmatmul.msk.bf16.gmra.mxu1 %vm101_vm0, %v5070_v6  ;;  %4281 = vmatmul.msk.bf16.gmra.mxu0 %vm101_vm0, %v5075_v7 }
  0x1a   :  { %4285 = vmatmul.msk.bf16.gmra.mxu2 %vm101_vm0, %v5097_v9 }
  0x1b   :  { %4287 = vmatmul.msk.bf16.gmra.mxu3 %vm101_vm0, %v5117_v11 }
  0x29   :  { %4301 = vmatmul.msk.bf16.vlgmr.msrb.gmra.mxu1 %vm101_vm0, %v5058_v4 }
  0x39   :  { %4302 = vmatmul.msk.bf16.gmra.mxu1 %vm101_vm0, %v5075_v7 }
  0x49   :  { %4303 = vmatmul.msk.bf16.gmra.mxu1 %vm101_vm0, %v5053_v3 }
  0x59   :  { %4304 = vmatmul.msk.bf16.gmra.mxu1 %vm101_vm0, %v5070_v6 }
  0x69   :  { %4305 = vmatmul.msk.bf16.gmra.mxu1 %vm101_vm0, %v5088_v8 }
  0x79   :  { %4306 = vmatmul.msk.bf16.gmra.mxu1 %vm101_vm0, %v5097_v9 }
  0x86   :  { %v145_v12 = vpop.f32.mrf.mxu1  ;;  %v135_v16 = vpop.f32.mrf.mxu0 }
  0x87   :  { %v136_v25 = vadd.f32 %v5138_v22, %v135_v16  ;;  %v146_v63 = vadd.f32 %v5138_v22, %v145_v12 }
  0x89   :  { %4307 = vmatmul.msk.bf16.gmra.mxu1 %vm101_vm0, %v5108_v10  ;;  %v317_v31 = vpack.c.bf16 %v136_v25, %v136_v25 }
  0x8b   :  { %v371_v36 = vunpack.c.l.b16 %v317_v31 }
  0x8d   :  { %v155_v12 = vpop.f32.mrf.mxu2 }
  0x8e   :  { %v147_v13 = vpop.f32.mrf.mxu1  ;;  %v137_v19 = vpop.f32.mrf.mxu0 }
  0x8f   :  { %v138_v26 = vadd.f32 %v5138_v22, %v137_v19  ;;  %v148_v61 = vadd.f32 %v5138_v22, %v147_v13 }
  0x91   :  { %v318_v32 = vpack.c.bf16 %v138_v26, %v138_v26  ;;  %v322_v2 = vpack.c.bf16 %v148_v61, %v148_v61 }
  0x93   :  { %v372_v37 = vunpack.c.l.b16 %v318_v32 }
  0x95   :  { %v373_v39 = vpack.c.b16 %v372_v37, %v371_v36 }
  0x96   :  { %v5123_v14 = vpop.f32.mrf.mxu1  ;;  %v140_v30 = vpop.f32.mrf.mxu0 }
  0x97   :  { %v141_v44 = vadd.f32 %v5138_v22, %v140_v30 }
  0x99   :  { %4308 = vmatmul.msk.bf16.gmra.mxu1 %vm101_vm0, %v5117_v11  ;;  %v319_v49 = vpack.c.bf16 %v141_v44, %v141_v44 }
  0x9b   :  { %v402_v54 = vunpack.c.l.b16 %v319_v49 }
  0x9e   :  { %v5127_v15 = vpop.f32.mrf.mxu1  ;;  %v142_v40 = vpop.f32.mrf.mxu0 }
  0x9f   :  { %v143_v45 = vadd.f32 %v5138_v22, %v142_v40 }
  0xa1   :  { %v320_v50 = vpack.c.bf16 %v143_v45, %v143_v45 }
  0xa3   :  { %v403_v55 = vunpack.c.l.b16 %v320_v50 }
  0xa5   :  { %v404_v57 = vpack.c.b16 %v403_v55, %v402_v54 }
  0xa6   :  { %v206_v17 = vpop.f32.mrf.mxu1 }
  0xa7   :  { %v207_v20 = vadd.f32 %v5132_v18, %v206_v17  ;;  %v321_v17 = vpack.c.bf16 %v146_v63, %v146_v63 }
  0xa9   :  { %v333_v23 = vpack.c.bf16 %v207_v20, %v207_v20  ;;  %v433_v20 = vunpack.c.l.b16 %v322_v2 }
  0xab   :  { %v376_v28 = vunpack.c.l.b16 %v333_v23 }
  0xae   :  { %v208_v21 = vpop.f32.mrf.mxu1 }
  0xaf   :  { %v209_v24 = vadd.f32 %v5132_v18, %v208_v21  ;;  %v432_v21 = vunpack.c.l.b16 %v321_v17 }
  0xb1   :  { %v334_v27 = vpack.c.bf16 %v209_v24, %v209_v24  ;;  %v434_v24 = vpack.c.b16 %v433_v20, %v432_v21 }
  0xb3   :  { %v377_v29 = vunpack.c.l.b16 %v334_v27  ;;  %v153_v27 = vadd.f32 %v5138_v22, %v5127_v15 }
  0xb5   :  { %v378_v33 = vpack.c.b16 %v377_v29, %v376_v28  ;;  %v151_v29 = vadd.f32 %v5138_v22, %v5123_v14  ;;  %v324_v32 = vpack.c.bf16 %v153_v27, %v153_v27  ;;  %v156_v14 = vadd.f32 %v5138_v22, %v155_v12 }
  0xb6   :  { %v211_v34 = vpop.f32.mrf.mxu1 }
  0xb7   :  { %v384_v35 = vsel %vm379_vm1, %v378_v33, 0  ;;  %v212_v38 = vadd.f32 %v5132_v18, %v211_v34  ;;  %v463_v37 = vunpack.c.l.b16 %v324_v32  ;;  %v325_v49 = vpack.c.bf16 %v156_v14, %v156_v14 }
  0xb8   :  { %393 = vmatpush.bf16.xpose.msrb.mxu3 %v384_v35  ;;  %v323_v35 = vpack.c.bf16 %v151_v29, %v151_v29 }
  0xb9   :  { %v335_v42 = vpack.c.bf16 %v212_v38, %v212_v38  ;;  %v157_v38 = vpop.f32.mrf.mxu2  ;;  %v492_v54 = vunpack.c.l.b16 %v325_v49 }
  0xba   :  { %v158_v44 = vadd.f32 %v5138_v22, %v157_v38 }
  0xbb   :  { %v407_v47 = vunpack.c.l.b16 %v335_v42 }
  0xbc   :  { %v326_v50 = vpack.c.bf16 %v158_v44, %v158_v44 }
  0xbe   :  { %v213_v41 = vpop.f32.mrf.mxu1  ;;  %v493_v55 = vunpack.c.l.b16 %v326_v50 }
  0xbf   :  { %v214_v43 = vadd.f32 %v5132_v18, %v213_v41  ;;  %4330 = vmatmul.msk.bf16.vlgmr.msrb.gmra.mxu3 %vm379_vm1, %v373_v39  ;;  %v462_v39 = vunpack.c.l.b16 %v323_v35 }
  0xc1   :  { %v336_v46 = vpack.c.bf16 %v214_v43, %v214_v43  ;;  %v464_v41 = vpack.c.b16 %v463_v37, %v462_v39 }
  0xc3   :  { %v408_v48 = vunpack.c.l.b16 %v336_v46 }
  0xc5   :  { %v409_v51 = vpack.c.b16 %v408_v48, %v407_v47  ;;  %v160_v48 = vpop.f32.mrf.mxu2 }
  0xc6   :  { %v216_v52 = vpop.f32.mrf.mxu1  ;;  %v161_v63 = vadd.f32 %v5138_v22, %v160_v48 }
  0xc7   :  { %v414_v53 = vsel %vm379_vm1, %v409_v51, 0  ;;  %v217_v56 = vadd.f32 %v5132_v18, %v216_v52 }
  0xc8   :  { %423 = vmatpush.bf16.xpose.msra.mxu3 %v414_v53 }
  0xc9   :  { %v337_v59 = vpack.c.bf16 %v217_v56, %v217_v56 }
  0xcb   :  { %v437_v0 = vunpack.c.l.b16 %v337_v59 }
  0xce   :  { %v218_v58 = vpop.f32.mrf.mxu1 }
  0xcf   :  { %v219_v60 = vadd.f32 %v5132_v18, %v218_v58  ;;  %4331 = vmatmul.msk.bf16.vlgmr.msra.gmra.mxu3 %vm379_vm1, %v404_v57  ;;  %v494_v57 = vpack.c.b16 %v493_v55, %v492_v54  ;;  %v162_v58 = vpop.f32.mrf.mxu2 }
  0xd1   :  { %v338_v62 = vpack.c.bf16 %v219_v60, %v219_v60  ;;  %v165_v60 = vpop.f32.mrf.mxu3 }
  0xd3   :  { %v438_v1 = vunpack.c.l.b16 %v338_v62 }
  0xd5   :  { %v439_v5 = vpack.c.b16 %v438_v1, %v437_v0  ;;  %v163_v0 = vadd.f32 %v5138_v22, %v162_v58 }
  0xd6   :  { %v221_v16 = vpop.f32.mrf.mxu1 }
  0xd7   :  { %v444_v19 = vsel %vm379_vm1, %v439_v5, 0  ;;  %v222_v23 = vadd.f32 %v5132_v18, %v221_v16  ;;  %v327_v16 = vpack.c.bf16 %v161_v63, %v161_v63  ;;  %v328_v17 = vpack.c.bf16 %v163_v0, %v163_v0 }
  0xd8   :  { %453 = vmatpush.bf16.xpose.msrb.mxu3 %v444_v19 }
  0xd9   :  { %v339_v26 = vpack.c.bf16 %v222_v23, %v222_v23  ;;  %v167_v23 = vpop.f32.mrf.mxu3 }
  0xdb   :  { %v467_v30 = vunpack.c.l.b16 %v339_v26 }
  0xde   :  { %v223_v25 = vpop.f32.mrf.mxu1 }
  0xdf   :  { %v224_v13 = vadd.f32 %v5132_v18, %v223_v25  ;;  %4332 = vmatmul.msk.bf16.vlgmr.msrb.gmra.mxu3 %vm379_vm1, %v434_v24  ;;  %v522_v24 = vunpack.c.l.b16 %v327_v16  ;;  %v523_v25 = vunpack.c.l.b16 %v328_v17 }
  0xe1   :  { %v340_v28 = vpack.c.bf16 %v224_v13, %v224_v13  ;;  %v524_v13 = vpack.c.b16 %v523_v25, %v522_v24 }
  0xe3   :  { %v468_v31 = vunpack.c.l.b16 %v340_v28  ;;  %v166_v28 = vadd.f32 %v5138_v22, %v165_v60 }
  0xe5   :  { %v469_v33 = vpack.c.b16 %v468_v31, %v467_v30  ;;  %v168_v30 = vadd.f32 %v5138_v22, %v167_v23 }
  0xe6   :  { %v226_v34 = vpop.f32.mrf.mxu1 }
  0xe7   :  { %v474_v36 = vsel %vm379_vm1, %v469_v33, 0  ;;  %v227_v40 = vadd.f32 %v5132_v18, %v226_v34  ;;  %v170_v33 = vpop.f32.mrf.mxu3  ;;  %v329_v34 = vpack.c.bf16 %v166_v28, %v166_v28 }
  0xe8   :  { %483 = vmatpush.bf16.xpose.msra.mxu3 %v474_v36  ;;  %v330_v36 = vpack.c.bf16 %v168_v30, %v168_v30 }
  0xe9   :  { %v341_v42 = vpack.c.bf16 %v227_v40, %v227_v40  ;;  %v552_v39 = vunpack.c.l.b16 %v329_v34 }
  0xea   :  { %v553_v40 = vunpack.c.l.b16 %v330_v36 }
  0xeb   :  { %v497_v46 = vunpack.c.l.b16 %v341_v42 }
  0xec   :  { %v554_v42 = vpack.c.b16 %v553_v40, %v552_v39 }
  0xee   :  { %v228_v15 = vpop.f32.mrf.mxu1 }
  0xef   :  { %v229_v43 = vadd.f32 %v5132_v18, %v228_v15  ;;  %4333 = vmatmul.msk.bf16.vlgmr.msra.gmra.mxu3 %vm379_vm1, %v464_v41 }
  0xf1   :  { %v342_v45 = vpack.c.bf16 %v229_v43, %v229_v43  ;;  %v172_v43 = vpop.f32.mrf.mxu3 }
  0xf3   :  { %v498_v47 = vunpack.c.l.b16 %v342_v45  ;;  %v171_v45 = vadd.f32 %v5138_v22, %v170_v33 }
  0xf5   :  { %v499_v51 = vpack.c.b16 %v498_v47, %v497_v46  ;;  %v173_v47 = vadd.f32 %v5138_v22, %v172_v43  ;;  %v331_v50 = vpack.c.bf16 %v171_v45, %v171_v45 }
  0xf6   :  { %v231_v52 = vpop.f32.mrf.mxu1 }
  0xf7   :  { %v504_v53 = vsel %vm379_vm1, %v499_v51, 0  ;;  %v232_v56 = vadd.f32 %v5132_v18, %v231_v52  ;;  %v332_v52 = vpack.c.bf16 %v173_v47, %v173_v47  ;;  %v582_v54 = vunpack.c.l.b16 %v331_v50 }
  0xf8   :  { %513 = vmatpush.bf16.xpose.msrb.mxu3 %v504_v53 }
  0xf9   :  { %v343_v61 = vpack.c.bf16 %v232_v56, %v232_v56  ;;  %v583_v55 = vunpack.c.l.b16 %v332_v52 }
  0xfb   :  { %v527_v2 = vunpack.c.l.b16 %v343_v61 }
  0xfe   :  { %v233_v59 = vpop.f32.mrf.mxu1 }
  0xff   :  { %v234_v62 = vadd.f32 %v5132_v18, %v233_v59  ;;  %4334 = vmatmul.msk.bf16.vlgmr.msrb.gmra.mxu3 %vm379_vm1, %v494_v57  ;;  %v584_v57 = vpack.c.b16 %v583_v55, %v582_v54 }
 0x101   :  { %v344_v1 = vpack.c.bf16 %v234_v62, %v234_v62 }
 0x103   :  { %v528_v5 = vunpack.c.l.b16 %v344_v1 }
 0x105   :  { %v529_v19 = vpack.c.b16 %v528_v5, %v527_v2 }
 0x106   :  { %v236_v20 = vpop.f32.mrf.mxu1 }
 0x107   :  { %v534_v21 = vsel %vm379_vm1, %v529_v19, 0  ;;  %v237_v26 = vadd.f32 %v5132_v18, %v236_v20 }
 0x108   :  { %543 = vmatpush.bf16.xpose.msra.mxu3 %v534_v21 }
 0x109   :  { %v345_v12 = vpack.c.bf16 %v237_v26, %v237_v26 }
 0x10b   :  { %v557_v31 = vunpack.c.l.b16 %v345_v12 }
 0x10e   :  { %v238_v27 = vpop.f32.mrf.mxu1 }
 0x10f   :  { %4335 = vmatmul.msk.bf16.vlgmr.msra.gmra.mxu3 %vm379_vm1, %v524_v13  ;;  %v239_v29 = vadd.f32 %v5132_v18, %v238_v27  ;;  %v4637_v13 = vld [vmem:[%s6818_s1 + $0x88] sm:$0xff] }
 0x110   :  { %274 = vmatpush.bf16.msrb.mxu2 %v4637_v13 }
 0x111   :  { %v346_v32 = vpack.c.bf16 %v239_v29, %v239_v29  ;;  %v4636_v29 = vld [vmem:[%s6818_s1 + $0x80] sm:$0xff] }
 0x113   :  { %v558_v35 = vunpack.c.l.b16 %v346_v32 }
 0x114   :  { %275 = vmatpush.bf16.msrb.mxu2 %v4636_v29 }
 0x115   :  { %v559_v37 = vpack.c.b16 %v558_v35, %v557_v31 }
 0x116   :  { %v241_v38 = vpop.f32.mrf.mxu1 }
 0x117   :  { %v564_v41 = vsel %vm379_vm1, %v559_v37, 0  ;;  %v242_v15 = vadd.f32 %v5132_v18, %v241_v38  ;;  %4322 = vmatmul.msk.bf16.vlgmr.msrb.gmra.mxu2 %vm101_vm0, %v5058_v4 }
 0x118   :  { %573 = vmatpush.bf16.xpose.msrb.mxu3 %v564_v41 }
 0x119   :  { %v347_v14 = vpack.c.bf16 %v242_v15, %v242_v15 }
 0x11b   :  { %v587_v48 = vunpack.c.l.b16 %v347_v14 }
 0x11e   :  { %v243_v44 = vpop.f32.mrf.mxu1 }
 0x11f   :  { %v244_v46 = vadd.f32 %v5132_v18, %v243_v44  ;;  %4336 = vmatmul.msk.bf16.vlgmr.msrb.gmra.mxu3 %vm379_vm1, %v554_v42  ;;  %v4657_v18 = vld [vmem:[%s6820_s3] sm:$0xff]  }
 0x120   :  { %v5192_v58 = vunpack.c.l.bf16 %v4657_v18  ;;  %v5196_v61 = vunpack.c.h.bf16 %v4657_v18 }
 0x121   :  { %v348_v49 = vpack.c.bf16 %v244_v46, %v244_v46 }
 0x123   :  { %v588_v51 = vunpack.c.l.b16 %v348_v49 }
 0x125   :  { %v589_v53 = vpack.c.b16 %v588_v51, %v587_v48 }
 0x127   :  { %v594_v56 = vsel %vm379_vm1, %v589_v53, 0  ;;  %4323 = vmatmul.msk.bf16.gmra.mxu2 %vm101_vm0, %v5075_v7 }
 0x128   :  { %603 = vmatpush.bf16.xpose.msra.mxu3 %v594_v56 }
 0x12f   :  { %4337 = vmatmul.msk.bf16.vlgmr.msra.gmra.mxu3 %vm379_vm1, %v584_v57 }
 0x137   :  { %4324 = vmatmul.msk.bf16.gmra.mxu2 %vm101_vm0, %v5053_v3 }
 0x142   :  { %v395_v22 = vpop.f32.mrf.mxu3 }
 0x143   :  { %v396_v59 = vadd.f32 %v5192_v58, %v395_v22 }
 0x145   :  { %v611_v60 = vsel %vm610_vm2, %v396_v59, -inf }
 0x146   :  { %612 = vmax.xlane.f32.xlu1 %v611_v60 }
 0x147   :  { %4325 = vmatmul.msk.bf16.gmra.mxu2 %vm101_vm0, %v5070_v6 }
 0x14a   :  { %v397_v62 = vpop.f32.mrf.mxu3 }
 0x14b   :  { %v398_v63 = vadd.f32 %v5196_v61, %v397_v62 }
 0x14d   :  { %v614_v0 = vsel %vm610_vm2, %v398_v63, -inf }
 0x14e   :  { %615 = vmax.xlane.f32.xlu1 %v614_v0 }
 0x152   :  { %v425_v1 = vpop.f32.mrf.mxu3 }
 0x153   :  { %v426_v2 = vadd.f32 %v5192_v58, %v425_v1 }
 0x155   :  { %v617_v5 = vsel %vm610_vm2, %v426_v2, -inf }
 0x156   :  { %618 = vmax.xlane.f32.xlu0 %v617_v5 }
 0x157   :  { %4326 = vmatmul.msk.bf16.gmra.mxu2 %vm101_vm0, %v5088_v8 }
 0x15a   :  { %v427_v16 = vpop.f32.mrf.mxu3 }
 0x15b   :  { %v428_v17 = vadd.f32 %v5196_v61, %v427_v16 }
 0x15d   :  { %v620_v19 = vsel %vm610_vm2, %v428_v17, -inf }
 0x15e   :  { %621 = vmax.xlane.f32.xlu0 %v620_v19 }
 0x162   :  { %v5204_v20 = vpop.f32.mrf.mxu3 }
 0x167   :  { %4327 = vmatmul.msk.bf16.gmra.mxu2 %vm101_vm0, %v5097_v9 }
 0x16a   :  { %v5206_v21 = vpop.f32.mrf.mxu3 }
 0x172   :  { %v5208_v23 = vpop.f32.mrf.mxu3 }
 0x177   :  { %4328 = vmatmul.msk.bf16.gmra.mxu2 %vm101_vm0, %v5108_v10 }
 0x17a   :  { %v5210_v24 = vpop.f32.mrf.mxu3 }
 0x17b   :  { %v5269_v60 = vadd.f32 %v5196_v61, %v5210_v24 }
 0x182   :  { %v515_v25 = vpop.f32.mrf.mxu3 }
 0x183   :  { %v516_v26 = vadd.f32 %v5192_v58, %v515_v25 }
 0x185   :  { %v635_v12 = vsel %vm610_vm2, %v516_v26, -inf }
 0x186   :  { %636 = vmax.xlane.f32.xlu0 %v635_v12  ;;  %v5283_v12 = vld [vmem:[%s6819_s2 + $0x8] ss:$0 sm:$0xff] }
 0x187   :  { %4329 = vmatmul.msk.bf16.gmra.mxu2 %vm101_vm0, %v5117_v11  ;;  %v632_v11 = vsel %vm610_vm2, %v5269_v60, -inf }
 0x18a   :  { %v517_v27 = vpop.f32.mrf.mxu3 }
 0x18b   :  { %v5218_v28 = vadd.f32 %v5196_v61, %v517_v27 }
 0x18d   :  { %v638_v30 = vsel %vm610_vm2, %v5218_v28, -inf }
 0x18e   :  { %639 = vmax.xlane.f32.xlu1 %v638_v30 }
 0x192   :  { %v545_v31 = vpop.f32.mrf.mxu3 }
 0x193   :  { %v546_v32 = vadd.f32 %v5192_v58, %v545_v31 }
 0x195   :  { %v641_v33 = vsel %vm610_vm2, %v546_v32, -inf }
 0x196   :  { %642 = vmax.xlane.f32.xlu2 %v641_v33 }
 0x19a   :  { %v547_v34 = vpop.f32.mrf.mxu3  ;;  %v277_v13 = vpop.f32.mrf.mxu2 }
 0x19b   :  { %v548_v35 = vadd.f32 %v5196_v61, %v547_v34 }
 0x19d   :  { %v644_v36 = vsel %vm610_vm2, %v548_v35, -inf }
 0x19e   :  { %645 = vmax.xlane.f32.xlu2 %v644_v36  ;;  %v5297_v36 = vadd.f32 %v5192_v58, %v5208_v23 }
 0x1a2   :  { %v279_v34 = vpop.f32.mrf.mxu2 }
 0x1b9   :  { %v613_v37 = vpop.xlane.xlu1 %612 }
 0x1ba   :  { %v659_v38 = vsub.f32 %v396_v59, %v613_v37  ;;  %v5265_v59 = vpop.f32.mrf.mxu3 }
 0x1bc   :  { %v675_v39 = vmul.f32 1.442695, %v659_v38 }
 0x1be   :  { %4697 = vpow2.f32 %v675_v39 }
 0x1c1   :  { %v616_v15 = vpop.xlane.xlu1 %615 }
 0x1c2   :  { %v660_v14 = vsub.f32 %v398_v63, %v616_v15  ;;  %v629_v15 = vsel %vm610_vm2, %v5297_v36, -inf }
 0x1c4   :  { %v5237_v40 = vpop.eup %4697  ;;  %v677_v45 = vmul.f32 1.442695, %v660_v14 }
 0x1c5   :  { %v707_v41 = vsel %vm610_vm2, %v5237_v40, 0.0 }
 0x1c6   :  { %708 = vadd.xlane.f32.xlu1 %v707_v41 }
 0x1c9   :  { %v619_v42 = vpop.xlane.xlu0 %618 }
 0x1ca   :  { %v661_v43 = vsub.f32 %v426_v2, %v619_v42 }
 0x1cc   :  { %v679_v44 = vmul.f32 1.442695, %v661_v43 }
 0x1ce   :  { %4699 = vpow2.f32 %v679_v44  ;;  %v282_v44 = vpop.f32.mrf.mxu2 }
 0x1cf   :  { %4701 = vpow2.f32 %v677_v45  ;;  %v283_v45 = vadd.f32 %v5283_v12, %v282_v44 }
 0x1d1   :  { %v622_v46 = vpop.xlane.xlu0 %621 }
 0x1d2   :  { %v662_v47 = vsub.f32 %v428_v17, %v622_v46  ;;  %v5274_v17 = vpop.f32.mrf.mxu3 }
 0x1d4   :  { %v5243_v48 = vpop.eup %4699  ;;  %v681_v49 = vmul.f32 1.442695, %v662_v47  ;;  %v351_v47 = vpack.c.bf16 %v283_v45, %v283_v45 }
 0x1d5   :  { %v713_v50 = vsel %vm610_vm2, %v5243_v48, 0.0  ;;  %v5247_v51 = vpop.eup %4701 }
 0x1d6   :  { %4703 = vpow2.f32 %v681_v49  ;;  %714 = vadd.xlane.f32.xlu2 %v713_v50  ;;  %v710_v54 = vsel %vm610_vm2, %v5247_v51, 0.0  ;;  %v284_v49 = vpop.f32.mrf.mxu2 }
 0x1d7   :  { %v285_v50 = vadd.f32 %v5283_v12, %v284_v49 }
 0x1da   :  { %v605_v30 = vpop.f32.mrf.mxu3 }
 0x1db   :  { %v5300_v37 = vadd.f32 %v5192_v58, %v605_v30 }
 0x1dc   :  { %v5249_v52 = vpop.eup %4703 }
 0x1dd   :  { %v716_v53 = vsel %vm610_vm2, %v5249_v52, 0.0  ;;  %v653_v42 = vsel %vm610_vm2, %v5300_v37, -inf }
 0x1de   :  { %717 = vadd.xlane.f32.xlu0 %v716_v53  ;;  %711 = vadd.xlane.f32.xlu2 %v710_v54  ;;  %v838_v53 = vunpack.c.l.b16 %v351_v47  ;;  %v352_v54 = vpack.c.bf16 %v285_v50, %v285_v50 }
 0x1e2   :  { %v607_v43 = vpop.f32.mrf.mxu3 }
 0x1e3   :  { %v5307_v23 = vadd.f32 %v5196_v61, %v607_v43 }
 0x1e5   :  { %v656_v46 = vsel %vm610_vm2, %v5307_v23, -inf }
 0x1f9   :  { %v637_v55 = vpop.xlane.xlu0 %636 }
 0x1fa   :  { %v667_v56 = vsub.f32 %v516_v26, %v637_v55  ;;  %v839_v55 = vunpack.c.l.b16 %v352_v54 }
 0x1fc   :  { %v691_v57 = vmul.f32 1.442695, %v667_v56  ;;  %v840_v56 = vpack.c.b16 %v839_v55, %v838_v53 }
 0x1fe   :  { %4705 = vpow2.f32 %v691_v57  ;;  %v287_v57 = vpop.f32.mrf.mxu2  ;;  %852 = vmatpush.bf16.msra.mxu1 %v840_v56 }
 0x201   :  { %v640_v62 = vpop.xlane.xlu1 %639 }
 0x202   :  { %v668_v1 = vsub.f32 %v5218_v28, %v640_v62  ;;  %v278_v28 = vadd.f32 %v5283_v12, %v277_v13 }
 0x204   :  { %v5261_v18 = vpop.eup %4705  ;;  %v693_v5 = vmul.f32 1.442695, %v668_v1  ;;  %v349_v33 = vpack.c.bf16 %v278_v28, %v278_v28 }
 0x205   :  { %v731_v22 = vsel %vm610_vm2, %v5261_v18, 0.0 }
 0x206   :  { %732 = vadd.xlane.f32.xlu2 %v731_v22  ;;  %v810_v38 = vunpack.c.l.b16 %v349_v33  ;;  %v288_v22 = vadd.f32 %v5283_v12, %v287_v57  ;;  %v289_v62 = vpop.f32.mrf.mxu2 }
 0x209   :  { %v643_v63 = vpop.xlane.xlu2 %642 }
 0x20a   :  { %v669_v0 = vsub.f32 %v546_v32, %v643_v63  ;;  %v353_v63 = vpack.c.bf16 %v288_v22, %v288_v22 }
 0x20c   :  { %v695_v2 = vmul.f32 1.442695, %v669_v0  ;;  %v290_v0 = vadd.f32 %v5283_v12, %v289_v62  ;;  %v866_v1 = vunpack.c.l.b16 %v353_v63 }
 0x20e   :  { %4707 = vpow2.f32 %v695_v2  ;;  %633 = vmax.xlane.f32.xlu2 %v632_v11  ;;  %v354_v2 = vpack.c.bf16 %v290_v0, %v290_v0 }
 0x20f   :  { %4709 = vpow2.f32 %v693_v5 }
 0x210   :  { %v867_v11 = vunpack.c.l.b16 %v354_v2 }
 0x211   :  { %v646_v16 = vpop.xlane.xlu2 %645 }
 0x212   :  { %v670_v19 = vsub.f32 %v548_v35, %v646_v16  ;;  %v280_v35 = vadd.f32 %v5283_v12, %v279_v34  ;;  %v868_v5 = vpack.c.b16 %v867_v11, %v866_v1  ;;  %v292_v16 = vpop.f32.mrf.mxu2 }
 0x214   :  { %v5276_v25 = vpop.eup %4707  ;;  %v697_v24 = vmul.f32 1.442695, %v670_v19  ;;  %v350_v39 = vpack.c.bf16 %v280_v35, %v280_v35  ;;  %880 = vmatpush.bf16.msra.mxu2 %v868_v5 }
 0x215   :  { %v737_v26 = vsel %vm610_vm2, %v5276_v25, 0.0  ;;  %v5285_v27 = vpop.eup %4709 }
 0x216   :  { %4711 = vpow2.f32 %v697_v24  ;;  %738 = vadd.xlane.f32.xlu0 %v737_v26  ;;  %v734_v32 = vsel %vm610_vm2, %v5285_v27, 0.0  ;;  %v811_v41 = vunpack.c.l.b16 %v350_v39  ;;  %v293_v26 = vadd.f32 %v5283_v12, %v292_v16 }
 0x218   :  { %v812_v14 = vpack.c.b16 %v811_v41, %v810_v38  ;;  %v355_v13 = vpack.c.bf16 %v293_v26, %v293_v26 }
 0x21a   :  { %824 = vmatpush.bf16.msrb.mxu0 %v812_v14  ;;  %v294_v28 = vpop.f32.mrf.mxu2  ;;  %v894_v35 = vunpack.c.l.b16 %v355_v13 }
 0x21c   :  { %v5288_v29 = vpop.eup %4711 }
 0x21d   :  { %v740_v31 = vsel %vm610_vm2, %v5288_v29, 0.0 }
 0x21e   :  { %741 = vadd.xlane.f32.xlu1 %v740_v31  ;;  %735 = vadd.xlane.f32.xlu0 %v734_v32  ;;  %v295_v32 = vadd.f32 %v5283_v12, %v294_v28 }
 0x220   :  { %v356_v38 = vpack.c.bf16 %v295_v32, %v295_v32 }
 0x222   :  { %v895_v41 = vunpack.c.l.b16 %v356_v38  ;;  %v297_v14 = vpop.f32.mrf.mxu2  ;;  %v4639_v38 = vld [vmem:[%s6818_s1 + $0x18] sm:$0xff] }
 0x223   :  { %v298_v53 = vadd.f32 %v5283_v12, %v297_v14 }
 0x225   :  { %v357_v22 = vpack.c.bf16 %v298_v53, %v298_v53 }
 0x226   :  { %630 = vmax.xlane.f32.xlu1 %v629_v15  ;;  %654 = vmax.xlane.f32.xlu0 %v653_v42  ;;  %v896_v42 = vpack.c.b16 %v895_v41, %v894_v35  ;;  %v4641_v35 = vld [vmem:[%s6818_s1 + $0x58] sm:$0xff]  ;;  %v4640_v41 = vld [vmem:[%s6818_s1 + $0x50] sm:$0xff] }
 0x227   :  { %v922_v0 = vunpack.c.l.b16 %v357_v22 }
 0x228   :  { %908 = vmatpush.bf16.msrb.mxu3 %v896_v42  ;;  %v4638_v42 = vld [vmem:[%s6818_s1 + $0x10] sm:$0xff] }
 0x22a   :  { %v299_v63 = vpop.f32.mrf.mxu2 }
 0x22e   :  { %657 = vmax.xlane.f32.xlu1 %v656_v46 }
 0x232   :  { %v302_v11 = vpop.f32.mrf.mxu2 }
 0x233   :  { %v303_v5 = vadd.f32 %v5283_v12, %v302_v11 }
 0x235   :  { %v359_v16 = vpack.c.bf16 %v303_v5, %v303_v5 }
 0x237   :  { %v950_v26 = vunpack.c.l.b16 %v359_v16 }
 0x239   :  { %v709_v24 = vpop.xlane.xlu1 %708 }
 0x249   :  { %v715_v19 = vpop.xlane.xlu2 %714 }
 0x24a   :  { %4713 = vrcp.f32 %v715_v19  ;;  %v304_v19 = vpop.f32.mrf.mxu2 }
 0x24b   :  { %4715 = vrcp.f32 %v709_v24  ;;  %v305_v24 = vadd.f32 %v5283_v12, %v304_v19 }
 0x24d   :  { %v360_v13 = vpack.c.bf16 %v305_v24, %v305_v24 }
 0x24f   :  { %v951_v28 = vunpack.c.l.b16 %v360_v13  ;;  %v5375_v13 = vadd.f32 %v5196_v61, %v5206_v21 }
 0x250   :  { %v4714_v33 = vpop.eup %4713 }
 0x251   :  { %v718_v30 = vpop.xlane.xlu0 %717  ;;  %v712_v31 = vpop.xlane.xlu2 %711  ;;  %v773_v39 = vmul.f32 %v4714_v33, %v5243_v48 }
 0x252   :  { %4717 = vrcp.f32 %v718_v30  ;;  %v4716_v34 = vpop.eup %4715  ;;  %v952_v30 = vpack.c.b16 %v951_v28, %v950_v26 }
 0x253   :  { %4719 = vrcp.f32 %v712_v31  ;;  %v771_v15 = vmul.f32 %v4716_v34, %v5237_v40  ;;  %v789_v45 = vpack.c.bf16 %v773_v39, %v773_v39 }
 0x254   :  { %964 = vmatpush.bf16.msrb.mxu1 %v952_v30 }
 0x255   :  { %v787_v47 = vpack.c.bf16 %v771_v15, %v771_v15  ;;  %v833_v55 = vunpack.c.l.b16 %v789_v45 }
 0x257   :  { %v805_v56 = vunpack.c.l.b16 %v787_v47 }
 0x258   :  { %v4718_v43 = vpop.eup %4717 }
 0x259   :  { %v4720_v44 = vpop.eup %4719  ;;  %v774_v46 = vmul.f32 %v4718_v43, %v5249_v52  ;;  %v300_v52 = vadd.f32 %v5283_v12, %v299_v63  ;;  %v5346_v43 = vadd.f32 %v5192_v58, %v5204_v20  ;;  %v5354_v20 = vadd.f32 %v5196_v61, %v5274_v17 }
 0x25a   :  { %v772_v49 = vmul.f32 %v4720_v44, %v5247_v51 }
 0x25b   :  { %v790_v50 = vpack.c.bf16 %v774_v46, %v774_v46  ;;  %v358_v51 = vpack.c.bf16 %v300_v52, %v300_v52  ;;  %v650_v17 = vsel %vm610_vm2, %v5354_v20, -inf }
 0x25c   :  { %v788_v54 = vpack.c.bf16 %v772_v49, %v772_v49  ;;  %v623_v49 = vsel %vm610_vm2, %v5346_v43, -inf }
 0x25d   :  { %v834_v48 = vunpack.c.l.b16 %v790_v50  ;;  %v923_v1 = vunpack.c.l.b16 %v358_v51 }
 0x25e   :  { %v806_v57 = vunpack.c.l.b16 %v788_v54 }
 0x25f   :  { %v835_v40 = vpack.c.b16 %v834_v48, %v833_v55  ;;  %v924_v2 = vpack.c.b16 %v923_v1, %v922_v0 }
 0x260   :  { %v807_v62 = vpack.c.b16 %v806_v57, %v805_v56 }
 0x261   :  { %4339 = vmatmul.msk.bf16.vlgmr.msra.gmra.mxu1 %vm610_vm2, %v835_v40  ;;  %936 = vmatpush.bf16.msra.mxu0 %v924_v2 }
 0x262   :  { %4338 = vmatmul.msk.bf16.vlgmr.msrb.gmra.mxu0 %vm610_vm2, %v807_v62  ;;  %1135 = vmatpush.bf16.msra.mxu1 %v4641_v35 }
 0x265   :  { %1064 = vmatpush.bf16.msrb.mxu0 %v4639_v38 }
 0x266   :  { %1136 = vmatpush.bf16.msra.mxu1 %v4640_v41 }
 0x269   :  { %1065 = vmatpush.bf16.msrb.mxu0 %v4638_v42 }
 0x279   :  { %v733_v31 = vpop.xlane.xlu2 %732 }
 0x281   :  { %v634_v32 = vpop.xlane.xlu2 %633 }
 0x282   :  { %v666_v33 = vsub.f32 %v5269_v60, %v634_v32 }
 0x284   :  { %v689_v34 = vmul.f32 1.442695, %v666_v33 }
 0x286   :  { %4721 = vpow2.f32 %v689_v34 }
 0x287   :  { %4723 = vrcp.f32 %v733_v31  ;;  %v5387_v31 = vadd.f32 %v5192_v58, %v5265_v59 }
 0x289   :  { %v739_v39 = vpop.xlane.xlu0 %738  ;;  %v647_v61 = vsel %vm610_vm2, %v5387_v31, -inf }
 0x28a   :  { %4725 = vrcp.f32 %v739_v39 }
 0x28c   :  { %v5337_v15 = vpop.eup %4721 }
 0x28d   :  { %v728_v60 = vsel %vm610_vm2, %v5337_v15, 0.0  ;;  %v4724_v45 = vpop.eup %4723 }
 0x28e   :  { %729 = vadd.xlane.f32.xlu0 %v728_v60  ;;  %v779_v47 = vmul.f32 %v4724_v45, %v5261_v18 }
 0x290   :  { %v4726_v46 = vpop.eup %4725  ;;  %v795_v55 = vpack.c.bf16 %v779_v47, %v779_v47 }
 0x291   :  { %v736_v14 = vpop.xlane.xlu0 %735  ;;  %v742_v44 = vpop.xlane.xlu1 %741  ;;  %v781_v50 = vmul.f32 %v4726_v46, %v5276_v25 }
 0x292   :  { %4727 = vrcp.f32 %v736_v14  ;;  %v917_v51 = vunpack.c.l.b16 %v795_v55 }
 0x293   :  { %4729 = vrcp.f32 %v742_v44  ;;  %v797_v40 = vpack.c.bf16 %v781_v50, %v781_v50 }
 0x295   :  { %v945_v2 = vunpack.c.l.b16 %v797_v40 }
 0x296   :  { %624 = vmax.xlane.f32.xlu0 %v623_v49 }
 0x298   :  { %v4728_v53 = vpop.eup %4727 }
 0x299   :  { %v4730_v54 = vpop.eup %4729  ;;  %v780_v48 = vmul.f32 %v4728_v53, %v5285_v27  ;;  %v655_v56 = vpop.xlane.xlu0 %654 }
 0x29a   :  { %v631_v57 = vpop.xlane.xlu1 %630  ;;  %v782_v18 = vmul.f32 %v4730_v54, %v5288_v29  ;;  %v673_v22 = vsub.f32 %v5300_v37, %v655_v56 }
 0x29b   :  { %v665_v62 = vsub.f32 %v5297_v36, %v631_v57  ;;  %v796_v25 = vpack.c.bf16 %v780_v48, %v780_v48 }
 0x29c   :  { %v798_v63 = vpack.c.bf16 %v782_v18, %v782_v18  ;;  %v703_v52 = vmul.f32 1.442695, %v673_v22 }
 0x29d   :  { %v687_v0 = vmul.f32 1.442695, %v665_v62  ;;  %v918_v1 = vunpack.c.l.b16 %v796_v25 }
 0x29e   :  { %v946_v27 = vunpack.c.l.b16 %v798_v63  ;;  %4731 = vpow2.f32 %v703_v52  ;;  %651 = vmax.xlane.f32.xlu0 %v650_v17  ;;  %v5447_v52 = vld [vmem:[%s6817_s0 + $0x38] sm:$0xff] }
 0x29f   :  { %v919_v11 = vpack.c.b16 %v918_v1, %v917_v51  ;;  %4733 = vpow2.f32 %v687_v0 }
 0x2a0   :  { %v947_v29 = vpack.c.b16 %v946_v27, %v945_v2 }
 0x2a1   :  { %4342 = vmatmul.msk.bf16.vlgmr.msra.gmra.mxu0 %vm610_vm2, %v919_v11 }
 0x2a2   :  { %v658_v37 = vpop.xlane.xlu1 %657  ;;  %4343 = vmatmul.msk.bf16.vlgmr.msrb.gmra.mxu1 %vm610_vm2, %v947_v29 }
 0x2a3   :  { %v674_v36 = vsub.f32 %v5307_v23, %v658_v37  ;;  %v626_v23 = vsel %vm610_vm2, %v5375_v13, -inf }
 0x2a4   :  { %v5365_v5 = vpop.eup %4731 }
 0x2a5   :  { %v705_v16 = vmul.f32 1.442695, %v674_v36  ;;  %v5367_v19 = vpop.eup %4733  ;;  %v749_v24 = vsel %vm610_vm2, %v5365_v5, 0.0 }
 0x2a6   :  { %750 = vadd.xlane.f32.xlu1 %v749_v24  ;;  %v725_v26 = vsel %vm610_vm2, %v5367_v19, 0.0 }
 0x2a7   :  { %4735 = vpow2.f32 %v705_v16  ;;  %726 = vadd.xlane.f32.xlu2 %v725_v26 }
 0x2ad   :  { %v5377_v28 = vpop.eup %4735 }
 0x2ae   :  { %v752_v30 = vsel %vm610_vm2, %v5377_v28, 0.0  ;;  %627 = vmax.xlane.f32.xlu1 %v626_v23 }
 0x2af   :  { %753 = vadd.xlane.f32.xlu2 %v752_v30 }
 0x2b1   :  { %4359 = vmatmul.msk.bf16.vlgmr.msrb.gmra.mxu0 %vm101_vm0, %v5058_v4 }
 0x2b2   :  { %4380 = vmatmul.msk.bf16.vlgmr.msra.gmra.mxu1 %vm101_vm0, %v5058_v4  ;;  %v307_v4 = vpop.f32.mrf.mxu2 }
 0x2b3   :  { %v308_v58 = vadd.f32 %v5283_v12, %v307_v4 }
 0x2b7   :  { %648 = vmax.xlane.f32.xlu2 %v647_v61 }
 0x2ba   :  { %v309_v21 = vpop.f32.mrf.mxu2 }
 0x2bb   :  { %v310_v59 = vadd.f32 %v5283_v12, %v309_v21 }
 0x2bd   :  { %v362_v32 = vpack.c.bf16 %v310_v59, %v310_v59  ;;  %v5470_v59 = vld [vmem:[%s6819_s2 + $0x5] ss:$0 sm:$0xff] }
 0x2bf   :  { %v979_v33 = vunpack.c.l.b16 %v362_v32 }
 0x2c1   :  { %4360 = vmatmul.msk.bf16.gmra.mxu0 %vm101_vm0, %v5075_v7 }
 0x2c2   :  { %4381 = vmatmul.msk.bf16.gmra.mxu1 %vm101_vm0, %v5075_v7  ;;  %v361_v7 = vpack.c.bf16 %v308_v58, %v308_v58  ;;  %v312_v35 = vpop.f32.mrf.mxu2 }
 0x2ca   :  { %v314_v38 = vpop.f32.mrf.mxu2 }
 0x2cb   :  { %v315_v39 = vadd.f32 %v5283_v12, %v314_v38 }
 0x2cd   :  { %v364_v42 = vpack.c.bf16 %v315_v39, %v315_v39 }
 0x2cf   :  { %v1007_v45 = vunpack.c.l.b16 %v364_v42 }
 0x2d1   :  { %4361 = vmatmul.msk.bf16.gmra.mxu0 %vm101_vm0, %v5053_v3 }
 0x2d2   :  { %4382 = vmatmul.msk.bf16.gmra.mxu1 %vm101_vm0, %v5053_v3  ;;  %v978_v3 = vunpack.c.l.b16 %v361_v7 }
 0x2d4   :  { %v980_v34 = vpack.c.b16 %v979_v33, %v978_v3 }
 0x2d6   :  { %992 = vmatpush.bf16.msrb.mxu2 %v980_v34 }
 0x2de   :  { %v5420_v49 = vpop.f32.mrf.mxu1 }
 0x2df   :  { %v5418_v46 = vpop.f32.mrf.mxu0 }
 0x2e1   :  { %4362 = vmatmul.msk.bf16.gmra.mxu0 %vm101_vm0, %v5070_v6 }
 0x2e2   :  { %4383 = vmatmul.msk.bf16.gmra.mxu1 %vm101_vm0, %v5070_v6 }
 0x2e6   :  { %v5433_v48 = vpop.f32.mrf.mxu1 }
 0x2e7   :  { %v5431_v55 = vpop.f32.mrf.mxu0 }
 0x2f1   :  { %4363 = vmatmul.msk.bf16.gmra.mxu0 %vm101_vm0, %v5088_v8 }
 0x2f2   :  { %4384 = vmatmul.msk.bf16.gmra.mxu1 %vm101_vm0, %v5088_v8  ;;  %v313_v8 = vadd.f32 %v5283_v12, %v312_v35 }
 0x2f4   :  { %v363_v60 = vpack.c.bf16 %v313_v8, %v313_v8  ;;  %v5480_v8 = vld [vmem:[%s6819_s2 + $0x1] ss:$0 sm:$0xff] }
 0x2f6   :  { %v1006_v44 = vunpack.c.l.b16 %v363_v60 }
 0x2f8   :  { %v1008_v50 = vpack.c.b16 %v1007_v45, %v1006_v44 }
 0x2fa   :  { %1020 = vmatpush.bf16.msra.mxu3 %v1008_v50 }
 0x301   :  { %v730_v6 = vpop.xlane.xlu0 %729  ;;  %4364 = vmatmul.msk.bf16.gmra.mxu0 %vm101_vm0, %v5097_v9 }
 0x302   :  { %4385 = vmatmul.msk.bf16.gmra.mxu1 %vm101_vm0, %v5097_v9 }
 0x309   :  { %v625_v41 = vpop.xlane.xlu0 %624 }
 0x30a   :  { %v663_v14 = vsub.f32 %v5346_v43, %v625_v41 }
 0x30c   :  { %v683_v47 = vmul.f32 1.442695, %v663_v14 }
 0x30e   :  { %4737 = vpow2.f32 %v683_v47 }
 0x30f   :  { %4739 = vrcp.f32 %v730_v6 }
 0x311   :  { %v652_v9 = vpop.xlane.xlu0 %651  ;;  %4365 = vmatmul.msk.bf16.gmra.mxu0 %vm101_vm0, %v5108_v10 }
 0x312   :  { %v672_v12 = vsub.f32 %v5354_v20, %v652_v9  ;;  %4386 = vmatmul.msk.bf16.gmra.mxu1 %vm101_vm0, %v5108_v10 }
 0x314   :  { %v5427_v43 = vpop.eup %4737  ;;  %v701_v53 = vmul.f32 1.442695, %v672_v12 }
 0x315   :  { %v719_v54 = vsel %vm610_vm2, %v5427_v43, 0.0  ;;  %v4740_v40 = vpop.eup %4739 }
 0x316   :  { %4741 = vpow2.f32 %v701_v53  ;;  %720 = vadd.xlane.f32.xlu1 %v719_v54  ;;  %v778_v18 = vmul.f32 %v4740_v40, %v5337_v15 }
 0x318   :  { %v794_v0 = vpack.c.bf16 %v778_v18, %v778_v18 }
 0x319   :  { %v751_v56 = vpop.xlane.xlu1 %750 }
 0x31a   :  { %v727_v57 = vpop.xlane.xlu2 %726  ;;  %v890_v27 = vunpack.c.l.b16 %v794_v0 }
 0x31b   :  { %4743 = vrcp.f32 %v727_v57 }
 0x31c   :  { %v5435_v20 = vpop.eup %4741 }
 0x31d   :  { %v746_v10 = vsel %vm610_vm2, %v5435_v20, 0.0 }
 0x31e   :  { %747 = vadd.xlane.f32.xlu1 %v746_v10  ;;  %v5440_v22 = vpop.f32.mrf.mxu0 }
 0x31f   :  { %v5442_v62 = vpop.f32.mrf.mxu1 }
 0x321   :  { %v4744_v25 = vpop.eup %4743  ;;  %v628_v63 = vpop.xlane.xlu1 %627  ;;  %4366 = vmatmul.msk.bf16.gmra.mxu0 %vm101_vm0, %v5447_v52 }
 0x322   :  { %v777_v51 = vmul.f32 %v4744_v25, %v5367_v19  ;;  %v754_v1 = vpop.xlane.xlu2 %753  ;;  %v664_v15 = vsub.f32 %v5375_v13, %v628_v63  ;;  %4387 = vmatmul.msk.bf16.gmra.mxu1 %vm101_vm0, %v5447_v52 }
 0x323   :  { %4745 = vrcp.f32 %v754_v1 }
 0x324   :  { %v793_v17 = vpack.c.bf16 %v777_v51, %v777_v51  ;;  %v685_v2 = vmul.f32 1.442695, %v664_v15  ;;  %4747 = vrcp.f32 %v751_v56 }
 0x326   :  { %v889_v11 = vunpack.c.l.b16 %v793_v17  ;;  %4749 = vpow2.f32 %v685_v2  ;;  %v5455_v29 = vpop.f32.mrf.mxu0 }
 0x327   :  { %v5457_v37 = vpop.f32.mrf.mxu1 }
 0x328   :  { %v891_v36 = vpack.c.b16 %v890_v27, %v889_v11 }
 0x329   :  { %v4746_v16 = vpop.eup %4745 }
 0x32a   :  { %4341 = vmatmul.msk.bf16.vlgmr.msrb.gmra.mxu3 %vm610_vm2, %v891_v36  ;;  %v649_v19 = vpop.xlane.xlu2 %648  ;;  %v4748_v24 = vpop.eup %4747  ;;  %v786_v23 = vmul.f32 %v4746_v16, %v5377_v28 }
 0x32b   :  { %v671_v26 = vsub.f32 %v5387_v31, %v649_v19  ;;  %v785_v4 = vmul.f32 %v4748_v24, %v5365_v5 }
 0x32c   :  { %v5461_v13 = vpop.eup %4749  ;;  %v802_v21 = vpack.c.bf16 %v786_v23, %v786_v23 }
 0x32d   :  { %v699_v30 = vmul.f32 1.442695, %v671_v26  ;;  %v722_v61 = vsel %vm610_vm2, %v5461_v13, 0.0  ;;  %v801_v31 = vpack.c.bf16 %v785_v4, %v785_v4 }
 0x32e   :  { %723 = vadd.xlane.f32.xlu2 %v722_v61  ;;  %v1067_v58 = vpop.f32.mrf.mxu0  ;;  %v1002_v3 = vunpack.c.l.b16 %v802_v21 }
 0x32f   :  { %4751 = vpow2.f32 %v699_v30  ;;  %v1138_v7 = vpop.f32.mrf.mxu1  ;;  %v1001_v33 = vunpack.c.l.b16 %v801_v31  ;;  %v1068_v42 = vadd.f32 %v5480_v8, %v1067_v58 }
 0x330   :  { %v1139_v28 = vadd.f32 %v5470_v59, %v1138_v7 }
 0x331   :  { %v1003_v6 = vpack.c.b16 %v1002_v3, %v1001_v33  ;;  %v1249_v9 = vpack.c.bf16 %v1068_v42, %v1068_v42 }
 0x332   :  { %v1265_v38 = vpack.c.bf16 %v1139_v28, %v1139_v28 }
 0x333   :  { %v1304_v54 = vunpack.c.l.b16 %v1249_v9 }
 0x334   :  { %v1309_v60 = vunpack.c.l.b16 %v1265_v38 }
 0x335   :  { %v5473_v32 = vpop.eup %4751 }
 0x336   :  { %v743_v5 = vsel %vm610_vm2, %v5473_v32, 0.0  ;;  %v1069_v34 = vpop.f32.mrf.mxu0 }
 0x337   :  { %v1140_v35 = vpop.f32.mrf.mxu1  ;;  %744 = vadd.xlane.f32.xlu0 %v743_v5  ;;  %v1070_v44 = vadd.f32 %v5480_v8, %v1069_v34 }
 0x338   :  { %v1141_v39 = vadd.f32 %v5470_v59, %v1140_v35 }
 0x339   :  { %v1250_v12 = vpack.c.bf16 %v1070_v44, %v1070_v44 }
 0x33a   :  { %v1266_v41 = vpack.c.bf16 %v1141_v39, %v1141_v39  ;;  %4345 = vmatmul.msk.bf16.vlgmr.msra.gmra.mxu3 %vm610_vm2, %v1003_v6 }
 0x33b   :  { %v1305_v56 = vunpack.c.l.b16 %v1250_v12 }
 0x33c   :  { %v1310_v14 = vunpack.c.l.b16 %v1266_v41 }
 0x33d   :  { %v1306_v18 = vpack.c.b16 %v1305_v56, %v1304_v54 }
 0x33e   :  { %v1311_v45 = vpack.c.b16 %v1310_v14, %v1309_v60  ;;  %v1072_v47 = vpop.f32.mrf.mxu0 }
 0x33f   :  { %v1143_v50 = vpop.f32.mrf.mxu1  ;;  %v1073_v1 = vadd.f32 %v5480_v8, %v1072_v47 }
 0x340   :  { %v1316_v53 = vsel %vm379_vm1, %v1311_v45, 0  ;;  %v1144_v57 = vadd.f32 %v5470_v59, %v1143_v50 }
 0x341   :  { %1325 = vmatpush.bf16.xpose.msrb.mxu3 %v1316_v53  ;;  %v1251_v36 = vpack.c.bf16 %v1073_v1, %v1073_v1 }
 0x342   :  { %v1267_v25 = vpack.c.bf16 %v1144_v57, %v1144_v57 }
 0x343   :  { %v1334_v24 = vunpack.c.l.b16 %v1251_v36 }
 0x344   :  { %v1339_v51 = vunpack.c.l.b16 %v1267_v25 }
 0x346   :  { %v1074_v40 = vpop.f32.mrf.mxu0 }
 0x347   :  { %v1145_v10 = vpop.f32.mrf.mxu1  ;;  %v1075_v17 = vadd.f32 %v5480_v8, %v1074_v40 }
 0x348   :  { %v1146_v63 = vadd.f32 %v5470_v59, %v1145_v10 }
 0x349   :  { %v1252_v16 = vpack.c.bf16 %v1075_v17, %v1075_v17 }
 0x34a   :  { %v1268_v0 = vpack.c.bf16 %v1146_v63, %v1146_v63  ;;  %4411 = vmatmul.msk.bf16.vlgmr.msrb.gmra.mxu3 %vm379_vm1, %v1306_v18 }
 0x34b   :  { %v1335_v26 = vunpack.c.l.b16 %v1252_v16 }
 0x34c   :  { %v1340_v15 = vunpack.c.l.b16 %v1268_v0 }
 0x34d   :  { %v1336_v4 = vpack.c.b16 %v1335_v26, %v1334_v24 }
 0x34e   :  { %v1341_v2 = vpack.c.b16 %v1340_v15, %v1339_v51  ;;  %v1077_v27 = vpop.f32.mrf.mxu0 }
 0x34f   :  { %v1148_v11 = vpop.f32.mrf.mxu1  ;;  %v1078_v3 = vadd.f32 %v5480_v8, %v1077_v27 }
 0x350   :  { %v1346_v19 = vsel %vm379_vm1, %v1341_v2, 0  ;;  %v1149_v23 = vadd.f32 %v5470_v59, %v1148_v11 }
 0x351   :  { %1355 = vmatpush.bf16.xpose.msra.mxu3 %v1346_v19  ;;  %v1253_v6 = vpack.c.bf16 %v1078_v3, %v1078_v3 }
 0x352   :  { %v1269_v58 = vpack.c.bf16 %v1149_v23, %v1149_v23 }
 0x353   :  { %v1364_v41 = vunpack.c.l.b16 %v1253_v6 }
 0x354   :  { %v1369_v31 = vunpack.c.l.b16 %v1269_v58 }
 0x356   :  { %v1079_v30 = vpop.f32.mrf.mxu0 }
 0x357   :  { %v1150_v61 = vpop.f32.mrf.mxu1  ;;  %v1080_v33 = vadd.f32 %v5480_v8, %v1079_v30 }
 0x358   :  { %v1151_v7 = vadd.f32 %v5470_v59, %v1150_v61 }
 0x359   :  { %v1254_v38 = vpack.c.bf16 %v1080_v33, %v1080_v33 }
 0x35a   :  { %v1270_v21 = vpack.c.bf16 %v1151_v7, %v1151_v7  ;;  %4412 = vmatmul.msk.bf16.vlgmr.msra.gmra.mxu3 %vm379_vm1, %v1336_v4 }
 0x35b   :  { %v1365_v60 = vunpack.c.l.b16 %v1254_v38 }
 0x35c   :  { %v1370_v28 = vunpack.c.l.b16 %v1270_v21 }
 0x35d   :  { %v1366_v45 = vpack.c.b16 %v1365_v60, %v1364_v41 }
 0x35e   :  { %v1371_v5 = vpack.c.b16 %v1370_v28, %v1369_v31  ;;  %v1082_v34 = vpop.f32.mrf.mxu0 }
 0x35f   :  { %v1153_v35 = vpop.f32.mrf.mxu1  ;;  %v1083_v53 = vadd.f32 %v5480_v8, %v1082_v34 }
 0x360   :  { %v1376_v39 = vsel %vm379_vm1, %v1371_v5, 0  ;;  %v1154_v42 = vadd.f32 %v5470_v59, %v1153_v35 }
 0x361   :  { %1385 = vmatpush.bf16.xpose.msrb.mxu3 %v1376_v39  ;;  %v1255_v18 = vpack.c.bf16 %v1083_v53, %v1083_v53 }
 0x362   :  { %v1271_v47 = vpack.c.bf16 %v1154_v42, %v1154_v42 }
 0x363   :  { %v1394_v51 = vunpack.c.l.b16 %v1255_v18 }
 0x364   :  { %v1399_v12 = vunpack.c.l.b16 %v1271_v47 }
 0x366   :  { %v1084_v14 = vpop.f32.mrf.mxu0 }
 0x367   :  { %v1155_v44 = vpop.f32.mrf.mxu1  ;;  %v1085_v56 = vadd.f32 %v5480_v8, %v1084_v14 }
 0x368   :  { %v1156_v50 = vadd.f32 %v5470_v59, %v1155_v44 }
 0x369   :  { %v1256_v25 = vpack.c.bf16 %v1085_v56, %v1085_v56 }
 0x36a   :  { %v1272_v9 = vpack.c.bf16 %v1156_v50, %v1156_v50  ;;  %4413 = vmatmul.msk.bf16.vlgmr.msrb.gmra.mxu3 %vm379_vm1, %v1366_v45 }
 0x36b   :  { %v1395_v1 = vunpack.c.l.b16 %v1256_v25 }
 0x36c   :  { %v1400_v54 = vunpack.c.l.b16 %v1272_v9 }
 0x36d   :  { %v1396_v27 = vpack.c.b16 %v1395_v1, %v1394_v51 }
 0x36e   :  { %v1401_v57 = vpack.c.b16 %v1400_v54, %v1399_v12  ;;  %v1087_v40 = vpop.f32.mrf.mxu0 }
 0x36f   :  { %v1158_v10 = vpop.f32.mrf.mxu1  ;;  %v1088_v16 = vadd.f32 %v5480_v8, %v1087_v40 }
 0x370   :  { %v1406_v63 = vsel %vm379_vm1, %v1401_v57, 0  ;;  %v1159_v0 = vadd.f32 %v5470_v59, %v1158_v10 }
 0x371   :  { %1415 = vmatpush.bf16.xpose.msra.mxu3 %v1406_v63  ;;  %v1257_v23 = vpack.c.bf16 %v1088_v16, %v1088_v16 }
 0x372   :  { %v1273_v15 = vpack.c.bf16 %v1159_v0, %v1159_v0 }
 0x373   :  { %v1424_v21 = vunpack.c.l.b16 %v1257_v23 }
 0x374   :  { %v1429_v36 = vunpack.c.l.b16 %v1273_v15 }
 0x376   :  { %v1089_v17 = vpop.f32.mrf.mxu0 }
 0x377   :  { %v1160_v2 = vpop.f32.mrf.mxu1  ;;  %v1090_v24 = vadd.f32 %v5480_v8, %v1089_v17 }
 0x378   :  { %v1161_v11 = vadd.f32 %v5470_v59, %v1160_v2 }
 0x379   :  { %v1258_v61 = vpack.c.bf16 %v1090_v24, %v1090_v24 }
 0x37a   :  { %v1274_v19 = vpack.c.bf16 %v1161_v11, %v1161_v11  ;;  %4414 = vmatmul.msk.bf16.vlgmr.msra.gmra.mxu3 %vm379_vm1, %v1396_v27 }
 0x37b   :  { %v1425_v31 = vunpack.c.l.b16 %v1258_v61 }
 0x37c   :  { %v1430_v26 = vunpack.c.l.b16 %v1274_v19 }
 0x37d   :  { %v1426_v28 = vpack.c.b16 %v1425_v31, %v1424_v21 }
 0x37e   :  { %v1431_v30 = vpack.c.b16 %v1430_v26, %v1429_v36  ;;  %v1092_v4 = vpop.f32.mrf.mxu0 }
 0x37f   :  { %v1163_v58 = vpop.f32.mrf.mxu1  ;;  %v1093_v38 = vadd.f32 %v5480_v8, %v1092_v4 }
 0x380   :  { %v1436_v7 = vsel %vm379_vm1, %v1431_v30, 0  ;;  %v1164_v3 = vadd.f32 %v5470_v59, %v1163_v58 }
 0x381   :  { %1445 = vmatpush.bf16.xpose.msrb.mxu3 %v1436_v7  ;;  %v1259_v42 = vpack.c.bf16 %v1093_v38, %v1093_v38 }
 0x382   :  { %v1275_v33 = vpack.c.bf16 %v1164_v3, %v1164_v3 }
 0x383   :  { %v1454_v9 = vunpack.c.l.b16 %v1259_v42 }
 0x384   :  { %v1459_v6 = vunpack.c.l.b16 %v1275_v33 }
 0x386   :  { %v1094_v5 = vpop.f32.mrf.mxu0 }
 0x387   :  { %v1165_v34 = vpop.f32.mrf.mxu1  ;;  %v1095_v41 = vadd.f32 %v5480_v8, %v1094_v5 }
 0x388   :  { %v1166_v35 = vadd.f32 %v5470_v59, %v1165_v34 }
 0x389   :  { %v1260_v44 = vpack.c.bf16 %v1095_v41, %v1095_v41  ;;  %v721_v18 = vpop.xlane.xlu1 %720 }
 0x38a   :  { %v1276_v39 = vpack.c.bf16 %v1166_v35, %v1166_v35  ;;  %4415 = vmatmul.msk.bf16.vlgmr.msrb.gmra.mxu3 %vm379_vm1, %v1426_v28  ;;  %4753 = vrcp.f32 %v721_v18 }
 0x38b   :  { %v1455_v12 = vunpack.c.l.b16 %v1260_v44 }
 0x38c   :  { %v1460_v60 = vunpack.c.l.b16 %v1276_v39 }
 0x38d   :  { %v1456_v54 = vpack.c.b16 %v1455_v12, %v1454_v9 }
 0x38e   :  { %v1461_v14 = vpack.c.b16 %v1460_v60, %v1459_v6  ;;  %v1097_v45 = vpop.f32.mrf.mxu0 }
 0x38f   :  { %v1168_v47 = vpop.f32.mrf.mxu1  ;;  %v1098_v63 = vadd.f32 %v5480_v8, %v1097_v45 }
 0x390   :  { %v1466_v50 = vsel %vm379_vm1, %v1461_v14, 0  ;;  %v1169_v53 = vadd.f32 %v5470_v59, %v1168_v47  ;;  %v4754_v19 = vpop.eup %4753 }
 0x391   :  { %1475 = vmatpush.bf16.xpose.msra.mxu3 %v1466_v50  ;;  %v1261_v15 = vpack.c.bf16 %v1098_v63, %v1098_v63  ;;  %v775_v30 = vmul.f32 %v4754_v19, %v5427_v43  ;;  %v748_v28 = vpop.xlane.xlu1 %747 }
 0x392   :  { %v1277_v56 = vpack.c.bf16 %v1169_v53, %v1169_v53 }
 0x393   :  { %v1484_v24 = vunpack.c.l.b16 %v1261_v15  ;;  %v791_v3 = vpack.c.bf16 %v775_v30, %v775_v30  ;;  %v4672_v15 = vld [vmem:[%s6820_s3 + $0x8] sm:$0xff]  }
 0x394   :  { %v1489_v25 = vunpack.c.l.b16 %v1277_v56 }
 0x395   :  { %v861_v41 = vunpack.c.l.b16 %v791_v3 }
 0x396   :  { %v1099_v57 = vpop.f32.mrf.mxu0 }
 0x397   :  { %v1170_v40 = vpop.f32.mrf.mxu1  ;;  %v1100_v51 = vadd.f32 %v5480_v8, %v1099_v57 }
 0x398   :  { %v1171_v10 = vadd.f32 %v5470_v59, %v1170_v40 }
 0x399   :  { %v1262_v2 = vpack.c.bf16 %v1100_v51, %v1100_v51 }
 0x39a   :  { %v1278_v0 = vpack.c.bf16 %v1171_v10, %v1171_v10  ;;  %4416 = vmatmul.msk.bf16.vlgmr.msra.gmra.mxu3 %vm379_vm1, %v1456_v54 }
 0x39b   :  { %v1485_v26 = vunpack.c.l.b16 %v1262_v2 }
 0x39c   :  { %v1490_v1 = vunpack.c.l.b16 %v1278_v0 }
 0x39d   :  { %v1486_v61 = vpack.c.b16 %v1485_v26, %v1484_v24  ;;  %v5559_v26 = vunpack.c.h.bf16 %v4672_v15 }
 0x39e   :  { %v1491_v17 = vpack.c.b16 %v1490_v1, %v1489_v25  ;;  %v1102_v27 = vpop.f32.mrf.mxu0 }
 0x39f   :  { %v1173_v11 = vpop.f32.mrf.mxu1  ;;  %v1103_v34 = vadd.f32 %v5480_v8, %v1102_v27 }
 0x3a0   :  { %v1496_v36 = vsel %vm379_vm1, %v1491_v17, 0  ;;  %v1174_v23 = vadd.f32 %v5470_v59, %v1173_v11  ;;  %v5547_v17 = vunpack.c.l.bf16 %v4672_v15 }
 0x3a1   :  { %v724_v16 = vpop.xlane.xlu2 %723  ;;  %1505 = vmatpush.bf16.xpose.msrb.mxu3 %v1496_v36  ;;  %v1263_v42 = vpack.c.bf16 %v1103_v34, %v1103_v34 }
 0x3a2   :  { %4755 = vrcp.f32 %v724_v16  ;;  %v1279_v4 = vpack.c.bf16 %v1174_v23, %v1174_v23 }
 0x3a4   :  { %v1519_v5 = vunpack.c.l.b16 %v1279_v4 }
 0x3a6   :  { %v1104_v7 = vpop.f32.mrf.mxu0 }
 0x3a7   :  { %v1175_v58 = vpop.f32.mrf.mxu1  ;;  %v1105_v43 = vadd.f32 %v5480_v8, %v1104_v7  ;;  %v1514_v8 = vunpack.c.l.b16 %v1263_v42 }
 0x3a8   :  { %v4756_v21 = vpop.eup %4755  ;;  %v1176_v31 = vadd.f32 %v5470_v59, %v1175_v58 }
 0x3a9   :  { %v776_v33 = vmul.f32 %v4756_v21, %v5461_v13  ;;  %v1264_v13 = vpack.c.bf16 %v1105_v43, %v1105_v43 }
 0x3aa   :  { %v1280_v35 = vpack.c.bf16 %v1176_v31, %v1176_v31  ;;  %v745_v6 = vpop.xlane.xlu0 %744  ;;  %4417 = vmatmul.msk.bf16.vlgmr.msrb.gmra.mxu3 %vm379_vm1, %v1486_v61  ;;  %v4643_v31 = vld [vmem:[%s6818_s1 + $0x98] sm:$0xff] }
 0x3ab   :  { %v792_v38 = vpack.c.bf16 %v776_v33, %v776_v33  ;;  %4757 = vrcp.f32 %v745_v6  ;;  %v1515_v9 = vunpack.c.l.b16 %v1264_v13 }
 0x3ac   :  { %4759 = vrcp.f32 %v748_v28  ;;  %v1520_v39 = vunpack.c.l.b16 %v1280_v35  ;;  %v4642_v28 = vld [vmem:[%s6818_s1 + $0x90] sm:$0xff] }
 0x3ad   :  { %v862_v60 = vunpack.c.l.b16 %v792_v38  ;;  %v5530_v59 = vpop.f32.mrf.mxu3  ;;  %v1516_v56 = vpack.c.b16 %v1515_v9, %v1514_v8 }
 0x3ae   :  { %v1521_v14 = vpack.c.b16 %v1520_v39, %v1519_v5  ;;  %v5586_v5 = vld [vmem:[%s6817_s0] sm:$0xff]  ;;  %v5601_v39 = vld [vmem:[%s6817_s0 + $0x8] sm:$0xff] }
 0x3af   :  { %v863_v44 = vpack.c.b16 %v862_v60, %v861_v41 }
 0x3b0   :  { %v1526_v45 = vsel %vm379_vm1, %v1521_v14, 0 }
 0x3b1   :  { %v4758_v47 = vpop.eup %4757  ;;  %4340 = vmatmul.msk.bf16.vlgmr.msra.gmra.mxu2 %vm610_vm2, %v863_v44  ;;  %1535 = vmatpush.bf16.xpose.msra.mxu3 %v1526_v45  ;;  %v5618_v45 = vld [vmem:[%s6817_s0 + $0x10] sm:$0xff] }
 0x3b2   :  { %v4760_v50 = vpop.eup %4759  ;;  %v783_v12 = vmul.f32 %v4758_v47, %v5473_v32  ;;  %1206 = vmatpush.bf16.msra.mxu2 %v4643_v31 }
 0x3b3   :  { %v784_v53 = vmul.f32 %v4760_v50, %v5435_v20 }
 0x3b4   :  { %v799_v57 = vpack.c.bf16 %v783_v12, %v783_v12 }
 0x3b5   :  { %v5536_v54 = vpop.f32.mrf.mxu3  ;;  %v800_v40 = vpack.c.bf16 %v784_v53, %v784_v53 }
 0x3b6   :  { %v973_v10 = vunpack.c.l.b16 %v799_v57  ;;  %1207 = vmatpush.bf16.msra.mxu2 %v4642_v28 }
 0x3b7   :  { %v974_v18 = vunpack.c.l.b16 %v800_v40  ;;  %v5645_v40 = vld [vmem:[%s6817_s0 + $0x18] sm:$0xff] }
 0x3b9   :  { %v975_v63 = vpack.c.b16 %v974_v18, %v973_v10 }
 0x3ba   :  { %4418 = vmatmul.msk.bf16.vlgmr.msra.gmra.mxu3 %vm379_vm1, %v1516_v56 }
 0x3bd   :  { %v5539_v25 = vpop.f32.mrf.mxu3 }
 0x3c1   :  { %4344 = vmatmul.msk.bf16.vlgmr.msrb.gmra.mxu2 %vm610_vm2, %v975_v63 }
 0x3c5   :  { %v5542_v0 = vpop.f32.mrf.mxu3 }
 0x3cd   :  { %v1327_v51 = vpop.f32.mrf.mxu3 }
 0x3ce   :  { %v5630_v9 = vadd.f32 %v5547_v17, %v1327_v51  ;;  %v5655_v51 = vld [vmem:[%s6817_s0 + $0x20] sm:$0xff] }
 0x3d0   :  { %v1542_v56 = vsel %vm610_vm2, %v5630_v9, -inf }
 0x3d1   :  { %4401 = vmatmul.msk.bf16.vlgmr.msra.gmra.mxu2 %vm101_vm0, %v5586_v5 }
 0x3d5   :  { %v1329_v32 = vpop.f32.mrf.mxu3 }
 0x3d6   :  { %v5596_v43 = vadd.f32 %v5559_v26, %v1329_v32 }
 0x3d8   :  { %v1545_v41 = vsel %vm610_vm2, %v5596_v43, -inf }
 0x3dd   :  { %v1357_v1 = vpop.f32.mrf.mxu3 }
 0x3de   :  { %v5633_v12 = vadd.f32 %v5547_v17, %v1357_v1 }
 0x3e0   :  { %v1548_v53 = vsel %vm610_vm2, %v5633_v12, -inf }
 0x3e1   :  { %4402 = vmatmul.msk.bf16.gmra.mxu2 %vm101_vm0, %v5601_v39 }
 0x3e5   :  { %v1359_v20 = vpop.f32.mrf.mxu3 }
 0x3e6   :  { %v5640_v57 = vadd.f32 %v5559_v26, %v1359_v20 }
 0x3e8   :  { %v1551_v10 = vsel %vm610_vm2, %v5640_v57, -inf }
 0x3ed   :  { %v1387_v2 = vpop.f32.mrf.mxu3 }
 0x3ee   :  { %v5550_v27 = vadd.f32 %v5547_v17, %v1387_v2 }
 0x3f0   :  { %v1554_v11 = vsel %vm610_vm2, %v5550_v27, -inf }
 0x3f1   :  { %1555 = vmax.xlane.f32.xlu1 %v1554_v11  ;;  %4403 = vmatmul.msk.bf16.gmra.mxu2 %vm101_vm0, %v5618_v45  ;;  %v5670_v11 = vld [vmem:[%s6817_s0 + $0x28] sm:$0xff] }
 0x3f5   :  { %v1389_v36 = vpop.f32.mrf.mxu3 }
 0x3f6   :  { %v5562_v23 = vadd.f32 %v5559_v26, %v1389_v36 }
 0x3f8   :  { %v1557_v58 = vsel %vm610_vm2, %v5562_v23, -inf }
 0x3fd   :  { %v1417_v16 = vpop.f32.mrf.mxu3 }
 0x3fe   :  { %v5555_v19 = vadd.f32 %v5547_v17, %v1417_v16 }
 0x400   :  { %v1560_v24 = vsel %vm610_vm2, %v5555_v19, -inf }
 0x401   :  { %1561 = vmax.xlane.f32.xlu2 %v1560_v24  ;;  %4404 = vmatmul.msk.bf16.gmra.mxu2 %vm101_vm0, %v5645_v40 }
 0x405   :  { %v1419_v30 = vpop.f32.mrf.mxu3 }
 0x406   :  { %v5565_v61 = vadd.f32 %v5559_v26, %v1419_v30 }
 0x408   :  { %v1563_v4 = vsel %vm610_vm2, %v5565_v61, -inf }
 0x409   :  { %1564 = vmax.xlane.f32.xlu0 %v1563_v4  ;;  %1558 = vmax.xlane.f32.xlu2 %v1557_v58 }
 0x40d   :  { %v5571_v7 = vpop.f32.mrf.mxu3 }
 0x411   :  { %4405 = vmatmul.msk.bf16.gmra.mxu2 %vm101_vm0, %v5655_v51 }
 0x415   :  { %v5573_v21 = vpop.f32.mrf.mxu3 }
 0x41d   :  { %v5578_v3 = vpop.f32.mrf.mxu3 }
 0x421   :  { %4406 = vmatmul.msk.bf16.gmra.mxu2 %vm101_vm0, %v5670_v11 }
 0x425   :  { %v1479_v33 = vpop.f32.mrf.mxu3 }
 0x426   :  { %v5664_v15 = vadd.f32 %v5559_v26, %v1479_v33 }
 0x428   :  { %v1575_v16 = vsel %vm610_vm2, %v5664_v15, -inf }
 0x42d   :  { %v1507_v34 = vpop.f32.mrf.mxu3 }
 0x42e   :  { %v5591_v35 = vadd.f32 %v5547_v17, %v1507_v34 }
 0x430   :  { %v1578_v6 = vsel %vm610_vm2, %v5591_v35, -inf }
 0x431   :  { %1579 = vmax.xlane.f32.xlu2 %v1578_v6  ;;  %v5687_v6 = vld [vmem:[%s6817_s0 + $0x30] sm:$0xff] }
 0x432   :  { %4407 = vmatmul.msk.bf16.gmra.mxu2 %vm101_vm0, %v5687_v6 }
 0x434   :  { %v5682_v34 = vpop.f32.mrf.mxu2 }
 0x435   :  { %v1509_v38 = vpop.f32.mrf.mxu3 }
 0x436   :  { %v5613_v13 = vadd.f32 %v5559_v26, %v1509_v38 }
 0x438   :  { %v1581_v50 = vsel %vm610_vm2, %v5613_v13, -inf }
 0x439   :  { %1546 = vmax.xlane.f32.xlu2 %v1545_v41 }
 0x43d   :  { %v1537_v60 = vpop.f32.mrf.mxu3 }
 0x43e   :  { %v5608_v42 = vadd.f32 %v5547_v17, %v1537_v60  ;;  %v5701_v60 = vadd.f32 %v5547_v17, %v5578_v3 }
 0x440   :  { %v1584_v14 = vsel %vm610_vm2, %v5608_v42, -inf }
 0x441   :  { %1585 = vmax.xlane.f32.xlu0 %v1584_v14  ;;  %v5703_v14 = vpop.f32.mrf.mxu2 }
 0x442   :  { %4408 = vmatmul.msk.bf16.gmra.mxu2 %vm101_vm0, %v5447_v52 }
 0x445   :  { %v1539_v44 = vpop.f32.mrf.mxu3 }
 0x446   :  { %v5623_v47 = vadd.f32 %v5559_v26, %v1539_v44  ;;  %v1572_v44 = vsel %vm610_vm2, %v5701_v60, -inf }
 0x448   :  { %v1587_v8 = vsel %vm610_vm2, %v5623_v47, -inf }
 0x449   :  { %1582 = vmax.xlane.f32.xlu0 %v1581_v50  ;;  %1588 = vmax.xlane.f32.xlu1 %v1587_v8  ;;  %v5709_v50 = vpop.f32.mrf.mxu2 }
 0x451   :  { %1549 = vmax.xlane.f32.xlu0 %v1548_v53  ;;  %1543 = vmax.xlane.f32.xlu1 %v1542_v56  ;;  %v5711_v8 = vpop.f32.mrf.mxu2 }
 0x459   :  { %1552 = vmax.xlane.f32.xlu1 %v1551_v10  ;;  %v1209_v3 = vpop.f32.mrf.mxu2 }
 0x464   :  { %v1556_v18 = vpop.xlane.xlu1 %1555 }
 0x465   :  { %v1594_v63 = vsub.f32 %v5550_v27, %v1556_v18  ;;  %v5717_v18 = vld [vmem:[%s6819_s2 + $0x9] ss:$0 sm:$0xff] }
 0x467   :  { %v1614_v32 = vmul.f32 1.442695, %v1594_v63 }
 0x469   :  { %4761 = vpow2.f32 %v1614_v32  ;;  %v1210_v32 = vadd.f32 %v5717_v18, %v1209_v3 }
 0x46f   :  { %v5659_v1 = vpop.eup %4761 }
 0x470   :  { %v1650_v20 = vsel %vm610_vm2, %v5659_v1, 0.0 }
 0x471   :  { %1651 = vadd.xlane.f32.xlu1 %v1650_v20 }
 0x474   :  { %v1562_v2 = vpop.xlane.xlu2 %1561 }
 0x475   :  { %v1596_v27 = vsub.f32 %v5555_v19, %v1562_v2 }
 0x477   :  { %v1618_v36 = vmul.f32 1.442695, %v1596_v27 }
 0x479   :  { %4763 = vpow2.f32 %v1618_v36  ;;  %1576 = vmax.xlane.f32.xlu1 %v1575_v16  ;;  %v1211_v36 = vpop.f32.mrf.mxu2 }
 0x47a   :  { %v1212_v16 = vadd.f32 %v5717_v18, %v1211_v36 }
 0x47c   :  { %v1565_v24 = vpop.xlane.xlu0 %1564  ;;  %v1559_v30 = vpop.xlane.xlu2 %1558 }
 0x47d   :  { %v1597_v4 = vsub.f32 %v5565_v61, %v1565_v24  ;;  %v1595_v19 = vsub.f32 %v5562_v23, %v1559_v30 }
 0x47f   :  { %v5678_v58 = vpop.eup %4763  ;;  %v1620_v31 = vmul.f32 1.442695, %v1597_v4  ;;  %v1616_v28 = vmul.f32 1.442695, %v1595_v19  ;;  %v1282_v4 = vpack.c.bf16 %v1212_v16, %v1212_v16 }
 0x480   :  { %v1656_v33 = vsel %vm610_vm2, %v5678_v58, 0.0 }
 0x481   :  { %4765 = vpow2.f32 %v1620_v31  ;;  %1657 = vadd.xlane.f32.xlu2 %v1656_v33  ;;  %v1742_v31 = vunpack.c.l.b16 %v1282_v4 }
 0x482   :  { %4767 = vpow2.f32 %v1616_v28 }
 0x487   :  { %v5691_v23 = vpop.eup %4765 }
 0x488   :  { %v5693_v61 = vpop.eup %4767  ;;  %v1659_v38 = vsel %vm610_vm2, %v5691_v23, 0.0 }
 0x489   :  { %1660 = vadd.xlane.f32.xlu0 %v1659_v38  ;;  %v1653_v41 = vsel %vm610_vm2, %v5693_v61, 0.0 }
 0x48a   :  { %1654 = vadd.xlane.f32.xlu2 %v1653_v41  ;;  %v1214_v41 = vpop.f32.mrf.mxu2 }
 0x491   :  { %1573 = vmax.xlane.f32.xlu0 %v1572_v44 }
 0x4a4   :  { %v1580_v53 = vpop.xlane.xlu2 %1579 }
 0x4a5   :  { %v1602_v56 = vsub.f32 %v5591_v35, %v1580_v53  ;;  %v1281_v35 = vpack.c.bf16 %v1210_v32, %v1210_v32 }
 0x4a7   :  { %v1630_v10 = vmul.f32 1.442695, %v1602_v56  ;;  %v1741_v30 = vunpack.c.l.b16 %v1281_v35  ;;  %v1215_v56 = vadd.f32 %v5717_v18, %v1214_v41 }
 0x4a9   :  { %4769 = vpow2.f32 %v1630_v10  ;;  %v1743_v38 = vpack.c.b16 %v1742_v31, %v1741_v30 }
 0x4ab   :  { %1755 = vmatpush.bf16.msra.mxu0 %v1743_v38 }
 0x4ac   :  { %v1547_v63 = vpop.xlane.xlu2 %1546 }
 0x4ad   :  { %v1591_v52 = vsub.f32 %v5596_v43, %v1547_v63 }
 0x4af   :  { %v5721_v20 = vpop.eup %4769  ;;  %v1608_v2 = vmul.f32 1.442695, %v1591_v52 }
 0x4b0   :  { %v1674_v27 = vsel %vm610_vm2, %v5721_v20, 0.0 }
 0x4b1   :  { %4771 = vpow2.f32 %v1608_v2  ;;  %1675 = vadd.xlane.f32.xlu1 %v1674_v27  ;;  %v1283_v2 = vpack.c.bf16 %v1215_v56, %v1215_v56  ;;  %v1216_v27 = vpop.f32.mrf.mxu2 }
 0x4b2   :  { %v1217_v35 = vadd.f32 %v5717_v18, %v1216_v27 }
 0x4b4   :  { %v1586_v24 = vpop.xlane.xlu0 %1585 }
 0x4b5   :  { %v1604_v19 = vsub.f32 %v5608_v42, %v1586_v24  ;;  %v1769_v24 = vunpack.c.l.b16 %v1283_v2 }
 0x4b7   :  { %v5727_v28 = vpop.eup %4771  ;;  %v1634_v43 = vmul.f32 1.442695, %v1604_v19 }
 0x4b8   :  { %v1641_v33 = vsel %vm610_vm2, %v5727_v28, 0.0 }
 0x4b9   :  { %4773 = vpow2.f32 %v1634_v43  ;;  %1642 = vadd.xlane.f32.xlu1 %v1641_v33 }
 0x4bc   :  { %v1583_v44 = vpop.xlane.xlu0 %1582  ;;  %v1589_v53 = vpop.xlane.xlu1 %1588 }
 0x4bd   :  { %v1603_v10 = vsub.f32 %v5613_v13, %v1583_v44  ;;  %v1605_v42 = vsub.f32 %v5623_v47, %v1589_v53  ;;  %v1284_v13 = vpack.c.bf16 %v1217_v35, %v1217_v35  ;;  %v1219_v53 = vpop.f32.mrf.mxu2 }
 0x4be   :  { %v1220_v2 = vadd.f32 %v5717_v18, %v1219_v53 }
 0x4bf   :  { %v5734_v3 = vpop.eup %4773  ;;  %v1632_v63 = vmul.f32 1.442695, %v1603_v10  ;;  %v1636_v32 = vmul.f32 1.442695, %v1605_v42  ;;  %v1770_v4 = vunpack.c.l.b16 %v1284_v13 }
 0x4c0   :  { %v1680_v52 = vsel %vm610_vm2, %v5734_v3, 0.0 }
 0x4c1   :  { %4775 = vpow2.f32 %v1632_v63  ;;  %1681 = vadd.xlane.f32.xlu2 %v1680_v52  ;;  %v1771_v41 = vpack.c.b16 %v1770_v4, %v1769_v24 }
 0x4c2   :  { %4777 = vpow2.f32 %v1636_v32 }
 0x4c3   :  { %1783 = vmatpush.bf16.msrb.mxu1 %v1771_v41 }
 0x4c4   :  { %v1550_v36 = vpop.xlane.xlu0 %1549  ;;  %v1544_v16 = vpop.xlane.xlu1 %1543 }
 0x4c5   :  { %v1592_v47 = vsub.f32 %v5633_v12, %v1550_v36  ;;  %v1590_v30 = vsub.f32 %v5630_v9, %v1544_v16  ;;  %v5751_v9 = vadd.f32 %v5547_v17, %v5571_v7  ;;  %v1221_v7 = vpop.f32.mrf.mxu2  ;;  %v5768_v16 = vadd.f32 %v5559_v26, %v5573_v21 }
 0x4c6   :  { %v1222_v27 = vadd.f32 %v5717_v18, %v1221_v7 }
 0x4c7   :  { %v5741_v19 = vpop.eup %4775  ;;  %v1610_v31 = vmul.f32 1.442695, %v1592_v47  ;;  %v1606_v43 = vmul.f32 1.442695, %v1590_v30  ;;  %v1566_v32 = vsel %vm610_vm2, %v5751_v9, -inf  ;;  %v1569_v4 = vsel %vm610_vm2, %v5768_v16, -inf }
 0x4c8   :  { %v5743_v33 = vpop.eup %4777  ;;  %v1677_v38 = vsel %vm610_vm2, %v5741_v19, 0.0  ;;  %v1286_v36 = vpack.c.bf16 %v1222_v27, %v1222_v27 }
 0x4c9   :  { %4779 = vpow2.f32 %v1610_v31  ;;  %1678 = vadd.xlane.f32.xlu2 %v1677_v38  ;;  %v1683_v44 = vsel %vm610_vm2, %v5743_v33, 0.0 }
 0x4ca   :  { %4781 = vpow2.f32 %v1606_v43  ;;  %1684 = vadd.xlane.f32.xlu0 %v1683_v44  ;;  %v1798_v24 = vunpack.c.l.b16 %v1286_v36 }
 0x4cc   :  { %v1553_v12 = vpop.xlane.xlu1 %1552 }
 0x4cd   :  { %v1593_v56 = vsub.f32 %v5640_v57, %v1553_v12  ;;  %v1285_v57 = vpack.c.bf16 %v1220_v2, %v1220_v2  ;;  %v1224_v31 = vpop.f32.mrf.mxu2 }
 0x4ce   :  { %v1225_v43 = vadd.f32 %v5717_v18, %v1224_v31 }
 0x4cf   :  { %v5754_v10 = vpop.eup %4779  ;;  %v1612_v42 = vmul.f32 1.442695, %v1593_v56  ;;  %v1797_v35 = vunpack.c.l.b16 %v1285_v57 }
 0x4d0   :  { %v5756_v63 = vpop.eup %4781  ;;  %v1644_v52 = vsel %vm610_vm2, %v5754_v10, 0.0  ;;  %v1287_v41 = vpack.c.bf16 %v1225_v43, %v1225_v43 }
 0x4d1   :  { %4783 = vpow2.f32 %v1612_v42  ;;  %1567 = vmax.xlane.f32.xlu2 %v1566_v32  ;;  %1645 = vadd.xlane.f32.xlu1 %v1644_v52  ;;  %v1638_v17 = vsel %vm610_vm2, %v5756_v63, 0.0  ;;  %v1799_v30 = vpack.c.b16 %v1798_v24, %v1797_v35 }
 0x4d2   :  { %1639 = vadd.xlane.f32.xlu0 %v1638_v17  ;;  %v1825_v44 = vunpack.c.l.b16 %v1287_v41 }
 0x4d3   :  { %1811 = vmatpush.bf16.msrb.mxu2 %v1799_v30 }
 0x4d5   :  { %v1226_v38 = vpop.f32.mrf.mxu2 }
 0x4d6   :  { %v1227_v26 = vadd.f32 %v5717_v18, %v1226_v38 }
 0x4d7   :  { %v5770_v13 = vpop.eup %4783 }
 0x4d8   :  { %v1647_v47 = vsel %vm610_vm2, %v5770_v13, 0.0  ;;  %v1288_v53 = vpack.c.bf16 %v1227_v26, %v1227_v26 }
 0x4d9   :  { %1648 = vadd.xlane.f32.xlu2 %v1647_v47 }
 0x4da   :  { %1570 = vmax.xlane.f32.xlu0 %v1569_v4  ;;  %v1826_v12 = vunpack.c.l.b16 %v1288_v53 }
 0x4dc   :  { %v1827_v56 = vpack.c.b16 %v1826_v12, %v1825_v44 }
 0x4dd   :  { %v1229_v42 = vpop.f32.mrf.mxu2 }
 0x4de   :  { %1839 = vmatpush.bf16.msrb.mxu3 %v1827_v56  ;;  %v1230_v52 = vadd.f32 %v5717_v18, %v1229_v42 }
 0x4e0   :  { %v1289_v7 = vpack.c.bf16 %v1230_v52, %v1230_v52 }
 0x4e2   :  { %v1853_v36 = vunpack.c.l.b16 %v1289_v7 }
 0x4e4   :  { %v1652_v21 = vpop.xlane.xlu1 %1651 }
 0x4e5   :  { %v1231_v57 = vpop.f32.mrf.mxu2 }
 0x4e6   :  { %v1232_v27 = vadd.f32 %v5717_v18, %v1231_v57 }
 0x4e8   :  { %v1290_v24 = vpack.c.bf16 %v1232_v27, %v1232_v27 }
 0x4ea   :  { %v1854_v47 = vunpack.c.l.b16 %v1290_v24 }
 0x4ec   :  { %v1577_v32 = vpop.xlane.xlu1 %1576  ;;  %v1855_v31 = vpack.c.b16 %v1854_v47, %v1853_v36 }
 0x4ed   :  { %v1601_v2 = vsub.f32 %v5664_v15, %v1577_v32  ;;  %v1234_v15 = vpop.f32.mrf.mxu2 }
 0x4ee   :  { %1867 = vmatpush.bf16.msrb.mxu0 %v1855_v31  ;;  %v1235_v38 = vadd.f32 %v5717_v18, %v1234_v15 }
 0x4ef   :  { %v1628_v17 = vmul.f32 1.442695, %v1601_v2 }
 0x4f0   :  { %v1291_v12 = vpack.c.bf16 %v1235_v38, %v1235_v38 }
 0x4f1   :  { %4785 = vpow2.f32 %v1628_v17 }
 0x4f2   :  { %v1881_v57 = vunpack.c.l.b16 %v1291_v12 }
 0x4f4   :  { %v1658_v35 = vpop.xlane.xlu2 %1657 }
 0x4f5   :  { %4787 = vrcp.f32 %v1658_v35  ;;  %v1236_v56 = vpop.f32.mrf.mxu2 }
 0x4f6   :  { %4789 = vrcp.f32 %v1652_v21  ;;  %v1237_v42 = vadd.f32 %v5717_v18, %v1236_v56 }
 0x4f7   :  { %v5781_v30 = vpop.eup %4785 }
 0x4f8   :  { %v1671_v4 = vsel %vm610_vm2, %v5781_v30, 0.0  ;;  %v1292_v27 = vpack.c.bf16 %v1237_v42, %v1237_v42 }
 0x4f9   :  { %1672 = vadd.xlane.f32.xlu1 %v1671_v4 }
 0x4fa   :  { %v1882_v47 = vunpack.c.l.b16 %v1292_v27 }
 0x4fb   :  { %v4788_v41 = vpop.eup %4787 }
 0x4fc   :  { %v1661_v43 = vpop.xlane.xlu0 %1660  ;;  %v4790_v44 = vpop.eup %4789  ;;  %v1708_v53 = vmul.f32 %v4788_v41, %v5678_v58 }
 0x4fd   :  { %4791 = vrcp.f32 %v1661_v43  ;;  %v1655_v26 = vpop.xlane.xlu2 %1654  ;;  %v1706_v21 = vmul.f32 %v4790_v44, %v5659_v1  ;;  %v1883_v43 = vpack.c.b16 %v1882_v47, %v1881_v57 }
 0x4fe   :  { %4793 = vrcp.f32 %v1655_v26  ;;  %v1724_v2 = vpack.c.bf16 %v1708_v53, %v1708_v53  ;;  %v1239_v26 = vpop.f32.mrf.mxu2 }
 0x4ff   :  { %v1722_v35 = vpack.c.bf16 %v1706_v21, %v1706_v21  ;;  %1895 = vmatpush.bf16.msra.mxu1 %v1883_v43  ;;  %v1240_v12 = vadd.f32 %v5717_v18, %v1239_v26 }
 0x500   :  { %v1820_v31 = vunpack.c.l.b16 %v1724_v2 }
 0x501   :  { %v1792_v38 = vunpack.c.l.b16 %v1722_v35  ;;  %v1293_v21 = vpack.c.bf16 %v1240_v12, %v1240_v12 }
 0x503   :  { %v4792_v32 = vpop.eup %4791 }
 0x504   :  { %v4794_v52 = vpop.eup %4793  ;;  %v1709_v17 = vmul.f32 %v4792_v32, %v5691_v23  ;;  %v1574_v7 = vpop.xlane.xlu0 %1573  ;;  %v1909_v32 = vunpack.c.l.b16 %v1293_v21 }
 0x505   :  { %v1707_v36 = vmul.f32 %v4794_v52, %v5693_v61  ;;  %v1600_v24 = vsub.f32 %v5701_v60, %v1574_v7 }
 0x506   :  { %v1725_v58 = vpack.c.bf16 %v1709_v17, %v1709_v17  ;;  %v1241_v53 = vpop.f32.mrf.mxu2 }
 0x507   :  { %v1723_v4 = vpack.c.bf16 %v1707_v36, %v1707_v36  ;;  %v1626_v1 = vmul.f32 1.442695, %v1600_v24  ;;  %v1242_v56 = vadd.f32 %v5717_v18, %v1241_v53 }
 0x508   :  { %v1821_v15 = vunpack.c.l.b16 %v1725_v58 }
 0x509   :  { %v1793_v41 = vunpack.c.l.b16 %v1723_v4  ;;  %4795 = vpow2.f32 %v1626_v1  ;;  %v1294_v52 = vpack.c.bf16 %v1242_v56, %v1242_v56 }
 0x50a   :  { %v1822_v23 = vpack.c.b16 %v1821_v15, %v1820_v31  ;;  %v4647_v31 = vld [vmem:[%s6818_s1 + $0x68] sm:$0xff]  ;;  %v4646_v15 = vld [vmem:[%s6818_s1 + $0x60] sm:$0xff] }
 0x50b   :  { %v1794_v44 = vpack.c.b16 %v1793_v41, %v1792_v38  ;;  %v1910_v2 = vunpack.c.l.b16 %v1294_v52  ;;  %v4645_v38 = vld [vmem:[%s6818_s1 + $0x28] sm:$0xff] }
 0x50c   :  { %4422 = vmatmul.msk.bf16.vlgmr.msrb.gmra.mxu3 %vm610_vm2, %v1822_v23 }
 0x50d   :  { %4421 = vmatmul.msk.bf16.vlgmr.msrb.gmra.mxu2 %vm610_vm2, %v1794_v44  ;;  %v1911_v17 = vpack.c.b16 %v1910_v2, %v1909_v32  ;;  %v4644_v44 = vld [vmem:[%s6818_s1 + $0x20] sm:$0xff] }
 0x50e   :  { %v1244_v42 = vpop.f32.mrf.mxu2 }
 0x50f   :  { %v5794_v61 = vpop.eup %4795  ;;  %v1245_v7 = vadd.f32 %v5717_v18, %v1244_v42  ;;  %1923 = vmatpush.bf16.msra.mxu2 %v1911_v17 }
 0x510   :  { %v1668_v60 = vsel %vm610_vm2, %v5794_v61, 0.0 }
 0x511   :  { %1669 = vadd.xlane.f32.xlu0 %v1668_v60  ;;  %v1295_v27 = vpack.c.bf16 %v1245_v7, %v1245_v7 }
 0x513   :  { %v1937_v36 = vunpack.c.l.b16 %v1295_v27  ;;  %2149 = vmatpush.bf16.msrb.mxu2 %v4645_v38 }
 0x516   :  { %v1246_v57 = vpop.f32.mrf.mxu2 }
 0x517   :  { %v1247_v35 = vadd.f32 %v5717_v18, %v1246_v57  ;;  %2150 = vmatpush.bf16.msrb.mxu2 %v4644_v44 }
 0x519   :  { %v1296_v24 = vpack.c.bf16 %v1247_v35, %v1247_v35 }
 0x51b   :  { %v1938_v58 = vunpack.c.l.b16 %v1296_v24 }
 0x51d   :  { %v1939_v47 = vpack.c.b16 %v1938_v58, %v1937_v36 }
 0x51f   :  { %1951 = vmatpush.bf16.msra.mxu3 %v1939_v47 }
 0x523   :  { %2220 = vmatpush.bf16.msrb.mxu3 %v4647_v31 }
 0x524   :  { %v1676_v4 = vpop.xlane.xlu1 %1675 }
 0x525   :  { %4797 = vrcp.f32 %v1676_v4 }
 0x527   :  { %2221 = vmatpush.bf16.msrb.mxu3 %v4646_v15 }
 0x52b   :  { %v4798_v41 = vpop.eup %4797 }
 0x52c   :  { %v1643_v18 = vpop.xlane.xlu1 %1642  ;;  %v1714_v60 = vmul.f32 %v4798_v41, %v5721_v20 }
 0x52e   :  { %v1730_v56 = vpack.c.bf16 %v1714_v60, %v1714_v60 }
 0x534   :  { %v1682_v1 = vpop.xlane.xlu2 %1681 }
 0x535   :  { %4799 = vrcp.f32 %v1682_v1 }
 0x53b   :  { %v4800_v23 = vpop.eup %4799 }
 0x53c   :  { %v1679_v43 = vpop.xlane.xlu2 %1678  ;;  %v1716_v53 = vmul.f32 %v4800_v23, %v5734_v3  ;;  %v1904_v3 = vunpack.c.l.b16 %v1730_v56 }
 0x53d   :  { %4801 = vrcp.f32 %v1679_v43  ;;  %v1685_v26 = vpop.xlane.xlu0 %1684 }
 0x53e   :  { %4803 = vrcp.f32 %v1685_v26  ;;  %v1732_v2 = vpack.c.bf16 %v1716_v53, %v1716_v53 }
 0x53f   :  { %4805 = vrcp.f32 %v1643_v18 }
 0x540   :  { %v1932_v47 = vunpack.c.l.b16 %v1732_v2 }
 0x543   :  { %v4802_v12 = vpop.eup %4801 }
 0x544   :  { %v4804_v21 = vpop.eup %4803  ;;  %v1715_v42 = vmul.f32 %v4802_v12, %v5741_v19  ;;  %v1568_v32 = vpop.xlane.xlu2 %1567 }
 0x545   :  { %v1646_v52 = vpop.xlane.xlu1 %1645  ;;  %v1717_v17 = vmul.f32 %v4804_v21, %v5743_v33  ;;  %v1598_v7 = vsub.f32 %v5751_v9, %v1568_v32  ;;  %v1640_v57 = vpop.xlane.xlu0 %1639 }
 0x546   :  { %v4806_v27 = vpop.eup %4805  ;;  %v1731_v35 = vpack.c.bf16 %v1715_v42, %v1715_v42  ;;  %4807 = vrcp.f32 %v1640_v57 }
 0x547   :  { %v1733_v20 = vpack.c.bf16 %v1717_v17, %v1717_v17  ;;  %v1622_v36 = vmul.f32 1.442695, %v1598_v7  ;;  %4809 = vrcp.f32 %v1646_v52  ;;  %v1703_v58 = vmul.f32 %v4806_v27, %v5727_v28 }
 0x548   :  { %v1905_v24 = vunpack.c.l.b16 %v1731_v35 }
 0x549   :  { %v1933_v19 = vunpack.c.l.b16 %v1733_v20  ;;  %4811 = vpow2.f32 %v1622_v36  ;;  %v1719_v15 = vpack.c.bf16 %v1703_v58, %v1703_v58 }
 0x54a   :  { %v1906_v4 = vpack.c.b16 %v1905_v24, %v1904_v3 }
 0x54b   :  { %v1934_v1 = vpack.c.b16 %v1933_v19, %v1932_v47  ;;  %v1737_v60 = vunpack.c.l.b16 %v1719_v15 }
 0x54c   :  { %v4808_v31 = vpop.eup %4807  ;;  %v1649_v33 = vpop.xlane.xlu2 %1648  ;;  %4425 = vmatmul.msk.bf16.vlgmr.msra.gmra.mxu2 %vm610_vm2, %v1906_v4 }
 0x54d   :  { %v4810_v9 = vpop.eup %4809  ;;  %v1702_v18 = vmul.f32 %v4808_v31, %v5756_v63  ;;  %4426 = vmatmul.msk.bf16.vlgmr.msra.gmra.mxu3 %vm610_vm2, %v1934_v1  ;;  %v1571_v43 = vpop.xlane.xlu0 %1570  ;;  %4813 = vrcp.f32 %v1649_v33  ;;  %v1030_v1 = vpack.c.bf16 %v5536_v54, %v5530_v59  ;;  %v5920_v54 = vld [vmem:[%s6819_s2 + $0x6] ss:$0 sm:$0xff] }
 0x54e   :  { %v1599_v38 = vsub.f32 %v5768_v16, %v1571_v43  ;;  %v1704_v26 = vmul.f32 %v4810_v9, %v5754_v10 }
 0x54f   :  { %v5824_v28 = vpop.eup %4811  ;;  %v1718_v41 = vpack.c.bf16 %v1702_v18, %v1702_v18 }
 0x550   :  { %v1624_v23 = vmul.f32 1.442695, %v1599_v38  ;;  %v1662_v44 = vsel %vm610_vm2, %v5824_v28, 0.0  ;;  %v1720_v21 = vpack.c.bf16 %v1704_v26, %v1704_v26 }
 0x551   :  { %v1736_v53 = vunpack.c.l.b16 %v1718_v41  ;;  %1663 = vadd.xlane.f32.xlu2 %v1662_v44  ;;  %v1031_v44 = vpack.c.bf16 %v5455_v29, %v5440_v22 }
 0x552   :  { %4815 = vpow2.f32 %v1624_v23  ;;  %v1764_v32 = vunpack.c.l.b16 %v1720_v21 }
 0x553   :  { %v4814_v63 = vpop.eup %4813  ;;  %v1738_v12 = vpack.c.b16 %v1737_v60, %v1736_v53 }
 0x554   :  { %v1705_v56 = vmul.f32 %v4814_v63, %v5770_v13  ;;  %v1035_v13 = vld [vmem:[%s6821_s4] sm:$0xf] }
 0x555   :  { %4419 = vmatmul.msk.bf16.vlgmr.msra.gmra.mxu0 %vm610_vm2, %v1738_v12  ;;  %v2070_v17 = vsel %vm1992_vm3, %v1035_v13, 0 }
 0x556   :  { %v1721_v16 = vpack.c.bf16 %v1705_v56, %v1705_v56 }
 0x558   :  { %v5831_v42 = vpop.eup %4815  ;;  %v1765_v10 = vunpack.c.l.b16 %v1721_v16 }
 0x559   :  { %v1665_v52 = vsel %vm610_vm2, %v5831_v42, 0.0 }
 0x55a   :  { %v1766_v2 = vpack.c.b16 %v1765_v10, %v1764_v32  ;;  %1666 = vadd.xlane.f32.xlu0 %v1665_v52 }
 0x55c   :  { %4420 = vmatmul.msk.bf16.vlgmr.msrb.gmra.mxu1 %vm610_vm2, %v1766_v2  ;;  %4457 = vmatmul.msk.bf16.vlgmr.msrb.gmra.mxu2 %vm101_vm0, %v5586_v5 }
 0x55d   :  { %4478 = vmatmul.msk.bf16.vlgmr.msrb.gmra.mxu3 %vm101_vm0, %v5586_v5  ;;  %2079 = vmatpush.bf16.msrb.mxu1 %v2070_v17  ;;  %v1032_v17 = vpack.c.bf16 %v5457_v37, %v5442_v62 }
 0x56c   :  { %4458 = vmatmul.msk.bf16.gmra.mxu2 %vm101_vm0, %v5601_v39  ;;  %v1673_v7 = vpop.xlane.xlu1 %1672 }
 0x56d   :  { %4479 = vmatmul.msk.bf16.gmra.mxu3 %vm101_vm0, %v5601_v39  ;;  %4817 = vrcp.f32 %v1673_v7 }
 0x573   :  { %v4818_v57 = vpop.eup %4817 }
 0x574   :  { %v1713_v39 = vmul.f32 %v4818_v57, %v5781_v30  ;;  %v1027_v30 = vpack.c.bf16 %v5431_v55, %v5418_v46  ;;  %v1029_v55 = vpack.c.bf16 %v5703_v14, %v5682_v34 }
 0x576   :  { %v1729_v35 = vpack.c.bf16 %v1713_v39, %v1713_v39 }
 0x578   :  { %v1877_v3 = vunpack.c.l.b16 %v1729_v35 }
 0x57c   :  { %4459 = vmatmul.msk.bf16.gmra.mxu2 %vm101_vm0, %v5618_v45 }
 0x57d   :  { %4480 = vmatmul.msk.bf16.gmra.mxu3 %vm101_vm0, %v5618_v45 }
 0x584   :  { %v1670_v5 = vpop.xlane.xlu0 %1669 }
 0x585   :  { %4819 = vrcp.f32 %v1670_v5  ;;  %v5938_v5 = vld [vmem:[%s6819_s2 + $0x2] ss:$0 sm:$0xff] }
 0x58b   :  { %v4820_v27 = vpop.eup %4819 }
 0x58c   :  { %v1712_v20 = vmul.f32 %v4820_v27, %v5794_v61  ;;  %4460 = vmatmul.msk.bf16.gmra.mxu2 %vm101_vm0, %v5645_v40 }
 0x58d   :  { %4481 = vmatmul.msk.bf16.gmra.mxu3 %vm101_vm0, %v5645_v40  ;;  %v1028_v40 = vpack.c.bf16 %v5433_v48, %v5420_v49  ;;  %v4427_v48 = vld [vmem:[%s6821_s4 + $0x4] sm:$0xf] }
 0x58e   :  { %v1728_v36 = vpack.c.bf16 %v1712_v20, %v1712_v20  ;;  %v1994_v58 = vsel %vm1992_vm3, %v4427_v48, 0 }
 0x58f   :  { %v5879_v46 = vpop.f32.mrf.mxu3  ;;  %2003 = vmatpush.bf16.msra.mxu0 %v1994_v58 }
 0x590   :  { %v1876_v24 = vunpack.c.l.b16 %v1728_v36 }
 0x592   :  { %v1878_v45 = vpack.c.b16 %v1877_v3, %v1876_v24 }
 0x594   :  { %4424 = vmatmul.msk.bf16.vlgmr.msra.gmra.mxu1 %vm610_vm2, %v1878_v45 }
 0x597   :  { %v5886_v49 = vpop.f32.mrf.mxu3 }
 0x59c   :  { %4461 = vmatmul.msk.bf16.gmra.mxu2 %vm101_vm0, %v5655_v51 }
 0x59d   :  { %4482 = vmatmul.msk.bf16.gmra.mxu3 %vm101_vm0, %v5655_v51  ;;  %v5875_v51 = vpop.f32.mrf.mxu2 }
 0x5a4   :  { %4436 = vmatmul.msk.bf16.vlgmr.msrb.gmra.mxu1 %vm379_vm1, %v1027_v30 }
 0x5a5   :  { %v5884_v61 = vpop.f32.mrf.mxu2 }
 0x5ac   :  { %4462 = vmatmul.msk.bf16.gmra.mxu2 %vm101_vm0, %v5670_v11 }
 0x5ad   :  { %4483 = vmatmul.msk.bf16.gmra.mxu3 %vm101_vm0, %v5670_v11 }
 0x5b4   :  { %4437 = vmatmul.msk.bf16.gmra.mxu1 %vm379_vm1, %v1028_v40 }
 0x5bc   :  { %4463 = vmatmul.msk.bf16.gmra.mxu2 %vm101_vm0, %v5687_v6 }
 0x5bd   :  { %4484 = vmatmul.msk.bf16.gmra.mxu3 %vm101_vm0, %v5687_v6  ;;  %v5895_v6 = vld [vmem:[%s6817_s0 + $0x38] sm:$0xff] }
 0x5c4   :  { %4438 = vmatmul.msk.bf16.gmra.mxu1 %vm379_vm1, %v1029_v55  ;;  %v1664_v11 = vpop.xlane.xlu2 %1663 }
 0x5c5   :  { %4821 = vrcp.f32 %v1664_v11 }
 0x5cb   :  { %v4822_v14 = vpop.eup %4821 }
 0x5cc   :  { %4464 = vmatmul.msk.bf16.gmra.mxu2 %vm101_vm0, %v5895_v6  ;;  %v1710_v4 = vmul.f32 %v4822_v14, %v5824_v28 }
 0x5cd   :  { %v1667_v34 = vpop.xlane.xlu0 %1666  ;;  %4485 = vmatmul.msk.bf16.gmra.mxu3 %vm101_vm0, %v5895_v6 }
 0x5ce   :  { %4823 = vrcp.f32 %v1667_v34  ;;  %v1726_v33 = vpack.c.bf16 %v1710_v4, %v1710_v4  ;;  %v1033_v4 = vpack.c.bf16 %v5711_v8, %v5709_v50  ;;  %v1960_v50 = vpack.c.bf16 %v5884_v61, %v5875_v51 }
 0x5cf   :  { %v5901_v47 = vpop.f32.mrf.mxu2 }
 0x5d0   :  { %v5903_v19 = vpop.f32.mrf.mxu3  ;;  %v1848_v38 = vunpack.c.l.b16 %v1726_v33 }
 0x5d2   :  { %v1757_v28 = vpop.f32.mrf.mxu0 }
 0x5d4   :  { %v4824_v31 = vpop.eup %4823  ;;  %4439 = vmatmul.msk.bf16.gmra.mxu1 %vm379_vm1, %v1030_v1 }
 0x5d5   :  { %v1711_v9 = vmul.f32 %v4824_v31, %v5831_v42 }
 0x5d7   :  { %v1727_v15 = vpack.c.bf16 %v1711_v9, %v1711_v9  ;;  %v5910_v18 = vpop.f32.mrf.mxu2 }
 0x5d8   :  { %v5912_v43 = vpop.f32.mrf.mxu3 }
 0x5d9   :  { %v1849_v41 = vunpack.c.l.b16 %v1727_v15  ;;  %v1785_v52 = vpop.f32.mrf.mxu1 }
 0x5da   :  { %v1759_v12 = vpop.f32.mrf.mxu0 }
 0x5db   :  { %v1850_v26 = vpack.c.b16 %v1849_v41, %v1848_v38  ;;  %v1958_v16 = vpack.c.bf16 %v1759_v12, %v1757_v28 }
 0x5dd   :  { %4423 = vmatmul.msk.bf16.vlgmr.msrb.gmra.mxu0 %vm610_vm2, %v1850_v26 }
 0x5df   :  { %v5915_v23 = vpop.f32.mrf.mxu2 }
 0x5e0   :  { %v2223_v59 = vpop.f32.mrf.mxu3 }
 0x5e1   :  { %v2224_v60 = vadd.f32 %v5920_v54, %v2223_v59  ;;  %v1787_v27 = vpop.f32.mrf.mxu1 }
 0x5e2   :  { %v1959_v37 = vpack.c.bf16 %v1787_v27, %v1785_v52  ;;  %v2153_v52 = vadd.f32 %v5938_v5, %v5915_v23 }
 0x5e3   :  { %v2350_v53 = vpack.c.bf16 %v2224_v60, %v2224_v60 }
 0x5e4   :  { %4440 = vmatmul.msk.bf16.gmra.mxu1 %vm379_vm1, %v1031_v44 }
 0x5e5   :  { %v2394_v42 = vunpack.c.l.b16 %v2350_v53 }
 0x5e7   :  { %v5926_v63 = vpop.f32.mrf.mxu2 }
 0x5e8   :  { %v2225_v21 = vpop.f32.mrf.mxu3 }
 0x5e9   :  { %v2226_v56 = vadd.f32 %v5920_v54, %v2225_v21 }
 0x5eb   :  { %v2351_v32 = vpack.c.bf16 %v2226_v56, %v2226_v56 }
 0x5ed   :  { %v2395_v10 = vunpack.c.l.b16 %v2351_v32  ;;  %4428 = vmatmul.msk.bf16.vlgmr.msra.gmra.mxu0 %vm379_vm1, %v1958_v16 }
 0x5ef   :  { %v2396_v2 = vpack.c.b16 %v2395_v10, %v2394_v42  ;;  %v2157_v22 = vpop.f32.mrf.mxu2  ;;  %v1034_v10 = vpack.c.bf16 %v5542_v0, %v5539_v25  ;;  %v2334_v0 = vpack.c.bf16 %v2153_v52, %v2153_v52 }
 0x5f0   :  { %v2228_v29 = vpop.f32.mrf.mxu3  ;;  %v2158_v20 = vadd.f32 %v5938_v5, %v2157_v22 }
 0x5f1   :  { %v2401_v13 = vsel %vm379_vm1, %v2396_v2, 0  ;;  %v2229_v7 = vadd.f32 %v5920_v54, %v2228_v29  ;;  %v2155_v2 = vadd.f32 %v5938_v5, %v5926_v63  ;;  %v2389_v63 = vunpack.c.l.b16 %v2334_v0 }
 0x5f2   :  { %2410 = vmatpush.bf16.xpose.msra.mxu1 %v2401_v13  ;;  %v2336_v45 = vpack.c.bf16 %v2158_v20, %v2158_v20 }
 0x5f3   :  { %v2352_v57 = vpack.c.bf16 %v2229_v7, %v2229_v7  ;;  %v2335_v7 = vpack.c.bf16 %v2155_v2, %v2155_v2 }
 0x5f4   :  { %4441 = vmatmul.msk.bf16.gmra.mxu1 %vm379_vm1, %v1032_v17  ;;  %v2419_v58 = vunpack.c.l.b16 %v2336_v45 }
 0x5f5   :  { %v2424_v3 = vunpack.c.l.b16 %v2352_v57  ;;  %v1961_v57 = vpack.c.bf16 %v5886_v49, %v5879_v46 }
 0x5f7   :  { %v2159_v39 = vpop.f32.mrf.mxu2 }
 0x5f8   :  { %v2230_v35 = vpop.f32.mrf.mxu3  ;;  %v2160_v62 = vadd.f32 %v5938_v5, %v2159_v39 }
 0x5f9   :  { %v2231_v36 = vadd.f32 %v5920_v54, %v2230_v35  ;;  %v2390_v35 = vunpack.c.l.b16 %v2335_v7 }
 0x5fa   :  { %v2337_v40 = vpack.c.bf16 %v2160_v62, %v2160_v62 }
 0x5fb   :  { %v2353_v24 = vpack.c.bf16 %v2231_v36, %v2231_v36 }
 0x5fc   :  { %v2420_v34 = vunpack.c.l.b16 %v2337_v40 }
 0x5fd   :  { %v2425_v30 = vunpack.c.l.b16 %v2353_v24  ;;  %4429 = vmatmul.msk.bf16.gmra.mxu0 %vm379_vm1, %v1959_v37  ;;  %v2391_v24 = vpack.c.b16 %v2390_v35, %v2389_v63 }
 0x5fe   :  { %v2421_v31 = vpack.c.b16 %v2420_v34, %v2419_v58 }
 0x5ff   :  { %v2426_v55 = vpack.c.b16 %v2425_v30, %v2424_v3  ;;  %v2162_v11 = vpop.f32.mrf.mxu2 }
 0x600   :  { %v2233_v48 = vpop.f32.mrf.mxu3  ;;  %v2163_v38 = vadd.f32 %v5938_v5, %v2162_v11 }
 0x601   :  { %v2431_v14 = vsel %vm379_vm1, %v2426_v55, 0  ;;  %v2234_v1 = vadd.f32 %v5920_v54, %v2233_v48 }
 0x602   :  { %2440 = vmatpush.bf16.xpose.msra.mxu2 %v2431_v14  ;;  %v2338_v59 = vpack.c.bf16 %v2163_v38, %v2163_v38 }
 0x603   :  { %v2354_v33 = vpack.c.bf16 %v2234_v1, %v2234_v1 }
 0x604   :  { %4442 = vmatmul.msk.bf16.gmra.mxu1 %vm379_vm1, %v1033_v4  ;;  %v2449_v56 = vunpack.c.l.b16 %v2338_v59 }
 0x605   :  { %v2454_v8 = vunpack.c.l.b16 %v2354_v33 }
 0x607   :  { %v2164_v9 = vpop.f32.mrf.mxu2 }
 0x608   :  { %v2235_v15 = vpop.f32.mrf.mxu3  ;;  %v2165_v26 = vadd.f32 %v5938_v5, %v2164_v9 }
 0x609   :  { %v2236_v41 = vadd.f32 %v5920_v54, %v2235_v15  ;;  %4510 = vmatmul.msk.bf16.vlgmr.msra.gmra.mxu2 %vm379_vm1, %v2421_v31 }
 0x60a   :  { %v2339_v60 = vpack.c.bf16 %v2165_v26, %v2165_v26 }
 0x60b   :  { %v2355_v28 = vpack.c.bf16 %v2236_v41, %v2236_v41 }
 0x60c   :  { %v2450_v16 = vunpack.c.l.b16 %v2339_v60 }
 0x60d   :  { %v2455_v44 = vunpack.c.l.b16 %v2355_v28  ;;  %4430 = vmatmul.msk.bf16.gmra.mxu0 %vm379_vm1, %v1960_v50 }
 0x60e   :  { %v2451_v61 = vpack.c.b16 %v2450_v16, %v2449_v56 }
 0x60f   :  { %v2456_v53 = vpack.c.b16 %v2455_v44, %v2454_v8  ;;  %v2167_v12 = vpop.f32.mrf.mxu2 }
 0x610   :  { %v2238_v21 = vpop.f32.mrf.mxu3  ;;  %v2168_v46 = vadd.f32 %v5938_v5, %v2167_v12 }
 0x611   :  { %v5956_v42 = vpop.f32.mrf.mxu1  ;;  %v2461_v32 = vsel %vm379_vm1, %v2456_v53, 0  ;;  %v2239_v51 = vadd.f32 %v5920_v54, %v2238_v21 }
 0x612   :  { %2470 = vmatpush.bf16.xpose.msra.mxu3 %v2461_v32  ;;  %v2340_v55 = vpack.c.bf16 %v2168_v46, %v2168_v46 }
 0x613   :  { %v2356_v22 = vpack.c.bf16 %v2239_v51, %v2239_v51 }
 0x614   :  { %4443 = vmatmul.msk.bf16.gmra.mxu1 %vm379_vm1, %v1034_v10  ;;  %v2479_v33 = vunpack.c.l.b16 %v2340_v55 }
 0x615   :  { %v2484_v39 = vunpack.c.l.b16 %v2356_v22 }
 0x617   :  { %v2169_v29 = vpop.f32.mrf.mxu2 }
 0x618   :  { %v2240_v13 = vpop.f32.mrf.mxu3  ;;  %v2170_v49 = vadd.f32 %v5938_v5, %v2169_v29 }
 0x619   :  { %4511 = vmatmul.msk.bf16.vlgmr.msra.gmra.mxu3 %vm379_vm1, %v2451_v61  ;;  %v5968_v17 = vpop.f32.mrf.mxu1  ;;  %v2241_v25 = vadd.f32 %v5920_v54, %v2240_v13 }
 0x61a   :  { %v2341_v11 = vpack.c.bf16 %v2170_v49, %v2170_v49 }
 0x61b   :  { %v2357_v27 = vpack.c.bf16 %v2241_v25, %v2241_v25 }
 0x61c   :  { %v2480_v9 = vunpack.c.l.b16 %v2341_v11 }
 0x61d   :  { %4431 = vmatmul.msk.bf16.gmra.mxu0 %vm379_vm1, %v1961_v57  ;;  %v2485_v23 = vunpack.c.l.b16 %v2357_v27 }
 0x61e   :  { %v2481_v50 = vpack.c.b16 %v2480_v9, %v2479_v33 }
 0x61f   :  { %v2486_v20 = vpack.c.b16 %v2485_v23, %v2484_v39  ;;  %v2172_v36 = vpop.f32.mrf.mxu2 }
 0x620   :  { %v2243_v62 = vpop.f32.mrf.mxu3  ;;  %v2173_v34 = vadd.f32 %v5938_v5, %v2172_v36 }
 0x621   :  { %v5974_v37 = vpop.f32.mrf.mxu1  ;;  %v2491_v3 = vsel %vm379_vm1, %v2486_v20, 0  ;;  %v2244_v45 = vadd.f32 %v5920_v54, %v2243_v62 }
 0x622   :  { %2500 = vmatpush.bf16.xpose.msrb.mxu1 %v2491_v3  ;;  %v2342_v15 = vpack.c.bf16 %v2173_v34, %v2173_v34 }
 0x623   :  { %v2358_v30 = vpack.c.bf16 %v2244_v45, %v2244_v45 }
 0x624   :  { %4509 = vmatmul.msk.bf16.vlgmr.msra.gmra.mxu1 %vm379_vm1, %v2391_v24  ;;  %v2509_v8 = vunpack.c.l.b16 %v2342_v15 }
 0x625   :  { %v2514_v1 = vunpack.c.l.b16 %v2358_v30 }
 0x627   :  { %v2174_v40 = vpop.f32.mrf.mxu2 }
 0x628   :  { %v2245_v48 = vpop.f32.mrf.mxu3  ;;  %v2175_v4 = vadd.f32 %v5938_v5, %v2174_v40 }
 0x629   :  { %v5981_v58 = vpop.f32.mrf.mxu1  ;;  %v2246_v14 = vadd.f32 %v5920_v54, %v2245_v48 }
 0x62a   :  { %v2343_v41 = vpack.c.bf16 %v2175_v4, %v2175_v4 }
 0x62b   :  { %v2359_v31 = vpack.c.bf16 %v2246_v14, %v2246_v14 }
 0x62c   :  { %v2510_v59 = vunpack.c.l.b16 %v2343_v41 }
 0x62d   :  { %v2515_v38 = vunpack.c.l.b16 %v2359_v31 }
 0x62e   :  { %v2511_v60 = vpack.c.b16 %v2510_v59, %v2509_v8 }
 0x62f   :  { %v2516_v26 = vpack.c.b16 %v2515_v38, %v2514_v1  ;;  %v2177_v12 = vpop.f32.mrf.mxu2 }
 0x630   :  { %v2248_v32 = vpop.f32.mrf.mxu3  ;;  %v2178_v2 = vadd.f32 %v5938_v5, %v2177_v12 }
 0x631   :  { %v5986_v28 = vpop.f32.mrf.mxu1  ;;  %v2521_v44 = vsel %vm379_vm1, %v2516_v26, 0  ;;  %v2249_v10 = vadd.f32 %v5920_v54, %v2248_v32 }
 0x632   :  { %2530 = vmatpush.bf16.xpose.msrb.mxu2 %v2521_v44  ;;  %v2344_v7 = vpack.c.bf16 %v2178_v2, %v2178_v2 }
 0x633   :  { %v2360_v61 = vpack.c.bf16 %v2249_v10, %v2249_v10  ;;  %v1963_v10 = vpack.c.bf16 %v5968_v17, %v5956_v42 }
 0x634   :  { %4512 = vmatmul.msk.bf16.vlgmr.msrb.gmra.mxu1 %vm379_vm1, %v2481_v50  ;;  %v2539_v20 = vunpack.c.l.b16 %v2344_v7 }
 0x635   :  { %v2544_v25 = vunpack.c.l.b16 %v2360_v61 }
 0x637   :  { %v2179_v16 = vpop.f32.mrf.mxu2 }
 0x638   :  { %v2250_v52 = vpop.f32.mrf.mxu3  ;;  %v2180_v22 = vadd.f32 %v5938_v5, %v2179_v16 }
 0x639   :  { %v5990_v53 = vpop.f32.mrf.mxu1  ;;  %4513 = vmatmul.msk.bf16.vlgmr.msrb.gmra.mxu2 %vm379_vm1, %v2511_v60  ;;  %v2251_v29 = vadd.f32 %v5920_v54, %v2250_v52 }
 0x63a   :  { %v2345_v57 = vpack.c.bf16 %v2180_v22, %v2180_v22 }
 0x63b   :  { %v2361_v0 = vpack.c.bf16 %v2251_v29, %v2251_v29 }
 0x63c   :  { %v2540_v36 = vunpack.c.l.b16 %v2345_v57 }
 0x63d   :  { %v2545_v39 = vunpack.c.l.b16 %v2361_v0 }
 0x63e   :  { %v2541_v45 = vpack.c.b16 %v2540_v36, %v2539_v20 }
 0x63f   :  { %v2182_v13 = vpop.f32.mrf.mxu2  ;;  %v2546_v23 = vpack.c.b16 %v2545_v39, %v2544_v25 }
 0x640   :  { %v2253_v35 = vpop.f32.mrf.mxu3  ;;  %v2183_v11 = vadd.f32 %v5938_v5, %v2182_v13 }
 0x641   :  { %v5993_v21 = vpop.f32.mrf.mxu1  ;;  %v2551_v62 = vsel %vm379_vm1, %v2546_v23, 0  ;;  %v2254_v3 = vadd.f32 %v5920_v54, %v2253_v35 }
 0x642   :  { %2560 = vmatpush.bf16.xpose.msrb.mxu3 %v2551_v62  ;;  %v2346_v1 = vpack.c.bf16 %v2183_v11, %v2183_v11 }
 0x643   :  { %v2362_v49 = vpack.c.bf16 %v2254_v3, %v2254_v3 }
 0x644   :  { %v2569_v26 = vunpack.c.l.b16 %v2346_v1 }
 0x645   :  { %v2574_v14 = vunpack.c.l.b16 %v2362_v49 }
 0x647   :  { %v2184_v24 = vpop.f32.mrf.mxu2 }
 0x648   :  { %v2255_v40 = vpop.f32.mrf.mxu3  ;;  %v2185_v48 = vadd.f32 %v5938_v5, %v2184_v24 }
 0x649   :  { %v5995_v56 = vpop.f32.mrf.mxu1  ;;  %v2256_v34 = vadd.f32 %v5920_v54, %v2255_v40  ;;  %4514 = vmatmul.msk.bf16.vlgmr.msrb.gmra.mxu3 %vm379_vm1, %v2541_v45 }
 0x64a   :  { %v2347_v31 = vpack.c.bf16 %v2185_v48, %v2185_v48 }
 0x64b   :  { %v2363_v4 = vpack.c.bf16 %v2256_v34, %v2256_v34 }
 0x64c   :  { %v2570_v50 = vunpack.c.l.b16 %v2347_v31 }
 0x64d   :  { %v2575_v33 = vunpack.c.l.b16 %v2363_v4 }
 0x64e   :  { %v2571_v44 = vpack.c.b16 %v2570_v50, %v2569_v26 }
 0x64f   :  { %v2187_v9 = vpop.f32.mrf.mxu2  ;;  %v2576_v38 = vpack.c.b16 %v2575_v33, %v2574_v14 }
 0x650   :  { %v2258_v41 = vpop.f32.mrf.mxu3  ;;  %v2188_v61 = vadd.f32 %v5938_v5, %v2187_v9 }
 0x651   :  { %v5998_v51 = vpop.f32.mrf.mxu1  ;;  %v2581_v8 = vsel %vm379_vm1, %v2576_v38, 0  ;;  %v2259_v59 = vadd.f32 %v5920_v54, %v2258_v41 }
 0x652   :  { %2590 = vmatpush.bf16.xpose.msra.mxu1 %v2581_v8  ;;  %v2348_v13 = vpack.c.bf16 %v2188_v61, %v2188_v61 }
 0x653   :  { %v2364_v12 = vpack.c.bf16 %v2259_v59, %v2259_v59 }
 0x654   :  { %v2599_v39 = vunpack.c.l.b16 %v2348_v13 }
 0x655   :  { %v2604_v22 = vunpack.c.l.b16 %v2364_v12 }
 0x657   :  { %v2189_v16 = vpop.f32.mrf.mxu2 }
 0x658   :  { %v2260_v32 = vpop.f32.mrf.mxu3  ;;  %v2190_v52 = vadd.f32 %v5938_v5, %v2189_v16 }
 0x659   :  { %v6003_v27 = vpop.f32.mrf.mxu1  ;;  %v2261_v2 = vadd.f32 %v5920_v54, %v2260_v32  ;;  %4515 = vmatmul.msk.bf16.vlgmr.msra.gmra.mxu1 %vm379_vm1, %v2571_v44  ;;  %v1964_v54 = vpack.c.bf16 %v5910_v18, %v5901_v47  ;;  %v1965_v18 = vpack.c.bf16 %v5912_v43, %v5903_v19 }
 0x65a   :  { %6824 = vst [vmem:[#allocation5_spill] sm:$0xff] %v6003_v27  ;;  %v1869_v63 = vpop.f32.mrf.mxu0  ;;  %v2349_v25 = vpack.c.bf16 %v2190_v52, %v2190_v52  ;;  %v4649_v52 = vld [vmem:[%s6818_s1 + $0xa8] sm:$0xff] }
 0x65b   :  { %v2365_v29 = vpack.c.bf16 %v2261_v2, %v2261_v2  ;;  %2291 = vmatpush.bf16.msrb.mxu0 %v4649_v52  ;;  %v4648_v2 = vld [vmem:[%s6818_s1 + $0xa0] sm:$0xff] }
 0x65c   :  { %v2600_v42 = vunpack.c.l.b16 %v2349_v25  ;;  %v6114_v25 = vld [vmem:[%s6817_s0 + $0x8] sm:$0xff] }
 0x65d   :  { %v2605_v0 = vunpack.c.l.b16 %v2365_v29  ;;  %v6105_v29 = vld [vmem:[%s6817_s0] sm:$0xff] }
 0x65e   :  { %v2601_v5 = vpack.c.b16 %v2600_v42, %v2599_v39  ;;  %v6125_v39 = vld [vmem:[%s6817_s0 + $0x10] sm:$0xff] }
 0x65f   :  { %v2606_v57 = vpack.c.b16 %v2605_v0, %v2604_v22  ;;  %2292 = vmatpush.bf16.msrb.mxu0 %v4648_v2 }
 0x661   :  { %v6007_v46 = vpop.f32.mrf.mxu1  ;;  %v2611_v17 = vsel %vm379_vm1, %v2606_v57, 0 }
 0x662   :  { %v1871_v30 = vpop.f32.mrf.mxu0  ;;  %2620 = vmatpush.bf16.xpose.msra.mxu2 %v2611_v17 }
 0x663   :  { %v1962_v55 = vpack.c.bf16 %v1871_v30, %v1869_v63  ;;  %v4673_v63 = vld [vmem:[%s6820_s3 + $0x10] sm:$0xff]  }
 0x664   :  { %v6041_v20 = vunpack.c.l.bf16 %v4673_v63  ;;  %v6056_v40 = vunpack.c.h.bf16 %v4673_v63 }
 0x665   :  { %4432 = vmatmul.msk.bf16.gmra.mxu0 %vm379_vm1, %v1962_v55 }
 0x669   :  { %v6014_v15 = vpop.f32.mrf.mxu1  ;;  %4516 = vmatmul.msk.bf16.vlgmr.msra.gmra.mxu2 %vm379_vm1, %v2601_v5 }
 0x66a   :  { %6825 = vst [vmem:[#allocation6_spill] sm:$0xff] %v6014_v15  ;;  %v6088_v32 = vpop.f32.mrf.mxu0 }
 0x671   :  { %v6018_v60 = vpop.f32.mrf.mxu1 }
 0x675   :  { %4433 = vmatmul.msk.bf16.gmra.mxu0 %vm379_vm1, %v1963_v10  ;;  %v6090_v10 = vpop.f32.mrf.mxu0 }
 0x679   :  { %v6027_v7 = vpop.f32.mrf.mxu1 }
 0x67a   :  { %6826 = vst [vmem:[#allocation7_spill] sm:$0xff] %v6027_v7 }
 0x67d   :  { %v6092_v61 = vpop.f32.mrf.mxu0 }
 0x681   :  { %v6030_v23 = vpop.f32.mrf.mxu1 }
 0x685   :  { %4434 = vmatmul.msk.bf16.gmra.mxu0 %vm379_vm1, %v1964_v54  ;;  %v6100_v22 = vpop.f32.mrf.mxu0 }
 0x689   :  { %v6039_v35 = vpop.f32.mrf.mxu1 }
 0x68a   :  { %6827 = vst [vmem:[#allocation8_spill] sm:$0xff] %v6039_v35 }
 0x68c   :  { %v2442_v36 = vpop.f32.mrf.mxu2 }
 0x68d   :  { %v6044_v62 = vadd.f32 %v6041_v20, %v2442_v36  ;;  %v6109_v13 = vpop.f32.mrf.mxu0 }
 0x68f   :  { %v2633_v3 = vsel %vm610_vm2, %v6044_v62, -inf }
 0x690   :  { %2634 = vmax.xlane.f32.xlu0 %v2633_v3 }
 0x691   :  { %v6048_v47 = vpop.f32.mrf.mxu1 }
 0x694   :  { %v2444_v48 = vpop.f32.mrf.mxu2 }
 0x695   :  { %4435 = vmatmul.msk.bf16.gmra.mxu0 %vm379_vm1, %v1965_v18  ;;  %v2445_v43 = vadd.f32 %v6056_v40, %v2444_v48  ;;  %v6118_v0 = vpop.f32.mrf.mxu0 }
 0x697   :  { %v2636_v31 = vsel %vm610_vm2, %v2445_v43, -inf }
 0x699   :  { %v6053_v24 = vpop.f32.mrf.mxu1 }
 0x69a   :  { %6828 = vst [vmem:[#allocation9_spill] sm:$0xff] %v6053_v24 }
 0x69c   :  { %v2472_v45 = vpop.f32.mrf.mxu3 }
 0x69d   :  { %v6069_v33 = vadd.f32 %v6041_v20, %v2472_v45  ;;  %v6120_v57 = vpop.f32.mrf.mxu0  ;;  %v6136_v45 = vld [vmem:[%s6817_s0 + $0x18] sm:$0xff] }
 0x69f   :  { %v2639_v41 = vsel %vm610_vm2, %v6069_v33, -inf }
 0x6a1   :  { %v2412_v49 = vpop.f32.mrf.mxu1 }
 0x6a2   :  { %v2413_v30 = vadd.f32 %v6041_v20, %v2412_v49 }
 0x6a4   :  { %v2474_v55 = vpop.f32.mrf.mxu3  ;;  %v2627_v11 = vsel %vm610_vm2, %v2413_v30, -inf }
 0x6a5   :  { %v6060_v34 = vadd.f32 %v6056_v40, %v2474_v55  ;;  %2628 = vmax.xlane.f32.xlu1 %v2627_v11  ;;  %4499 = vmatmul.msk.bf16.vlgmr.msrb.gmra.mxu0 %vm101_vm0, %v6105_v29  ;;  %v6129_v42 = vpop.f32.mrf.mxu0 }
 0x6a6   :  { %6829 = vst [vmem:[#allocation10_spill] sm:$0xff] %v6129_v42 }
 0x6a7   :  { %v2642_v19 = vsel %vm610_vm2, %v6060_v34, -inf }
 0x6a8   :  { %2643 = vmax.xlane.f32.xlu0 %v2642_v19 }
 0x6a9   :  { %v2414_v14 = vpop.f32.mrf.mxu1 }
 0x6aa   :  { %v2415_v4 = vadd.f32 %v6056_v40, %v2414_v14 }
 0x6ac   :  { %v2630_v1 = vsel %vm610_vm2, %v2415_v4, -inf }
 0x6ad   :  { %2631 = vmax.xlane.f32.xlu2 %v2630_v1  ;;  %2637 = vmax.xlane.f32.xlu1 %v2636_v31 }
 0x6b1   :  { %v2502_v9 = vpop.f32.mrf.mxu1 }
 0x6b2   :  { %v6072_v38 = vadd.f32 %v6041_v20, %v2502_v9 }
 0x6b4   :  { %v2645_v26 = vsel %vm610_vm2, %v6072_v38, -inf }
 0x6b5   :  { %2640 = vmax.xlane.f32.xlu2 %v2639_v41  ;;  %2646 = vmax.xlane.f32.xlu1 %v2645_v26 }
 0x6b6   :  { %4500 = vmatmul.msk.bf16.gmra.mxu0 %vm101_vm0, %v6114_v25 }
 0x6b9   :  { %v2504_v50 = vpop.f32.mrf.mxu1 }
 0x6ba   :  { %v6079_v8 = vadd.f32 %v6056_v40, %v2504_v50 }
 0x6bc   :  { %v2648_v59 = vsel %vm610_vm2, %v6079_v8, -inf  ;;  %v2532_v44 = vpop.f32.mrf.mxu2 }
 0x6bd   :  { %2649 = vmax.xlane.f32.xlu2 %v2648_v59  ;;  %v6084_v12 = vadd.f32 %v6041_v20, %v2532_v44 }
 0x6bf   :  { %v2651_v16 = vsel %vm610_vm2, %v6084_v12, -inf }
 0x6c4   :  { %v2534_v1 = vpop.f32.mrf.mxu2 }
 0x6c5   :  { %2652 = vmax.xlane.f32.xlu2 %v2651_v16  ;;  %v6146_v9 = vadd.f32 %v6056_v40, %v2534_v1 }
 0x6c6   :  { %4501 = vmatmul.msk.bf16.gmra.mxu0 %vm101_vm0, %v6125_v39 }
 0x6cc   :  { %v2562_v50 = vpop.f32.mrf.mxu3 }
 0x6d6   :  { %4502 = vmatmul.msk.bf16.gmra.mxu0 %vm101_vm0, %v6136_v45  ;;  %v2592_v52 = vpop.f32.mrf.mxu1 }
 0x6de   :  { %v2594_v1 = vpop.f32.mrf.mxu1 }
 0x6e2   :  { %v6131_v63 = vpop.f32.mrf.mxu0 }
 0x703   :  { %v2635_v36 = vpop.xlane.xlu0 %2634 }
 0x718   :  { %v2629_v17 = vpop.xlane.xlu1 %2628 }
 0x719   :  { %v2675_v5 = vsub.f32 %v2413_v30, %v2629_v17  ;;  %v2677_v30 = vsub.f32 %v6044_v62, %v2635_v36  ;;  %v2654_v17 = vsel %vm610_vm2, %v6146_v9, -inf }
 0x71b   :  { %v2691_v54 = vmul.f32 1.442695, %v2675_v5  ;;  %v2695_v31 = vmul.f32 1.442695, %v2677_v30  ;;  %v2644_v41 = vpop.xlane.xlu0 %2643 }
 0x71c   :  { %v2680_v59 = vsub.f32 %v6060_v34, %v2644_v41  ;;  %v6163_v34 = vadd.f32 %v6041_v20, %v2562_v50  ;;  %v2622_v50 = vpop.f32.mrf.mxu2 }
 0x71d   :  { %4825 = vpow2.f32 %v2691_v54  ;;  %v6168_v54 = vld [vmem:[%s6817_s0 + $0x20] sm:$0xff] }
 0x71e   :  { %v2701_v5 = vmul.f32 1.442695, %v2680_v59  ;;  %4503 = vmatmul.msk.bf16.gmra.mxu0 %vm101_vm0, %v6168_v54 }
 0x720   :  { %v2632_v3 = vpop.xlane.xlu2 %2631  ;;  %v2638_v18 = vpop.xlane.xlu1 %2637 }
 0x721   :  { %v2676_v49 = vsub.f32 %v2415_v4, %v2632_v3  ;;  %v2678_v55 = vsub.f32 %v2445_v43, %v2638_v18  ;;  %v6148_v43 = vpop.f32.mrf.mxu0 }
 0x722   :  { %6830 = vst [vmem:[#allocation11_spill] sm:$0xff] %v6148_v43 }
 0x723   :  { %v6140_v11 = vpop.eup %4825  ;;  %v2693_v48 = vmul.f32 1.442695, %v2676_v49  ;;  %v2697_v19 = vmul.f32 1.442695, %v2678_v55 }
 0x724   :  { %v2723_v14 = vsel %vm610_vm2, %v6140_v11, 0.0 }
 0x725   :  { %4827 = vpow2.f32 %v2693_v48  ;;  %2724 = vadd.xlane.f32.xlu0 %v2723_v14  ;;  %v2657_v48 = vsel %vm610_vm2, %v6163_v34, -inf  ;;  %v2564_v14 = vpop.f32.mrf.mxu3 }
 0x726   :  { %4829 = vpow2.f32 %v2697_v19  ;;  %v6186_v41 = vadd.f32 %v6056_v40, %v2564_v14  ;;  %v2624_v14 = vpop.f32.mrf.mxu2 }
 0x727   :  { %4831 = vpow2.f32 %v2695_v31 }
 0x728   :  { %v2641_v4 = vpop.xlane.xlu2 %2640  ;;  %v2647_v3 = vpop.xlane.xlu1 %2646 }
 0x729   :  { %v2679_v26 = vsub.f32 %v6069_v33, %v2641_v4  ;;  %v6176_v49 = vpop.f32.mrf.mxu0  ;;  %v2681_v55 = vsub.f32 %v6072_v38, %v2647_v3  ;;  %v6203_v3 = vadd.f32 %v6041_v20, %v2592_v52 }
 0x72b   :  { %v6151_v62 = vpop.eup %4827  ;;  %v2699_v44 = vmul.f32 1.442695, %v2679_v26  ;;  %v2703_v4 = vmul.f32 1.442695, %v2681_v55  ;;  %v6191_v26 = vadd.f32 %v6056_v40, %v2594_v1  ;;  %v2663_v52 = vsel %vm610_vm2, %v6203_v3, -inf }
 0x72c   :  { %v6154_v16 = vpop.eup %4829  ;;  %v2726_v2 = vsel %vm610_vm2, %v6151_v62, 0.0 }
 0x72d   :  { %4833 = vpow2.f32 %v2699_v44  ;;  %2727 = vadd.xlane.f32.xlu1 %v2726_v2  ;;  %2655 = vmax.xlane.f32.xlu0 %v2654_v17  ;;  %v2732_v33 = vsel %vm610_vm2, %v6154_v16, 0.0  ;;  %v6172_v36 = vpop.eup %4831  ;;  %v2660_v44 = vsel %vm610_vm2, %v6186_v41, -inf }
 0x72e   :  { %2733 = vadd.xlane.f32.xlu2 %v2732_v33  ;;  %4835 = vpow2.f32 %v2701_v5  ;;  %v2729_v30 = vsel %vm610_vm2, %v6172_v36, 0.0  ;;  %v2666_v33 = vsel %vm610_vm2, %v6191_v26, -inf }
 0x72f   :  { %4837 = vpow2.f32 %v2703_v4 }
 0x730   :  { %v2650_v31 = vpop.xlane.xlu2 %2649 }
 0x731   :  { %v2682_v59 = vsub.f32 %v6079_v8, %v2650_v31  ;;  %v6198_v17 = vpop.f32.mrf.mxu0  ;;  %v6206_v8 = vadd.f32 %v6041_v20, %v2622_v50  ;;  %v6227_v50 = vadd.f32 %v6056_v40, %v2624_v14 }
 0x732   :  { %6831 = vst [vmem:[#allocation12_spill] sm:$0xff] %v6198_v17 }
 0x733   :  { %v6174_v18 = vpop.eup %4833  ;;  %v2705_v5 = vmul.f32 1.442695, %v2682_v59  ;;  %v2669_v20 = vsel %vm610_vm2, %v6206_v8, -inf  ;;  %v2672_v59 = vsel %vm610_vm2, %v6227_v50, -inf }
 0x734   :  { %v2735_v19 = vsel %vm610_vm2, %v6174_v18, 0.0  ;;  %v6188_v38 = vpop.eup %4835 }
 0x735   :  { %2730 = vadd.xlane.f32.xlu1 %v2729_v30  ;;  %2658 = vmax.xlane.f32.xlu0 %v2657_v48  ;;  %v2738_v2 = vsel %vm610_vm2, %v6188_v38, 0.0  ;;  %v6211_v30 = vld [vmem:[%s6817_s0 + $0x28] sm:$0xff]  ;;  %v6215_v48 = vpop.eup %4837  ;;  %4839 = vpow2.f32 %v2705_v5 }
 0x736   :  { %2736 = vadd.xlane.f32.xlu2 %v2735_v19  ;;  %4504 = vmatmul.msk.bf16.gmra.mxu0 %vm101_vm0, %v6211_v30  ;;  %v2741_v1 = vsel %vm610_vm2, %v6215_v48, 0.0 }
 0x738   :  { %v2653_v55 = vpop.xlane.xlu2 %2652 }
 0x739   :  { %v2683_v19 = vsub.f32 %v6084_v12, %v2653_v55  ;;  %v6224_v31 = vpop.f32.mrf.mxu0 }
 0x73b   :  { %v2707_v4 = vmul.f32 1.442695, %v2683_v19  ;;  %v6229_v12 = vpop.eup %4839 }
 0x73d   :  { %2661 = vmax.xlane.f32.xlu1 %v2660_v44  ;;  %2739 = vadd.xlane.f32.xlu0 %v2738_v2  ;;  %4841 = vpow2.f32 %v2707_v4  ;;  %v2744_v44 = vsel %vm610_vm2, %v6229_v12, 0.0  ;;  %v6238_v2 = vld [vmem:[%s6817_s0 + $0x30] sm:$0xff] }
 0x73e   :  { %2667 = vmax.xlane.f32.xlu2 %v2666_v33 }
 0x741   :  { %v6244_v33 = vpop.f32.mrf.mxu0 }
 0x742   :  { %6832 = vst [vmem:[#allocation13_spill] sm:$0xff] %v6244_v33 }
 0x743   :  { %v6242_v40 = vpop.eup %4841 }
 0x744   :  { %v2747_v5 = vsel %vm610_vm2, %v6242_v40, 0.0 }
 0x745   :  { %2664 = vmax.xlane.f32.xlu1 %v2663_v52  ;;  %2670 = vmax.xlane.f32.xlu0 %v2669_v20  ;;  %v6257_v52 = vld [vmem:[%s6819_s2 + $0xa] ss:$0 sm:$0xff] }
 0x746   :  { %2742 = vadd.xlane.f32.xlu2 %v2741_v1  ;;  %4505 = vmatmul.msk.bf16.gmra.mxu0 %vm101_vm0, %v6238_v2 }
 0x749   :  { %v6248_v55 = vpop.f32.mrf.mxu0 }
 0x74d   :  { %2673 = vmax.xlane.f32.xlu1 %v2672_v59  ;;  %2745 = vadd.xlane.f32.xlu0 %v2744_v44 }
 0x751   :  { %v6252_v19 = vpop.f32.mrf.mxu0 }
 0x752   :  { %6833 = vst [vmem:[#allocation14_spill] sm:$0xff] %v6252_v19 }
 0x755   :  { %2748 = vadd.xlane.f32.xlu1 %v2747_v5 }
 0x756   :  { %4506 = vmatmul.msk.bf16.gmra.mxu0 %vm101_vm0, %v5895_v6 }
 0x759   :  { %v2294_v20 = vpop.f32.mrf.mxu0 }
 0x75a   :  { %v2295_v14 = vadd.f32 %v6257_v52, %v2294_v20 }
 0x75c   :  { %v2366_v1 = vpack.c.bf16 %v2295_v14, %v2295_v14 }
 0x75e   :  { %v2826_v44 = vunpack.c.l.b16 %v2366_v1 }
 0x761   :  { %v2296_v4 = vpop.f32.mrf.mxu0 }
 0x762   :  { %v2297_v59 = vadd.f32 %v6257_v52, %v2296_v4 }
 0x764   :  { %v2367_v5 = vpack.c.bf16 %v2297_v59, %v2297_v59 }
 0x766   :  { %v2827_v24 = vunpack.c.l.b16 %v2367_v5 }
 0x768   :  { %v2828_v35 = vpack.c.b16 %v2827_v24, %v2826_v44 }
 0x769   :  { %v2299_v33 = vpop.f32.mrf.mxu0 }
 0x76a   :  { %2840 = vmatpush.bf16.msra.mxu3 %v2828_v35  ;;  %v2300_v19 = vadd.f32 %v6257_v52, %v2299_v33 }
 0x76c   :  { %v2368_v7 = vpack.c.bf16 %v2300_v19, %v2300_v19 }
 0x76e   :  { %v2854_v43 = vunpack.c.l.b16 %v2368_v7 }
 0x771   :  { %v2301_v6 = vpop.f32.mrf.mxu0 }
 0x772   :  { %v2302_v15 = vadd.f32 %v6257_v52, %v2301_v6 }
 0x774   :  { %v2369_v27 = vpack.c.bf16 %v2302_v15, %v2302_v15 }
 0x776   :  { %v2855_v20 = vunpack.c.l.b16 %v2369_v27 }
 0x778   :  { %v2856_v14 = vpack.c.b16 %v2855_v20, %v2854_v43 }
 0x779   :  { %v2304_v17 = vpop.f32.mrf.mxu0 }
 0x77a   :  { %v2305_v4 = vadd.f32 %v6257_v52, %v2304_v17  ;;  %2868 = vmatpush.bf16.msrb.mxu1 %v2856_v14 }
 0x77c   :  { %v2370_v59 = vpack.c.bf16 %v2305_v4, %v2305_v4 }
 0x77e   :  { %v2882_v44 = vunpack.c.l.b16 %v2370_v59 }
 0x781   :  { %v2306_v42 = vpop.f32.mrf.mxu0 }
 0x782   :  { %v2307_v1 = vadd.f32 %v6257_v52, %v2306_v42 }
 0x784   :  { %v2371_v35 = vpack.c.bf16 %v2307_v1, %v2307_v1 }
 0x786   :  { %v2883_v5 = vunpack.c.l.b16 %v2371_v35 }
 0x788   :  { %v2884_v33 = vpack.c.b16 %v2883_v5, %v2882_v44 }
 0x789   :  { %v2309_v19 = vpop.f32.mrf.mxu0 }
 0x78a   :  { %2896 = vmatpush.bf16.msrb.mxu2 %v2884_v33  ;;  %v2310_v20 = vadd.f32 %v6257_v52, %v2309_v19 }
 0x791   :  { %v2311_v14 = vpop.f32.mrf.mxu0 }
 0x792   :  { %v2312_v4 = vadd.f32 %v6257_v52, %v2311_v14 }
 0x794   :  { %v2373_v33 = vpack.c.bf16 %v2312_v4, %v2312_v4 }
 0x798   :  { %v2725_v24 = vpop.xlane.xlu0 %2724 }
 0x799   :  { %4843 = vrcp.f32 %v2725_v24  ;;  %v2372_v24 = vpack.c.bf16 %v2310_v20, %v2310_v20 }
 0x79f   :  { %v4844_v15 = vpop.eup %4843 }
 0x7a0   :  { %v2656_v6 = vpop.xlane.xlu0 %2655  ;;  %v2728_v7 = vpop.xlane.xlu1 %2727  ;;  %v2787_v42 = vmul.f32 %v4844_v15, %v6140_v11  ;;  %v2910_v11 = vunpack.c.l.b16 %v2372_v24 }
 0x7a1   :  { %v2684_v27 = vsub.f32 %v6146_v9, %v2656_v6  ;;  %v2734_v43 = vpop.xlane.xlu2 %2733  ;;  %4845 = vrcp.f32 %v2728_v7 }
 0x7a2   :  { %4847 = vrcp.f32 %v2734_v43  ;;  %v2803_v35 = vpack.c.bf16 %v2787_v42, %v2787_v42 }
 0x7a3   :  { %v2709_v17 = vmul.f32 1.442695, %v2684_v27  ;;  %v2911_v27 = vunpack.c.l.b16 %v2373_v33 }
 0x7a4   :  { %v2821_v20 = vunpack.c.l.b16 %v2803_v35 }
 0x7a5   :  { %4849 = vpow2.f32 %v2709_v17  ;;  %v2912_v14 = vpack.c.b16 %v2911_v27, %v2910_v11 }
 0x7a7   :  { %v4846_v1 = vpop.eup %4845  ;;  %2924 = vmatpush.bf16.msrb.mxu3 %v2912_v14 }
 0x7a8   :  { %v4848_v59 = vpop.eup %4847  ;;  %v2788_v44 = vmul.f32 %v4846_v1, %v6151_v62  ;;  %v2659_v5 = vpop.xlane.xlu0 %2658 }
 0x7a9   :  { %v2731_v9 = vpop.xlane.xlu1 %2730  ;;  %v2685_v6 = vsub.f32 %v6163_v34, %v2659_v5  ;;  %v2737_v7 = vpop.xlane.xlu2 %2736  ;;  %v2790_v43 = vmul.f32 %v4848_v59, %v6154_v16 }
 0x7aa   :  { %4851 = vrcp.f32 %v2731_v9  ;;  %v2804_v15 = vpack.c.bf16 %v2788_v44, %v2788_v44 }
 0x7ab   :  { %v6271_v19 = vpop.eup %4849  ;;  %v2711_v17 = vmul.f32 1.442695, %v2685_v6  ;;  %4853 = vrcp.f32 %v2737_v7  ;;  %v2806_v1 = vpack.c.bf16 %v2790_v43, %v2790_v43 }
 0x7ac   :  { %v2822_v42 = vunpack.c.l.b16 %v2804_v15  ;;  %v2750_v62 = vsel %vm610_vm2, %v6271_v19, 0.0 }
 0x7ad   :  { %4855 = vpow2.f32 %v2711_v17  ;;  %2751 = vadd.xlane.f32.xlu2 %v2750_v62  ;;  %v2850_v7 = vunpack.c.l.b16 %v2806_v1  ;;  %v2314_v17 = vpop.f32.mrf.mxu0 }
 0x7ae   :  { %v2823_v34 = vpack.c.b16 %v2822_v42, %v2821_v20  ;;  %v2315_v42 = vadd.f32 %v6257_v52, %v2314_v17 }
 0x7b0   :  { %v4852_v4 = vpop.eup %4851  ;;  %v2740_v44 = vpop.xlane.xlu0 %2739  ;;  %4517 = vmatmul.msk.bf16.vlgmr.msra.gmra.mxu3 %vm610_vm2, %v2823_v34 }
 0x7b1   :  { %v2789_v24 = vmul.f32 %v4852_v4, %v6172_v36  ;;  %v2662_v5 = vpop.xlane.xlu1 %2661  ;;  %v4854_v16 = vpop.eup %4853  ;;  %4857 = vrcp.f32 %v2740_v44 }
 0x7b2   :  { %v2668_v59 = vpop.xlane.xlu2 %2667  ;;  %v2686_v35 = vsub.f32 %v6186_v41, %v2662_v5  ;;  %v2791_v15 = vmul.f32 %v4854_v16, %v6174_v18 }
 0x7b3   :  { %v2805_v9 = vpack.c.bf16 %v2789_v24, %v2789_v24  ;;  %v2688_v33 = vsub.f32 %v6191_v26, %v2668_v59  ;;  %v6280_v6 = vpop.eup %4855  ;;  %v2374_v59 = vpack.c.bf16 %v2315_v42, %v2315_v42 }
 0x7b4   :  { %v2713_v11 = vmul.f32 1.442695, %v2686_v35  ;;  %v2753_v43 = vsel %vm610_vm2, %v6280_v6, 0.0  ;;  %v2807_v26 = vpack.c.bf16 %v2791_v15, %v2791_v15 }
 0x7b5   :  { %v2849_v27 = vunpack.c.l.b16 %v2805_v9  ;;  %v2717_v36 = vmul.f32 1.442695, %v2688_v33  ;;  %2754 = vadd.xlane.f32.xlu0 %v2753_v43  ;;  %v2938_v15 = vunpack.c.l.b16 %v2374_v59 }
 0x7b6   :  { %4859 = vpow2.f32 %v2713_v11  ;;  %v2877_v9 = vunpack.c.l.b16 %v2807_v26 }
 0x7b7   :  { %v2851_v20 = vpack.c.b16 %v2850_v7, %v2849_v27  ;;  %4861 = vpow2.f32 %v2717_v36  ;;  %v4858_v41 = vpop.eup %4857  ;;  %v2316_v7 = vpop.f32.mrf.mxu0 }
 0x7b8   :  { %v2792_v62 = vmul.f32 %v4858_v41, %v6188_v38  ;;  %v2671_v14 = vpop.xlane.xlu0 %2670 }
 0x7b9   :  { %v2665_v34 = vpop.xlane.xlu1 %2664  ;;  %4518 = vmatmul.msk.bf16.vlgmr.msrb.gmra.mxu1 %vm610_vm2, %v2851_v20  ;;  %v2689_v18 = vsub.f32 %v6206_v8, %v2671_v14 }
 0x7ba   :  { %v2743_v4 = vpop.xlane.xlu2 %2742  ;;  %v2687_v1 = vsub.f32 %v6203_v3, %v2665_v34  ;;  %v2808_v24 = vpack.c.bf16 %v2792_v62, %v2792_v62  ;;  %v2317_v3 = vadd.f32 %v6257_v52, %v2316_v7 }
 0x7bb   :  { %v2719_v5 = vmul.f32 1.442695, %v2689_v18  ;;  %4863 = vrcp.f32 %v2743_v4 }
 0x7bc   :  { %v6290_v44 = vpop.eup %4859  ;;  %v2715_v16 = vmul.f32 1.442695, %v2687_v1  ;;  %v2878_v38 = vunpack.c.l.b16 %v2808_v24  ;;  %v2375_v27 = vpack.c.bf16 %v2317_v3, %v2317_v3 }
 0x7bd   :  { %v6292_v35 = vpop.eup %4861  ;;  %v2756_v33 = vsel %vm610_vm2, %v6290_v44, 0.0  ;;  %4865 = vpow2.f32 %v2719_v5 }
 0x7be   :  { %v2762_v8 = vsel %vm610_vm2, %v6292_v35, 0.0  ;;  %2757 = vadd.xlane.f32.xlu1 %v2756_v33  ;;  %v2879_v11 = vpack.c.b16 %v2878_v38, %v2877_v9  ;;  %4867 = vpow2.f32 %v2715_v16  ;;  %v2939_v41 = vunpack.c.l.b16 %v2375_v27 }
 0x7bf   :  { %2763 = vadd.xlane.f32.xlu0 %v2762_v8  ;;  %v2319_v4 = vpop.f32.mrf.mxu0 }
 0x7c0   :  { %v2746_v36 = vpop.xlane.xlu0 %2745  ;;  %4519 = vmatmul.msk.bf16.vlgmr.msrb.gmra.mxu2 %vm610_vm2, %v2879_v11  ;;  %v2940_v62 = vpack.c.b16 %v2939_v41, %v2938_v15  ;;  %v2320_v24 = vadd.f32 %v6257_v52, %v2319_v4 }
 0x7c1   :  { %v2674_v43 = vpop.xlane.xlu1 %2673  ;;  %v4864_v17 = vpop.eup %4863  ;;  %4869 = vrcp.f32 %v2746_v36 }
 0x7c2   :  { %v2690_v20 = vsub.f32 %v6227_v50, %v2674_v43  ;;  %v2793_v34 = vmul.f32 %v4864_v17, %v6215_v48  ;;  %2952 = vmatpush.bf16.msra.mxu1 %v2940_v62  ;;  %v2376_v48 = vpack.c.bf16 %v2320_v24, %v2320_v24 }
 0x7c3   :  { %v6301_v42 = vpop.eup %4865 }
 0x7c4   :  { %v2721_v26 = vmul.f32 1.442695, %v2690_v20  ;;  %v6303_v14 = vpop.eup %4867  ;;  %v2765_v18 = vsel %vm610_vm2, %v6301_v42, 0.0  ;;  %v2809_v5 = vpack.c.bf16 %v2793_v34, %v2793_v34  ;;  %v2966_v15 = vunpack.c.l.b16 %v2376_v48 }
 0x7c5   :  { %v2759_v1 = vsel %vm610_vm2, %v6303_v14, 0.0 }
 0x7c6   :  { %4871 = vpow2.f32 %v2721_v26  ;;  %2766 = vadd.xlane.f32.xlu1 %v2765_v18  ;;  %2760 = vadd.xlane.f32.xlu2 %v2759_v1  ;;  %v2905_v38 = vunpack.c.l.b16 %v2809_v5 }
 0x7c7   :  { %v4870_v50 = vpop.eup %4869  ;;  %v2321_v8 = vpop.f32.mrf.mxu0 }
 0x7c8   :  { %v2794_v16 = vmul.f32 %v4870_v50, %v6229_v12  ;;  %v2322_v3 = vadd.f32 %v6257_v52, %v2321_v8 }
 0x7c9   :  { %v2749_v50 = vpop.xlane.xlu1 %2748 }
 0x7ca   :  { %v2810_v59 = vpack.c.bf16 %v2794_v16, %v2794_v16  ;;  %v2377_v27 = vpack.c.bf16 %v2322_v3, %v2322_v3  ;;  %4873 = vrcp.f32 %v2749_v50 }
 0x7cc   :  { %v6312_v9 = vpop.eup %4871  ;;  %v2906_v33 = vunpack.c.l.b16 %v2810_v59  ;;  %v2967_v36 = vunpack.c.l.b16 %v2377_v27 }
 0x7cd   :  { %v2768_v7 = vsel %vm610_vm2, %v6312_v9, 0.0 }
 0x7ce   :  { %v2907_v11 = vpack.c.b16 %v2906_v33, %v2905_v38  ;;  %2769 = vadd.xlane.f32.xlu2 %v2768_v7  ;;  %v2968_v12 = vpack.c.b16 %v2967_v36, %v2966_v15 }
 0x7cf   :  { %v2324_v43 = vpop.f32.mrf.mxu0 }
 0x7d0   :  { %4520 = vmatmul.msk.bf16.vlgmr.msrb.gmra.mxu3 %vm610_vm2, %v2907_v11  ;;  %2980 = vmatpush.bf16.msra.mxu2 %v2968_v12  ;;  %v2325_v20 = vadd.f32 %v6257_v52, %v2324_v43  ;;  %v4874_v33 = vpop.eup %4873 }
 0x7d1   :  { %v2795_v3 = vmul.f32 %v4874_v33, %v6242_v40 }
 0x7d2   :  { %v2378_v26 = vpack.c.bf16 %v2325_v20, %v2325_v20  ;;  %v4525_v20 = vld [vmem:[%s6821_s4 + $0x8] sm:$0xf] }
 0x7d3   :  { %v2811_v27 = vpack.c.bf16 %v2795_v3, %v2795_v3 }
 0x7d4   :  { %v2994_v34 = vunpack.c.l.b16 %v2378_v26 }
 0x7d7   :  { %v2326_v17 = vpop.f32.mrf.mxu0 }
 0x7d8   :  { %v2327_v41 = vadd.f32 %v6257_v52, %v2326_v17  ;;  %v2933_v17 = vunpack.c.l.b16 %v2811_v27 }
 0x7da   :  { %v2379_v62 = vpack.c.bf16 %v2327_v41, %v2327_v41  ;;  %v3078_v41 = vsel %vm1992_vm3, %v4525_v20, 0 }
 0x7db   :  { %3087 = vmatpush.bf16.msrb.mxu2 %v3078_v41 }
 0x7dc   :  { %v2995_v18 = vunpack.c.l.b16 %v2379_v62 }
 0x7de   :  { %v2996_v4 = vpack.c.b16 %v2995_v18, %v2994_v34  ;;  %v4653_v18 = vld [vmem:[%s6818_s1 + $0x78] sm:$0xff] }
 0x7df   :  { %v2329_v1 = vpop.f32.mrf.mxu0 }
 0x7e0   :  { %3008 = vmatpush.bf16.msra.mxu3 %v2996_v4  ;;  %v2330_v5 = vadd.f32 %v6257_v52, %v2329_v1  ;;  %v4650_v1 = vld [vmem:[%s6818_s1 + $0x30] sm:$0xff] }
 0x7e2   :  { %v2380_v48 = vpack.c.bf16 %v2330_v5, %v2330_v5 }
 0x7e4   :  { %v3022_v7 = vunpack.c.l.b16 %v2380_v48 }
 0x7e7   :  { %v2331_v24 = vpop.f32.mrf.mxu0 }
 0x7e8   :  { %v2332_v16 = vadd.f32 %v6257_v52, %v2331_v24 }
 0x7ea   :  { %v2381_v38 = vpack.c.bf16 %v2332_v16, %v2332_v16 }
 0x7ec   :  { %v3023_v8 = vunpack.c.l.b16 %v2381_v38 }
 0x7ee   :  { %v3024_v11 = vpack.c.b16 %v3023_v8, %v3022_v7 }
 0x7f0   :  { %3036 = vmatpush.bf16.msrb.mxu1 %v3024_v11 }
 0x820   :  { %v2752_v59 = vpop.xlane.xlu2 %2751 }
 0x821   :  { %4875 = vrcp.f32 %v2752_v59 }
 0x827   :  { %v4876_v15 = vpop.eup %4875 }
 0x828   :  { %v2796_v36 = vmul.f32 %v4876_v15, %v6271_v19  ;;  %v2755_v12 = vpop.xlane.xlu0 %2754  ;;  %v4651_v19 = vld [vmem:[%s6818_s1 + $0x38] sm:$0xff] }
 0x829   :  { %4877 = vrcp.f32 %v2755_v12  ;;  %3173 = vmatpush.bf16.msrb.mxu3 %v4651_v19 }
 0x82a   :  { %v2812_v43 = vpack.c.bf16 %v2796_v36, %v2796_v36 }
 0x82c   :  { %v2934_v52 = vunpack.c.l.b16 %v2812_v43 }
 0x82d   :  { %3174 = vmatpush.bf16.msrb.mxu3 %v4650_v1 }
 0x82e   :  { %v2935_v26 = vpack.c.b16 %v2934_v52, %v2933_v17 }
 0x82f   :  { %v4878_v62 = vpop.eup %4877 }
 0x830   :  { %4521 = vmatmul.msk.bf16.vlgmr.msra.gmra.mxu1 %vm610_vm2, %v2935_v26  ;;  %v2797_v4 = vmul.f32 %v4878_v62, %v6280_v6  ;;  %v4652_v6 = vld [vmem:[%s6818_s1 + $0x70] sm:$0xff] }
 0x831   :  { %v2758_v40 = vpop.xlane.xlu1 %2757  ;;  %3244 = vmatpush.bf16.msra.mxu1 %v4653_v18 }
 0x832   :  { %v2764_v34 = vpop.xlane.xlu0 %2763  ;;  %4879 = vrcp.f32 %v2758_v40  ;;  %v2813_v24 = vpack.c.bf16 %v2797_v4, %v2797_v4 }
 0x833   :  { %4881 = vrcp.f32 %v2764_v34  ;;  %v2842_v15 = vpop.f32.mrf.mxu3 }
 0x834   :  { %v2961_v33 = vunpack.c.l.b16 %v2813_v24 }
 0x835   :  { %3245 = vmatpush.bf16.msra.mxu1 %v4652_v6 }
 0x836   :  { %v2870_v1 = vpop.f32.mrf.mxu1 }
 0x838   :  { %v4880_v50 = vpop.eup %4879 }
 0x839   :  { %v2798_v5 = vmul.f32 %v4880_v50, %v6290_v44  ;;  %v2761_v16 = vpop.xlane.xlu2 %2760  ;;  %v2767_v59 = vpop.xlane.xlu1 %2766 }
 0x83a   :  { %v4882_v48 = vpop.eup %4881  ;;  %4883 = vrcp.f32 %v2761_v16 }
 0x83b   :  { %v2814_v38 = vpack.c.bf16 %v2798_v5, %v2798_v5  ;;  %4885 = vrcp.f32 %v2767_v59  ;;  %v2800_v8 = vmul.f32 %v4882_v48, %v6292_v35  ;;  %v2844_v62 = vpop.f32.mrf.mxu3 }
 0x83d   :  { %v2962_v7 = vunpack.c.l.b16 %v2814_v38  ;;  %v2816_v44 = vpack.c.bf16 %v2800_v8, %v2800_v8 }
 0x83f   :  { %v2963_v3 = vpack.c.b16 %v2962_v7, %v2961_v33  ;;  %v2990_v17 = vunpack.c.l.b16 %v2816_v44 }
 0x840   :  { %v4884_v11 = vpop.eup %4883 }
 0x841   :  { %4522 = vmatmul.msk.bf16.vlgmr.msra.gmra.mxu2 %vm610_vm2, %v2963_v3  ;;  %v2799_v27 = vmul.f32 %v4884_v11, %v6303_v14  ;;  %v2770_v36 = vpop.xlane.xlu2 %2769  ;;  %v4886_v12 = vpop.eup %4885  ;;  %v3043_v14 = vpack.c.bf16 %v2844_v62, %v2842_v15 }
 0x842   :  { %4887 = vrcp.f32 %v2770_v36  ;;  %v2801_v20 = vmul.f32 %v4886_v12, %v6301_v42  ;;  %v2872_v42 = vpop.f32.mrf.mxu1  ;;  %v6403_v12 = vld [vmem:[%s6819_s2 + $0x7] ss:$0 sm:$0xff] }
 0x843   :  { %v2815_v43 = vpack.c.bf16 %v2799_v27, %v2799_v27  ;;  %v3044_v50 = vpack.c.bf16 %v2872_v42, %v2870_v1 }
 0x844   :  { %v2817_v35 = vpack.c.bf16 %v2801_v20, %v2801_v20 }
 0x845   :  { %v2989_v52 = vunpack.c.l.b16 %v2815_v43 }
 0x846   :  { %v3017_v19 = vunpack.c.l.b16 %v2817_v35 }
 0x847   :  { %v2991_v41 = vpack.c.b16 %v2990_v17, %v2989_v52 }
 0x848   :  { %v4888_v26 = vpop.eup %4887 }
 0x849   :  { %v2802_v40 = vmul.f32 %v4888_v26, %v6312_v9  ;;  %4523 = vmatmul.msk.bf16.vlgmr.msra.gmra.mxu3 %vm610_vm2, %v2991_v41  ;;  %v2898_v9 = vpop.f32.mrf.mxu2 }
 0x84b   :  { %v2818_v34 = vpack.c.bf16 %v2802_v40, %v2802_v40 }
 0x84d   :  { %v3018_v18 = vunpack.c.l.b16 %v2818_v34 }
 0x84f   :  { %v3019_v4 = vpack.c.b16 %v3018_v18, %v3017_v19 }
 0x851   :  { %4526 = vmatmul.msk.bf16.vlgmr.msrb.gmra.mxu2 %vm379_vm1, %v3043_v14  ;;  %4524 = vmatmul.msk.bf16.vlgmr.msrb.gmra.mxu1 %vm610_vm2, %v3019_v4  ;;  %v2900_v24 = vpop.f32.mrf.mxu2 }
 0x852   :  { %v3045_v5 = vpack.c.bf16 %v2900_v24, %v2898_v9 }
 0x853   :  { %v2926_v16 = vpop.f32.mrf.mxu3 }
 0x859   :  { %4547 = vmatmul.msk.bf16.vlgmr.msrb.gmra.mxu3 %vm101_vm0, %v6105_v29 }
 0x85b   :  { %v2928_v59 = vpop.f32.mrf.mxu3 }
 0x85c   :  { %v3046_v48 = vpack.c.bf16 %v2928_v59, %v2926_v16 }
 0x861   :  { %4527 = vmatmul.msk.bf16.gmra.mxu2 %vm379_vm1, %v3044_v50  ;;  %4568 = vmatmul.msk.bf16.vlgmr.msra.gmra.mxu1 %vm101_vm0, %v6105_v29  ;;  %v2092_v50 = vadd.f32 %v5993_v21, %v6109_v13 }
 0x869   :  { %4548 = vmatmul.msk.bf16.gmra.mxu3 %vm101_vm0, %v6114_v25 }
 0x871   :  { %4528 = vmatmul.msk.bf16.gmra.mxu2 %vm379_vm1, %v3045_v5  ;;  %4569 = vmatmul.msk.bf16.gmra.mxu1 %vm101_vm0, %v6114_v25 }
 0x879   :  { %4549 = vmatmul.msk.bf16.gmra.mxu3 %vm101_vm0, %v6125_v39 }
 0x881   :  { %4529 = vmatmul.msk.bf16.gmra.mxu2 %vm379_vm1, %v3046_v48  ;;  %4570 = vmatmul.msk.bf16.gmra.mxu1 %vm101_vm0, %v6125_v39 }
 0x889   :  { %4550 = vmatmul.msk.bf16.gmra.mxu3 %vm101_vm0, %v6136_v45 }
 0x891   :  { %4571 = vmatmul.msk.bf16.gmra.mxu1 %vm101_vm0, %v6136_v45 }
 0x899   :  { %4551 = vmatmul.msk.bf16.gmra.mxu3 %vm101_vm0, %v6168_v54 }
 0x8a1   :  { %4572 = vmatmul.msk.bf16.gmra.mxu1 %vm101_vm0, %v6168_v54  ;;  %v6386_v54 = vld [vmem:[%s6817_s0 + $0x38] sm:$0xff] }
 0x8a9   :  { %4552 = vmatmul.msk.bf16.gmra.mxu3 %vm101_vm0, %v6211_v30 }
 0x8ad   :  { %v2954_v29 = vpop.f32.mrf.mxu1 }
 0x8b1   :  { %4573 = vmatmul.msk.bf16.gmra.mxu1 %vm101_vm0, %v6211_v30 }
 0x8b5   :  { %v2956_v25 = vpop.f32.mrf.mxu1 }
 0x8b6   :  { %v3047_v39 = vpack.c.bf16 %v2956_v25, %v2954_v29 }
 0x8b8   :  { %4530 = vmatmul.msk.bf16.gmra.mxu2 %vm379_vm1, %v3047_v39 }
 0x8b9   :  { %4553 = vmatmul.msk.bf16.gmra.mxu3 %vm101_vm0, %v6238_v2 }
 0x8c1   :  { %4574 = vmatmul.msk.bf16.gmra.mxu1 %vm101_vm0, %v6238_v2  ;;  %v2082_v2 = vadd.f32 %v5974_v37, %v6088_v32  ;;  %v2087_v37 = vadd.f32 %v5986_v28, %v6092_v61  ;;  %v6416_v28 = vld [vmem:[%s6819_s2 + $0x3] ss:$0 sm:$0xff] }
 0x8c4   :  { %v2982_v45 = vpop.f32.mrf.mxu2 }
 0x8c9   :  { %4554 = vmatmul.msk.bf16.gmra.mxu3 %vm101_vm0, %v6386_v54 }
 0x8cc   :  { %v2984_v30 = vpop.f32.mrf.mxu2  ;;  %v3010_v33 = vpop.f32.mrf.mxu3 }
 0x8cd   :  { %v3048_v38 = vpack.c.bf16 %v2984_v30, %v2982_v45 }
 0x8ce   :  { %v3038_v7 = vpop.f32.mrf.mxu1 }
 0x8cf   :  { %4531 = vmatmul.msk.bf16.gmra.mxu2 %vm379_vm1, %v3048_v38 }
 0x8d1   :  { %4575 = vmatmul.msk.bf16.gmra.mxu1 %vm101_vm0, %v6386_v54 }
 0x8d4   :  { %v3089_v6 = vpop.f32.mrf.mxu2  ;;  %v3012_v8 = vpop.f32.mrf.mxu3 }
 0x8d5   :  { %v6395_v3 = vadd.f32 %v3089_v6, %v2082_v2  ;;  %v3049_v15 = vpack.c.bf16 %v3012_v8, %v3010_v33 }
 0x8d6   :  { %v3040_v11 = vpop.f32.mrf.mxu1 }
 0x8d7   :  { %v3050_v19 = vpack.c.bf16 %v3040_v11, %v3038_v7 }
 0x8dc   :  { %v6397_v44 = vpop.f32.mrf.mxu2  ;;  %v3176_v27 = vpop.f32.mrf.mxu3 }
 0x8dd   :  { %v3177_v1 = vadd.f32 %v6416_v28, %v3176_v27 }
 0x8de   :  { %v3247_v36 = vpop.f32.mrf.mxu1 }
 0x8df   :  { %4532 = vmatmul.msk.bf16.gmra.mxu2 %vm379_vm1, %v3049_v15  ;;  %v3248_v32 = vadd.f32 %v6403_v12, %v3247_v36  ;;  %v3358_v5 = vpack.c.bf16 %v3177_v1, %v3177_v1 }
 0x8e1   :  { %v3374_v41 = vpack.c.bf16 %v3248_v32, %v3248_v32  ;;  %v3413_v45 = vunpack.c.l.b16 %v3358_v5 }
 0x8e3   :  { %v3418_v40 = vunpack.c.l.b16 %v3374_v41 }
 0x8e4   :  { %v3094_v43 = vpop.f32.mrf.mxu2  ;;  %v3178_v52 = vpop.f32.mrf.mxu3 }
 0x8e5   :  { %v6408_v17 = vadd.f32 %v3094_v43, %v2087_v37  ;;  %v3179_v42 = vadd.f32 %v6416_v28, %v3178_v52  ;;  %v2097_v52 = vadd.f32 %v5998_v51, %v6120_v57 }
 0x8e6   :  { %v3249_v20 = vpop.f32.mrf.mxu1 }
 0x8e7   :  { %v3250_v26 = vadd.f32 %v6403_v12, %v3249_v20  ;;  %v3359_v16 = vpack.c.bf16 %v3179_v42, %v3179_v42 }
 0x8e9   :  { %v3375_v35 = vpack.c.bf16 %v3250_v26, %v3250_v26  ;;  %v3414_v30 = vunpack.c.l.b16 %v3359_v16 }
 0x8eb   :  { %v3419_v62 = vunpack.c.l.b16 %v3375_v35  ;;  %v3415_v6 = vpack.c.b16 %v3414_v30, %v3413_v45 }
 0x8ec   :  { %v6411_v34 = vpop.f32.mrf.mxu2  ;;  %v3181_v61 = vpop.f32.mrf.mxu3 }
 0x8ed   :  { %v3420_v18 = vpack.c.b16 %v3419_v62, %v3418_v40  ;;  %v3182_v38 = vadd.f32 %v6416_v28, %v3181_v61 }
 0x8ee   :  { %v3252_v14 = vpop.f32.mrf.mxu1 }
 0x8ef   :  { %4533 = vmatmul.msk.bf16.gmra.mxu2 %vm379_vm1, %v3050_v19  ;;  %v3425_v4 = vsel %vm379_vm1, %v3420_v18, 0  ;;  %v3253_v9 = vadd.f32 %v6403_v12, %v3252_v14  ;;  %v3360_v11 = vpack.c.bf16 %v3182_v38, %v3182_v38 }
 0x8f0   :  { %3434 = vmatpush.bf16.xpose.msra.mxu2 %v3425_v4 }
 0x8f1   :  { %v3376_v25 = vpack.c.bf16 %v3253_v9, %v3253_v9  ;;  %v3443_v32 = vunpack.c.l.b16 %v3360_v11 }
 0x8f3   :  { %v3448_v21 = vunpack.c.l.b16 %v3376_v25 }
 0x8f4   :  { %v3099_v24 = vpop.f32.mrf.mxu2  ;;  %v3183_v48 = vpop.f32.mrf.mxu3 }
 0x8f5   :  { %v6425_v59 = vadd.f32 %v3099_v24, %v2092_v50  ;;  %v3184_v7 = vadd.f32 %v6416_v28, %v3183_v48 }
 0x8f6   :  { %v3254_v29 = vpop.f32.mrf.mxu1 }
 0x8f7   :  { %v3255_v39 = vadd.f32 %v6403_v12, %v3254_v29  ;;  %v3361_v27 = vpack.c.bf16 %v3184_v7, %v3184_v7 }
 0x8f9   :  { %v3377_v33 = vpack.c.bf16 %v3255_v39, %v3255_v39  ;;  %v3444_v43 = vunpack.c.l.b16 %v3361_v27 }
 0x8fb   :  { %v3449_v13 = vunpack.c.l.b16 %v3377_v33  ;;  %v3445_v40 = vpack.c.b16 %v3444_v43, %v3443_v32 }
 0x8fc   :  { %v6430_v2 = vpop.f32.mrf.mxu2  ;;  %v3186_v8 = vpop.f32.mrf.mxu3 }
 0x8fd   :  { %v3450_v15 = vpack.c.b16 %v3449_v13, %v3448_v21  ;;  %v3187_v18 = vadd.f32 %v6416_v28, %v3186_v8 }
 0x8fe   :  { %v3257_v36 = vpop.f32.mrf.mxu1 }
 0x8ff   :  { %4599 = vmatmul.msk.bf16.vlgmr.msra.gmra.mxu2 %vm379_vm1, %v3415_v6  ;;  %v3455_v37 = vsel %vm379_vm1, %v3450_v15, 0  ;;  %v3258_v20 = vadd.f32 %v6403_v12, %v3257_v36  ;;  %v3362_v42 = vpack.c.bf16 %v3187_v18, %v3187_v18 }
 0x900   :  { %3464 = vmatpush.bf16.xpose.msra.mxu3 %v3455_v37 }
 0x901   :  { %v3378_v19 = vpack.c.bf16 %v3258_v20, %v3258_v20  ;;  %v3473_v16 = vunpack.c.l.b16 %v3362_v42 }
 0x903   :  { %v3478_v1 = vunpack.c.l.b16 %v3378_v19 }
 0x904   :  { %v3104_v41 = vpop.f32.mrf.mxu2  ;;  %v3188_v35 = vpop.f32.mrf.mxu3 }
 0x905   :  { %v6437_v26 = vadd.f32 %v3104_v41, %v2097_v52  ;;  %v3189_v4 = vadd.f32 %v6416_v28, %v3188_v35 }
 0x906   :  { %v3259_v62 = vpop.f32.mrf.mxu1 }
 0x907   :  { %v3260_v61 = vadd.f32 %v6403_v12, %v3259_v62  ;;  %4600 = vmatmul.msk.bf16.vlgmr.msra.gmra.mxu3 %vm379_vm1, %v3445_v40  ;;  %v3363_v9 = vpack.c.bf16 %v3189_v4, %v3189_v4 }
 0x909   :  { %v3379_v14 = vpack.c.bf16 %v3260_v61, %v3260_v61  ;;  %v3474_v48 = vunpack.c.l.b16 %v3363_v9 }
 0x90b   :  { %v3479_v51 = vunpack.c.l.b16 %v3379_v14  ;;  %v3475_v39 = vpack.c.b16 %v3474_v48, %v3473_v16 }
 0x90c   :  { %v3191_v57 = vpop.f32.mrf.mxu3  ;;  %v6457_v48 = vpop.f32.mrf.mxu2 }
 0x90d   :  { %v3480_v50 = vpack.c.b16 %v3479_v51, %v3478_v1  ;;  %v3192_v33 = vadd.f32 %v6416_v28, %v3191_v57 }
 0x90e   :  { %v3262_v24 = vpop.f32.mrf.mxu1 }
 0x90f   :  { %v3485_v5 = vsel %vm379_vm1, %v3480_v50, 0  ;;  %v3263_v29 = vadd.f32 %v6403_v12, %v3262_v24  ;;  %v3364_v11 = vpack.c.bf16 %v3192_v33, %v3192_v33 }
 0x910   :  { %3494 = vmatpush.bf16.xpose.msrb.mxu1 %v3485_v5 }
 0x911   :  { %v3380_v30 = vpack.c.bf16 %v3263_v29, %v3263_v29  ;;  %v3503_v32 = vunpack.c.l.b16 %v3364_v11 }
 0x913   :  { %v3508_v13 = vunpack.c.l.b16 %v3380_v30 }
 0x914   :  { %v3193_v25 = vpop.f32.mrf.mxu3 }
 0x915   :  { %v3194_v21 = vadd.f32 %v6416_v28, %v3193_v25 }
 0x916   :  { %v3264_v45 = vpop.f32.mrf.mxu1 }
 0x917   :  { %v3265_v38 = vadd.f32 %v6403_v12, %v3264_v45  ;;  %4601 = vmatmul.msk.bf16.vlgmr.msrb.gmra.mxu1 %vm379_vm1, %v3475_v39  ;;  %v3365_v27 = vpack.c.bf16 %v3194_v21, %v3194_v21 }
 0x919   :  { %v3381_v7 = vpack.c.bf16 %v3265_v38, %v3265_v38  ;;  %v3504_v43 = vunpack.c.l.b16 %v3365_v27 }
 0x91b   :  { %v3509_v6 = vunpack.c.l.b16 %v3381_v7  ;;  %v3505_v41 = vpack.c.b16 %v3504_v43, %v3503_v32 }
 0x91c   :  { %v3196_v8 = vpop.f32.mrf.mxu3 }
 0x91d   :  { %v3510_v15 = vpack.c.b16 %v3509_v6, %v3508_v13  ;;  %v3197_v62 = vadd.f32 %v6416_v28, %v3196_v8  ;;  %v2102_v13 = vadd.f32 %v6007_v46, %v6131_v63 }
 0x91e   :  { %v3267_v36 = vpop.f32.mrf.mxu1 }
 0x91f   :  { %v3515_v37 = vsel %vm379_vm1, %v3510_v15, 0  ;;  %v3268_v52 = vadd.f32 %v6403_v12, %v3267_v36  ;;  %v3366_v4 = vpack.c.bf16 %v3197_v62, %v3197_v62 }
 0x920   :  { %3524 = vmatpush.bf16.xpose.msrb.mxu2 %v3515_v37 }
 0x921   :  { %v3382_v35 = vpack.c.bf16 %v3268_v52, %v3268_v52  ;;  %v3533_v9 = vunpack.c.l.b16 %v3366_v4 }
 0x923   :  { %v3538_v18 = vunpack.c.l.b16 %v3382_v35 }
 0x924   :  { %v3198_v20 = vpop.f32.mrf.mxu3 }
 0x925   :  { %v3199_v61 = vadd.f32 %v6416_v28, %v3198_v20 }
 0x926   :  { %v3269_v40 = vpop.f32.mrf.mxu1 }
 0x927   :  { %v3270_v19 = vadd.f32 %v6403_v12, %v3269_v40  ;;  %4602 = vmatmul.msk.bf16.vlgmr.msrb.gmra.mxu2 %vm379_vm1, %v3505_v41  ;;  %v3367_v51 = vpack.c.bf16 %v3199_v61, %v3199_v61 }
 0x929   :  { %v3383_v14 = vpack.c.bf16 %v3270_v19, %v3270_v19  ;;  %v3534_v24 = vunpack.c.l.b16 %v3367_v51 }
 0x92b   :  { %v3539_v1 = vunpack.c.l.b16 %v3383_v14  ;;  %v3535_v29 = vpack.c.b16 %v3534_v24, %v3533_v9 }
 0x92c   :  { %v3201_v57 = vpop.f32.mrf.mxu3 }
 0x92d   :  { %v3540_v42 = vpack.c.b16 %v3539_v1, %v3538_v18  ;;  %v3202_v30 = vadd.f32 %v6416_v28, %v3201_v57 }
 0x92e   :  { %v3272_v50 = vpop.f32.mrf.mxu1 }
 0x92f   :  { %v3545_v5 = vsel %vm379_vm1, %v3540_v42, 0  ;;  %v3273_v16 = vadd.f32 %v6403_v12, %v3272_v50  ;;  %v3368_v8 = vpack.c.bf16 %v3202_v30, %v3202_v30 }
 0x930   :  { %3554 = vmatpush.bf16.xpose.msrb.mxu3 %v3545_v5 }
 0x931   :  { %v3384_v39 = vpack.c.bf16 %v3273_v16, %v3273_v16  ;;  %v3563_v43 = vunpack.c.l.b16 %v3368_v8 }
 0x933   :  { %v3568_v7 = vunpack.c.l.b16 %v3384_v39 }
 0x934   :  { %v3203_v25 = vpop.f32.mrf.mxu3 }
 0x935   :  { %v3204_v38 = vadd.f32 %v6416_v28, %v3203_v25 }
 0x936   :  { %v3274_v45 = vpop.f32.mrf.mxu1 }
 0x937   :  { %4603 = vmatmul.msk.bf16.vlgmr.msrb.gmra.mxu3 %vm379_vm1, %v3535_v29  ;;  %v3275_v33 = vadd.f32 %v6403_v12, %v3274_v45  ;;  %v3369_v11 = vpack.c.bf16 %v3204_v38, %v3204_v38  ;;  %v2107_v29 = vadd.f32 %v6018_v60, %v6176_v49 }
 0x939   :  { %v3385_v21 = vpack.c.bf16 %v3275_v33, %v3275_v33  ;;  %v3564_v52 = vunpack.c.l.b16 %v3369_v11 }
 0x93b   :  { %v3109_v6 = vpop.f32.mrf.mxu2  ;;  %v3569_v15 = vunpack.c.l.b16 %v3385_v21  ;;  %v3565_v35 = vpack.c.b16 %v3564_v52, %v3563_v43 }
 0x93c   :  { %v6465_v27 = vadd.f32 %v3109_v6, %v2102_v13  ;;  %v3206_v36 = vpop.f32.mrf.mxu3 }
 0x93d   :  { %v3570_v37 = vpack.c.b16 %v3569_v15, %v3568_v7  ;;  %v3207_v63 = vadd.f32 %v6416_v28, %v3206_v36 }
 0x93e   :  { %v3277_v32 = vpop.f32.mrf.mxu1 }
 0x93f   :  { %v3575_v20 = vsel %vm379_vm1, %v3570_v37, 0  ;;  %v3278_v41 = vadd.f32 %v6403_v12, %v3277_v32  ;;  %v3370_v1 = vpack.c.bf16 %v3207_v63, %v3207_v63 }
 0x940   :  { %3584 = vmatpush.bf16.xpose.msra.mxu1 %v3575_v20  ;;  %v2112_v20 = vadd.f32 %v6030_v23, %v6224_v31  ;;  %v4674_v23 = vld [vmem:[%s6820_s3 + $0x18] sm:$0xff]   ;;  %s5005_s3 = smov 4  }
 0x941   :  { %v3386_v62 = vpack.c.bf16 %v3278_v41, %v3278_v41  ;;  %v3593_v24 = vunpack.c.l.b16 %v3370_v1  ;;  %v6504_v31 = vunpack.c.l.bf16 %v4674_v23 }
 0x943   :  { %v6473_v18 = vpop.f32.mrf.mxu2  ;;  %v3598_v14 = vunpack.c.l.b16 %v3386_v62 }
 0x944   :  { %v3208_v40 = vpop.f32.mrf.mxu3 }
 0x945   :  { %v3209_v19 = vadd.f32 %v6416_v28, %v3208_v40  ;;  %v2117_v40 = vadd.f32 %v6048_v47, %v6248_v55 }
 0x946   :  { %v3279_v46 = vpop.f32.mrf.mxu1 }
 0x947   :  { %v3280_v61 = vadd.f32 %v6403_v12, %v3279_v46  ;;  %4604 = vmatmul.msk.bf16.vlgmr.msra.gmra.mxu1 %vm379_vm1, %v3565_v35  ;;  %v3371_v51 = vpack.c.bf16 %v3209_v19, %v3209_v19 }
 0x949   :  { %v3387_v4 = vpack.c.bf16 %v3280_v61, %v3280_v61  ;;  %v3594_v5 = vunpack.c.l.b16 %v3371_v51 }
 0x94b   :  { %v3599_v57 = vunpack.c.l.b16 %v3387_v4  ;;  %v3595_v30 = vpack.c.b16 %v3594_v5, %v3593_v24  ;;  %v6508_v4 = vunpack.c.h.bf16 %v4674_v23 }
 0x94c   :  { %v3211_v42 = vpop.f32.mrf.mxu3 }
 0x94d   :  { %v3600_v50 = vpack.c.b16 %v3599_v57, %v3598_v14  ;;  %v3212_v21 = vadd.f32 %v6416_v28, %v3211_v42 }
 0x94e   :  { %v3282_v9 = vpop.f32.mrf.mxu1 }
 0x94f   :  { %v3605_v16 = vsel %vm379_vm1, %v3600_v50, 0  ;;  %v3283_v39 = vadd.f32 %v6403_v12, %v3282_v9  ;;  %v3372_v11 = vpack.c.bf16 %v3212_v21, %v3212_v21 }
 0x950   :  { %3614 = vmatpush.bf16.xpose.msra.mxu2 %v3605_v16 }
 0x951   :  { %v3388_v33 = vpack.c.bf16 %v3283_v39, %v3283_v39  ;;  %v3623_v32 = vunpack.c.l.b16 %v3372_v11 }
 0x952   :  { %v3114_v25 = vpop.f32.mrf.mxu2 }
 0x953   :  { %v6479_v45 = vadd.f32 %v3114_v25, %v2107_v29  ;;  %v3628_v60 = vunpack.c.l.b16 %v3388_v33  ;;  %v4654_v33 = vld [vmem:[%s6818_s1 + $0xb0] sm:$0xff] }
 0x954   :  { %v3213_v38 = vpop.f32.mrf.mxu3 }
 0x955   :  { %v3214_v13 = vadd.f32 %v6416_v28, %v3213_v38 }
 0x956   :  { %v3284_v7 = vpop.f32.mrf.mxu1 }
 0x957   :  { %v3285_v6 = vadd.f32 %v6403_v12, %v3284_v7  ;;  %4605 = vmatmul.msk.bf16.vlgmr.msra.gmra.mxu2 %vm379_vm1, %v3595_v30  ;;  %v3373_v15 = vpack.c.bf16 %v3214_v13, %v3214_v13  ;;  %v4655_v30 = vld [vmem:[%s6818_s1 + $0xb8] sm:$0xff]  ;;  %v4970_v7 = vld [vmem:[%s6817_s0] sm:$0xff] }
 0x958   :  { %3315 = vmatpush.bf16.msra.mxu0 %v4655_v30 }
 0x959   :  { %v3389_v49 = vpack.c.bf16 %v3285_v6, %v3285_v6  ;;  %v3624_v43 = vunpack.c.l.b16 %v3373_v15  ;;  %v4971_v15 = vld [vmem:[%s6817_s0 + $0x8] sm:$0xff] }
 0x95a   :  { %v6485_v8 = vpop.f32.mrf.mxu2 }
 0x95b   :  { %v3629_v36 = vunpack.c.l.b16 %v3389_v49  ;;  %v3625_v41 = vpack.c.b16 %v3624_v43, %v3623_v32  ;;  %v4972_v43 = vld [vmem:[%s6817_s0 + $0x10] sm:$0xff] }
 0x95c   :  { %3316 = vmatpush.bf16.msra.mxu0 %v4654_v33 }
 0x95d   :  { %v3630_v37 = vpack.c.b16 %v3629_v36, %v3628_v60 }
 0x95f   :  { %v3635_v52 = vsel %vm379_vm1, %v3630_v37, 0  ;;  %4589 = vmatmul.msk.bf16.vlgmr.msra.gmra.mxu0 %vm101_vm0, %v4970_v7 }
 0x960   :  { %3644 = vmatpush.bf16.xpose.msra.mxu3 %v3635_v52  ;;  %v4973_v52 = vld [vmem:[%s6817_s0 + $0x18] sm:$0xff] }
 0x962   :  { %v3119_v28 = vpop.f32.mrf.mxu2 }
 0x963   :  { %v6490_v12 = vadd.f32 %v3119_v28, %v2112_v20  ;;  %v4974_v20 = vld [vmem:[%s6817_s0 + $0x20] sm:$0xff]  ;;  %v4975_v28 = vld [vmem:[%s6817_s0 + $0x28] sm:$0xff] }
 0x967   :  { %4606 = vmatmul.msk.bf16.vlgmr.msra.gmra.mxu3 %vm379_vm1, %v3625_v41 }
 0x96a   :  { %v6493_v35 = vpop.f32.mrf.mxu2 }
 0x96f   :  { %4590 = vmatmul.msk.bf16.gmra.mxu0 %vm101_vm0, %v4971_v15 }
 0x972   :  { %v3124_v62 = vpop.f32.mrf.mxu2 }
 0x973   :  { %v6497_v46 = vadd.f32 %v3124_v62, %v2117_v40 }
 0x97a   :  { %v6499_v63 = vpop.f32.mrf.mxu2 }
 0x97f   :  { %4591 = vmatmul.msk.bf16.gmra.mxu0 %vm101_vm0, %v4972_v43 }
 0x982   :  { %v3436_v19 = vpop.f32.mrf.mxu2 }
 0x983   :  { %v3437_v61 = vadd.f32 %v6504_v31, %v3436_v19 }
 0x985   :  { %v3651_v14 = vsel %vm610_vm2, %v3437_v61, -inf }
 0x986   :  { %3652 = vmax.xlane.f32.xlu0 %v3651_v14 }
 0x98a   :  { %v3438_v47 = vpop.f32.mrf.mxu2  ;;  %v3466_v1 = vpop.f32.mrf.mxu3 }
 0x98b   :  { %v3439_v55 = vadd.f32 %v6508_v4, %v3438_v47  ;;  %v3467_v51 = vadd.f32 %v6504_v31, %v3466_v1 }
 0x98d   :  { %v3654_v57 = vsel %vm610_vm2, %v3439_v55, -inf  ;;  %v3657_v42 = vsel %vm610_vm2, %v3467_v51, -inf }
 0x98e   :  { %3655 = vmax.xlane.f32.xlu1 %v3654_v57  ;;  %3658 = vmax.xlane.f32.xlu2 %v3657_v42 }
 0x98f   :  { %4592 = vmatmul.msk.bf16.gmra.mxu0 %vm101_vm0, %v4973_v52 }
 0x992   :  { %v3468_v50 = vpop.f32.mrf.mxu3 }
 0x993   :  { %v3469_v9 = vadd.f32 %v6508_v4, %v3468_v50 }
 0x994   :  { %v3496_v24 = vpop.f32.mrf.mxu1 }
 0x995   :  { %v6516_v5 = vadd.f32 %v6504_v31, %v3496_v24  ;;  %v3660_v16 = vsel %vm610_vm2, %v3469_v9, -inf }
 0x996   :  { %3661 = vmax.xlane.f32.xlu0 %v3660_v16 }
 0x997   :  { %v3663_v29 = vsel %vm610_vm2, %v6516_v5, -inf }
 0x998   :  { %3664 = vmax.xlane.f32.xlu1 %v3663_v29 }
 0x99c   :  { %v3498_v25 = vpop.f32.mrf.mxu1 }
 0x99d   :  { %v6522_v39 = vadd.f32 %v6508_v4, %v3498_v25 }
 0x99f   :  { %v3666_v38 = vsel %vm610_vm2, %v6522_v39, -inf  ;;  %4593 = vmatmul.msk.bf16.gmra.mxu0 %vm101_vm0, %v4974_v20 }
 0x9a0   :  { %3667 = vmax.xlane.f32.xlu2 %v3666_v38 }
 0x9aa   :  { %v3526_v21 = vpop.f32.mrf.mxu2 }
 0x9ab   :  { %v6537_v13 = vadd.f32 %v6504_v31, %v3526_v21 }
 0x9ad   :  { %v3669_v6 = vsel %vm610_vm2, %v6537_v13, -inf }
 0x9ae   :  { %3670 = vmax.xlane.f32.xlu0 %v3669_v6 }
 0x9af   :  { %4594 = vmatmul.msk.bf16.gmra.mxu0 %vm101_vm0, %v4975_v28 }
 0x9b2   :  { %v3528_v60 = vpop.f32.mrf.mxu2 }
 0x9b3   :  { %v6542_v49 = vadd.f32 %v6508_v4, %v3528_v60 }
 0x9b5   :  { %v3672_v11 = vsel %vm610_vm2, %v6542_v49, -inf }
 0x9b6   :  { %3673 = vmax.xlane.f32.xlu1 %v3672_v11 }
 0x9ba   :  { %v3556_v36 = vpop.f32.mrf.mxu3 }
 0x9bb   :  { %v6551_v37 = vadd.f32 %v6504_v31, %v3556_v36 }
 0x9bd   :  { %v3675_v32 = vsel %vm610_vm2, %v6551_v37, -inf }
 0x9be   :  { %3676 = vmax.xlane.f32.xlu1 %v3675_v32 }
 0x9c2   :  { %v3558_v50 = vpop.f32.mrf.mxu3 }
 0x9c3   :  { %v6580_v16 = vadd.f32 %v6508_v4, %v3558_v50  ;;  %v6628_v50 = vld [vmem:[%s6819_s2 + $0xb] ss:$0 sm:$0xff] }
 0x9c4   :  { %v3586_v6 = vpop.f32.mrf.mxu1 }
 0x9c5   :  { %v3678_v7 = vsel %vm610_vm2, %v6580_v16, -inf  ;;  %v6605_v28 = vadd.f32 %v6504_v31, %v3586_v6 }
 0x9da   :  { %v3616_v36 = vpop.f32.mrf.mxu2 }
 0x9f9   :  { %v3653_v41 = vpop.xlane.xlu0 %3652 }
 0x9fa   :  { %v3699_v40 = vsub.f32 %v3437_v61, %v3653_v41  ;;  %v4976_v61 = vld [vmem:[%s6817_s0 + $0x30] sm:$0xff] }
 0x9fb   :  { %4595 = vmatmul.msk.bf16.gmra.mxu0 %vm101_vm0, %v4976_v61  ;;  %v3646_v61 = vpop.f32.mrf.mxu3 }
 0x9fc   :  { %v3715_v62 = vmul.f32 1.442695, %v3699_v40  ;;  %v3681_v40 = vsel %vm610_vm2, %v6605_v28, -inf }
 0x9fe   :  { %4889 = vpow2.f32 %v3715_v62 }
 0xa01   :  { %v3656_v23 = vpop.xlane.xlu1 %3655  ;;  %v3659_v19 = vpop.xlane.xlu2 %3658 }
 0xa02   :  { %v3700_v14 = vsub.f32 %v3439_v55, %v3656_v23  ;;  %v3701_v1 = vsub.f32 %v3467_v51, %v3659_v19  ;;  %v3618_v23 = vpop.f32.mrf.mxu2 }
 0xa04   :  { %v6571_v47 = vpop.eup %4889  ;;  %v3717_v57 = vmul.f32 1.442695, %v3700_v14  ;;  %v3719_v24 = vmul.f32 1.442695, %v3701_v1  ;;  %v6619_v1 = vadd.f32 %v6508_v4, %v3618_v23 }
 0xa05   :  { %v3747_v42 = vsel %vm610_vm2, %v6571_v47, 0.0 }
 0xa06   :  { %4891 = vpow2.f32 %v3717_v57  ;;  %3748 = vadd.xlane.f32.xlu2 %v3747_v42  ;;  %v6623_v42 = vadd.f32 %v6504_v31, %v3616_v36 }
 0xa07   :  { %4893 = vpow2.f32 %v3719_v24 }
 0xa09   :  { %v3662_v55 = vpop.xlane.xlu0 %3661 }
 0xa0a   :  { %v3702_v29 = vsub.f32 %v3469_v9, %v3662_v55  ;;  %v3318_v55 = vpop.f32.mrf.mxu0 }
 0xa0b   :  { %v3665_v25 = vpop.xlane.xlu1 %3664  ;;  %4596 = vmatmul.msk.bf16.gmra.mxu0 %vm101_vm0, %v6386_v54 }
 0xa0c   :  { %v6582_v51 = vpop.eup %4891  ;;  %v3721_v30 = vmul.f32 1.442695, %v3702_v29  ;;  %v3703_v38 = vsub.f32 %v6516_v5, %v3665_v25  ;;  %v3690_v29 = vsel %vm610_vm2, %v6619_v1, -inf  ;;  %v3687_v25 = vsel %vm610_vm2, %v6623_v42, -inf }
 0xa0d   :  { %v3750_v33 = vsel %vm610_vm2, %v6582_v51, 0.0  ;;  %v6589_v9 = vpop.eup %4893 }
 0xa0e   :  { %3751 = vadd.xlane.f32.xlu0 %v3750_v33  ;;  %3679 = vmax.xlane.f32.xlu2 %v3678_v7  ;;  %4895 = vpow2.f32 %v3721_v30  ;;  %v3723_v21 = vmul.f32 1.442695, %v3703_v38  ;;  %v3753_v5 = vsel %vm610_vm2, %v6589_v9, 0.0  ;;  %v6636_v38 = vadd.f32 %v6504_v31, %v3646_v61  ;;  %v3648_v31 = vpop.f32.mrf.mxu3 }
 0xa10   :  { %4897 = vpow2.f32 %v3723_v21 }
 0xa13   :  { %v3668_v60 = vpop.xlane.xlu2 %3667 }
 0xa14   :  { %v6591_v11 = vpop.eup %4895  ;;  %v3704_v15 = vsub.f32 %v6522_v39, %v3668_v60  ;;  %v3588_v39 = vpop.f32.mrf.mxu1 }
 0xa15   :  { %v3756_v32 = vsel %vm610_vm2, %v6591_v11, 0.0  ;;  %v6608_v41 = vadd.f32 %v6508_v4, %v3588_v39  ;;  %v3320_v60 = vpop.f32.mrf.mxu0 }
 0xa16   :  { %3754 = vadd.xlane.f32.xlu0 %v3753_v5  ;;  %v6598_v43 = vpop.eup %4897  ;;  %v3725_v52 = vmul.f32 1.442695, %v3704_v15  ;;  %3757 = vadd.xlane.f32.xlu1 %v3756_v32  ;;  %v3693_v15 = vsel %vm610_vm2, %v6636_v38, -inf  ;;  %v3321_v36 = vadd.f32 %v6628_v50, %v3320_v60 }
 0xa17   :  { %v3759_v20 = vsel %vm610_vm2, %v6598_v43, 0.0  ;;  %v3684_v54 = vsel %vm610_vm2, %v6608_v41, -inf }
 0xa18   :  { %4899 = vpow2.f32 %v3725_v52  ;;  %3760 = vadd.xlane.f32.xlu2 %v3759_v20  ;;  %v3391_v52 = vpack.c.bf16 %v3321_v36, %v3321_v36  ;;  %v6647_v20 = vadd.f32 %v6508_v4, %v3648_v31 }
 0xa1a   :  { %v3851_v39 = vunpack.c.l.b16 %v3391_v52 }
 0xa1e   :  { %v6612_v62 = vpop.eup %4899  ;;  %3682 = vmax.xlane.f32.xlu1 %v3681_v40 }
 0xa1f   :  { %v3762_v19 = vsel %vm610_vm2, %v6612_v62, 0.0 }
 0xa20   :  { %3763 = vadd.xlane.f32.xlu0 %v3762_v19  ;;  %3685 = vmax.xlane.f32.xlu2 %v3684_v54 }
 0xa21   :  { %v3671_v14 = vpop.xlane.xlu0 %3670 }
 0xa22   :  { %v3705_v57 = vsub.f32 %v6537_v13, %v3671_v14  ;;  %v3319_v13 = vadd.f32 %v6628_v50, %v3318_v55 }
 0xa24   :  { %v3727_v24 = vmul.f32 1.442695, %v3705_v57  ;;  %v3390_v7 = vpack.c.bf16 %v3319_v13, %v3319_v13  ;;  %v3696_v57 = vsel %vm610_vm2, %v6647_v20, -inf }
 0xa26   :  { %4901 = vpow2.f32 %v3727_v24  ;;  %3691 = vmax.xlane.f32.xlu1 %v3690_v29  ;;  %v3850_v32 = vunpack.c.l.b16 %v3390_v7 }
 0xa28   :  { %3688 = vmax.xlane.f32.xlu0 %v3687_v25  ;;  %v3852_v23 = vpack.c.b16 %v3851_v39, %v3850_v32 }
 0xa29   :  { %v3674_v30 = vpop.xlane.xlu1 %3673 }
 0xa2a   :  { %v3706_v33 = vsub.f32 %v6542_v49, %v3674_v30  ;;  %3864 = vmatpush.bf16.msrb.mxu0 %v3852_v23 }
 0xa2c   :  { %v6639_v21 = vpop.eup %4901  ;;  %v3729_v6 = vmul.f32 1.442695, %v3706_v33 }
 0xa2d   :  { %v3765_v5 = vsel %vm610_vm2, %v6639_v21, 0.0 }
 0xa2e   :  { %4903 = vpow2.f32 %v3729_v6  ;;  %3694 = vmax.xlane.f32.xlu1 %v3693_v15  ;;  %3766 = vadd.xlane.f32.xlu2 %v3765_v5 }
 0xa31   :  { %v3677_v49 = vpop.xlane.xlu1 %3676 }
 0xa32   :  { %v3707_v40 = vsub.f32 %v6551_v37, %v3677_v49  ;;  %v3323_v37 = vpop.f32.mrf.mxu0 }
 0xa33   :  { %v3324_v55 = vadd.f32 %v6628_v50, %v3323_v37 }
 0xa34   :  { %v6650_v19 = vpop.eup %4903  ;;  %v3731_v54 = vmul.f32 1.442695, %v3707_v40 }
 0xa35   :  { %v3768_v14 = vsel %vm610_vm2, %v6650_v19, 0.0  ;;  %v3392_v29 = vpack.c.bf16 %v3324_v55, %v3324_v55 }
 0xa36   :  { %4905 = vpow2.f32 %v3731_v54  ;;  %3769 = vadd.xlane.f32.xlu0 %v3768_v14  ;;  %3697 = vmax.xlane.f32.xlu2 %v3696_v57 }
 0xa37   :  { %v3878_v30 = vunpack.c.l.b16 %v3392_v29 }
 0xa3a   :  { %v3325_v61 = vpop.f32.mrf.mxu0 }
 0xa3b   :  { %v3326_v25 = vadd.f32 %v6628_v50, %v3325_v61 }
 0xa3c   :  { %v6656_v24 = vpop.eup %4905 }
 0xa3d   :  { %v3771_v4 = vsel %vm610_vm2, %v6656_v24, 0.0  ;;  %v3393_v33 = vpack.c.bf16 %v3326_v25, %v3326_v25 }
 0xa3e   :  { %3772 = vadd.xlane.f32.xlu0 %v3771_v4 }
 0xa3f   :  { %v3879_v7 = vunpack.c.l.b16 %v3393_v33 }
 0xa41   :  { %v3880_v6 = vpack.c.b16 %v3879_v7, %v3878_v30 }
 0xa42   :  { %v3328_v13 = vpop.f32.mrf.mxu0 }
 0xa43   :  { %3892 = vmatpush.bf16.msrb.mxu1 %v3880_v6  ;;  %v3329_v60 = vadd.f32 %v6628_v50, %v3328_v13 }
 0xa45   :  { %v3394_v31 = vpack.c.bf16 %v3329_v60, %v3329_v60 }
 0xa47   :  { %v3906_v52 = vunpack.c.l.b16 %v3394_v31 }
 0xa4a   :  { %v3330_v15 = vpop.f32.mrf.mxu0 }
 0xa4b   :  { %v3331_v36 = vadd.f32 %v6628_v50, %v3330_v15 }
 0xa4d   :  { %v3395_v32 = vpack.c.bf16 %v3331_v36, %v3331_v36 }
 0xa4f   :  { %v3907_v49 = vunpack.c.l.b16 %v3395_v32 }
 0xa51   :  { %v3908_v39 = vpack.c.b16 %v3907_v49, %v3906_v52 }
 0xa52   :  { %v3333_v37 = vpop.f32.mrf.mxu0 }
 0xa53   :  { %3920 = vmatpush.bf16.msrb.mxu2 %v3908_v39 }
 0xa5a   :  { %v3335_v15 = vpop.f32.mrf.mxu0 }
 0xa79   :  { %v3749_v5 = vpop.xlane.xlu2 %3748 }
 0xa7a   :  { %4907 = vrcp.f32 %v3749_v5 }
 0xa80   :  { %v4908_v54 = vpop.eup %4907 }
 0xa81   :  { %v3680_v40 = vpop.xlane.xlu2 %3679  ;;  %v3752_v23 = vpop.xlane.xlu0 %3751  ;;  %v3811_v4 = vmul.f32 %v4908_v54, %v6571_v47  ;;  %v3334_v47 = vadd.f32 %v6628_v50, %v3333_v37 }
 0xa82   :  { %v3708_v14 = vsub.f32 %v6580_v16, %v3680_v40  ;;  %4909 = vrcp.f32 %v3752_v23 }
 0xa83   :  { %v3827_v55 = vpack.c.bf16 %v3811_v4, %v3811_v4  ;;  %v3396_v31 = vpack.c.bf16 %v3334_v47, %v3334_v47 }
 0xa84   :  { %v3733_v57 = vmul.f32 1.442695, %v3708_v14 }
 0xa85   :  { %v3845_v6 = vunpack.c.l.b16 %v3827_v55  ;;  %v3934_v23 = vunpack.c.l.b16 %v3396_v31 }
 0xa86   :  { %4911 = vpow2.f32 %v3733_v57 }
 0xa88   :  { %v4910_v61 = vpop.eup %4909 }
 0xa89   :  { %v3812_v29 = vmul.f32 %v4910_v61, %v6582_v51  ;;  %v3755_v25 = vpop.xlane.xlu0 %3754  ;;  %v3758_v13 = vpop.xlane.xlu1 %3757  ;;  %v3336_v51 = vadd.f32 %v6628_v50, %v3335_v15 }
 0xa8a   :  { %4913 = vrcp.f32 %v3755_v25 }
 0xa8b   :  { %v3828_v30 = vpack.c.bf16 %v3812_v29, %v3812_v29  ;;  %4915 = vrcp.f32 %v3758_v13  ;;  %v3761_v7 = vpop.xlane.xlu2 %3760  ;;  %v3397_v49 = vpack.c.bf16 %v3336_v51, %v3336_v51 }
 0xa8c   :  { %v6667_v33 = vpop.eup %4911  ;;  %4917 = vrcp.f32 %v3761_v7 }
 0xa8d   :  { %v3846_v16 = vunpack.c.l.b16 %v3828_v30  ;;  %v3774_v60 = vsel %vm610_vm2, %v6667_v33, 0.0  ;;  %v3935_v57 = vunpack.c.l.b16 %v3397_v49 }
 0xa8e   :  { %3775 = vadd.xlane.f32.xlu1 %v3774_v60 }
 0xa8f   :  { %v3847_v5 = vpack.c.b16 %v3846_v16, %v3845_v6  ;;  %v3936_v30 = vpack.c.b16 %v3935_v57, %v3934_v23 }
 0xa90   :  { %v4914_v36 = vpop.eup %4913 }
 0xa91   :  { %v4916_v32 = vpop.eup %4915  ;;  %v3813_v52 = vmul.f32 %v4914_v36, %v6589_v9  ;;  %4607 = vmatmul.msk.bf16.vlgmr.msrb.gmra.mxu0 %vm610_vm2, %v3847_v5  ;;  %v3683_v40 = vpop.xlane.xlu1 %3682  ;;  %3948 = vmatpush.bf16.msrb.mxu3 %v3936_v30 }
 0xa92   :  { %v3814_v39 = vmul.f32 %v4916_v32, %v6591_v11  ;;  %v3709_v14 = vsub.f32 %v6605_v28, %v3683_v40  ;;  %v4918_v55 = vpop.eup %4917  ;;  %v3338_v32 = vpop.f32.mrf.mxu0 }
 0xa93   :  { %v3829_v54 = vpack.c.bf16 %v3813_v52, %v3813_v52  ;;  %v3686_v37 = vpop.xlane.xlu2 %3685  ;;  %v3764_v61 = vpop.xlane.xlu0 %3763  ;;  %v3815_v6 = vmul.f32 %v4918_v55, %v6598_v43  ;;  %v3339_v40 = vadd.f32 %v6628_v50, %v3338_v32 }
 0xa94   :  { %v3830_v4 = vpack.c.bf16 %v3814_v39, %v3814_v39  ;;  %v3735_v25 = vmul.f32 1.442695, %v3709_v14  ;;  %v3710_v13 = vsub.f32 %v6608_v41, %v3686_v37  ;;  %4919 = vrcp.f32 %v3764_v61 }
 0xa95   :  { %v3873_v29 = vunpack.c.l.b16 %v3829_v54  ;;  %v3831_v47 = vpack.c.bf16 %v3815_v6, %v3815_v6  ;;  %v3398_v37 = vpack.c.bf16 %v3339_v40, %v3339_v40 }
 0xa96   :  { %v3874_v9 = vunpack.c.l.b16 %v3830_v4  ;;  %4921 = vpow2.f32 %v3735_v25  ;;  %v3737_v7 = vmul.f32 1.442695, %v3710_v13 }
 0xa97   :  { %v3962_v13 = vunpack.c.l.b16 %v3398_v37 }
 0xa98   :  { %v3875_v11 = vpack.c.b16 %v3874_v9, %v3873_v29  ;;  %4923 = vpow2.f32 %v3737_v7 }
 0xa99   :  { %v3692_v28 = vpop.xlane.xlu1 %3691 }
 0xa9a   :  { %4608 = vmatmul.msk.bf16.vlgmr.msrb.gmra.mxu1 %vm610_vm2, %v3875_v11  ;;  %v4920_v16 = vpop.eup %4919  ;;  %v3712_v60 = vsub.f32 %v6619_v1, %v3692_v28  ;;  %v3901_v1 = vunpack.c.l.b16 %v3831_v47  ;;  %v3340_v55 = vpop.f32.mrf.mxu0 }
 0xa9b   :  { %v3816_v15 = vmul.f32 %v4920_v16, %v6612_v62  ;;  %v3689_v41 = vpop.xlane.xlu0 %3688  ;;  %v3341_v25 = vadd.f32 %v6628_v50, %v3340_v55 }
 0xa9c   :  { %v6682_v5 = vpop.eup %4921  ;;  %v3741_v51 = vmul.f32 1.442695, %v3712_v60  ;;  %v3711_v36 = vsub.f32 %v6623_v42, %v3689_v41 }
 0xa9d   :  { %v3832_v31 = vpack.c.bf16 %v3816_v15, %v3816_v15  ;;  %v3777_v43 = vsel %vm610_vm2, %v6682_v5, 0.0  ;;  %v3399_v9 = vpack.c.bf16 %v3341_v25, %v3341_v25 }
 0xa9e   :  { %v6687_v52 = vpop.eup %4923  ;;  %4925 = vpow2.f32 %v3741_v51  ;;  %v3739_v49 = vmul.f32 1.442695, %v3711_v36  ;;  %3778 = vadd.xlane.f32.xlu2 %v3777_v43 }
 0xa9f   :  { %v3902_v39 = vunpack.c.l.b16 %v3832_v31  ;;  %v3780_v62 = vsel %vm610_vm2, %v6687_v52, 0.0  ;;  %v3963_v28 = vunpack.c.l.b16 %v3399_v9 }
 0xaa0   :  { %4927 = vpow2.f32 %v3739_v49  ;;  %3781 = vadd.xlane.f32.xlu0 %v3780_v62 }
 0xaa1   :  { %v3903_v42 = vpack.c.b16 %v3902_v39, %v3901_v1  ;;  %v3695_v23 = vpop.xlane.xlu1 %3694  ;;  %v3767_v54 = vpop.xlane.xlu2 %3766  ;;  %v3964_v47 = vpack.c.b16 %v3963_v28, %v3962_v13 }
 0xaa2   :  { %v3713_v14 = vsub.f32 %v6636_v38, %v3695_v23  ;;  %4929 = vrcp.f32 %v3767_v54  ;;  %v3343_v51 = vpop.f32.mrf.mxu0 }
 0xaa3   :  { %4609 = vmatmul.msk.bf16.vlgmr.msrb.gmra.mxu2 %vm610_vm2, %v3903_v42  ;;  %3976 = vmatpush.bf16.msra.mxu0 %v3964_v47  ;;  %v3344_v31 = vadd.f32 %v6628_v50, %v3343_v51 }
 0xaa4   :  { %v6694_v57 = vpop.eup %4925  ;;  %v3743_v4 = vmul.f32 1.442695, %v3713_v14 }
 0xaa5   :  { %v3786_v61 = vsel %vm610_vm2, %v6694_v57, 0.0  ;;  %v3400_v1 = vpack.c.bf16 %v3344_v31, %v3344_v31 }
 0xaa6   :  { %v6698_v29 = vpop.eup %4927  ;;  %4931 = vpow2.f32 %v3743_v4  ;;  %3787 = vadd.xlane.f32.xlu2 %v3786_v61 }
 0xaa7   :  { %v3783_v38 = vsel %vm610_vm2, %v6698_v29, 0.0  ;;  %v3990_v54 = vunpack.c.l.b16 %v3400_v1 }
 0xaa8   :  { %3784 = vadd.xlane.f32.xlu1 %v3783_v38  ;;  %v4930_v11 = vpop.eup %4929 }
 0xaa9   :  { %v3698_v30 = vpop.xlane.xlu2 %3697  ;;  %v3770_v7 = vpop.xlane.xlu0 %3769  ;;  %v3817_v15 = vmul.f32 %v4930_v11, %v6639_v21 }
 0xaaa   :  { %v3714_v6 = vsub.f32 %v6647_v20, %v3698_v30  ;;  %4933 = vrcp.f32 %v3770_v7  ;;  %v3345_v40 = vpop.f32.mrf.mxu0 }
 0xaab   :  { %v3833_v43 = vpack.c.bf16 %v3817_v15, %v3817_v15  ;;  %v3346_v42 = vadd.f32 %v6628_v50, %v3345_v40 }
 0xaac   :  { %v6704_v16 = vpop.eup %4931  ;;  %v3745_v60 = vmul.f32 1.442695, %v3714_v6 }
 0xaad   :  { %v3789_v41 = vsel %vm610_vm2, %v6704_v16, 0.0  ;;  %v3929_v39 = vunpack.c.l.b16 %v3833_v43  ;;  %v3401_v14 = vpack.c.bf16 %v3346_v42, %v3346_v42  ;;  %v4615_v43 = vld [vmem:[%s6821_s4 + $0xc] sm:$0xf] }
 0xaae   :  { %4935 = vpow2.f32 %v3745_v60  ;;  %3790 = vadd.xlane.f32.xlu0 %v3789_v41 }
 0xaaf   :  { %v3991_v4 = vunpack.c.l.b16 %v3401_v14 }
 0xab0   :  { %v4934_v36 = vpop.eup %4933 }
 0xab1   :  { %v3818_v20 = vmul.f32 %v4934_v36, %v6650_v19  ;;  %v3992_v19 = vpack.c.b16 %v3991_v4, %v3990_v54  ;;  %v3773_v31 = vpop.xlane.xlu0 %3772 }
 0xab2   :  { %v3348_v37 = vpop.f32.mrf.mxu0  ;;  %4937 = vrcp.f32 %v3773_v31 }
 0xab3   :  { %v3834_v32 = vpack.c.bf16 %v3818_v20, %v3818_v20  ;;  %4004 = vmatpush.bf16.msra.mxu1 %v3992_v19  ;;  %v3349_v61 = vadd.f32 %v6628_v50, %v3348_v37  ;;  %v4102_v20 = vsel %vm1992_vm3, %v4615_v43, 0 }
 0xab4   :  { %v6711_v49 = vpop.eup %4935  ;;  %4111 = vmatpush.bf16.msrb.mxu0 %v4102_v20 }
 0xab5   :  { %v3930_v62 = vunpack.c.l.b16 %v3834_v32  ;;  %v3792_v21 = vsel %vm610_vm2, %v6711_v49, 0.0  ;;  %v3402_v55 = vpack.c.bf16 %v3349_v61, %v3349_v61 }
 0xab6   :  { %3793 = vadd.xlane.f32.xlu1 %v3792_v21 }
 0xab7   :  { %v3931_v23 = vpack.c.b16 %v3930_v62, %v3929_v39  ;;  %v4018_v13 = vunpack.c.l.b16 %v3402_v55 }
 0xab8   :  { %v4938_v1 = vpop.eup %4937 }
 0xab9   :  { %4610 = vmatmul.msk.bf16.vlgmr.msrb.gmra.mxu3 %vm610_vm2, %v3931_v23  ;;  %v3819_v39 = vmul.f32 %v4938_v1, %v6656_v24 }
 0xaba   :  { %v3350_v25 = vpop.f32.mrf.mxu0 }
 0xabb   :  { %v3351_v38 = vadd.f32 %v6628_v50, %v3350_v25  ;;  %v3835_v62 = vpack.c.bf16 %v3819_v39, %v3819_v39 }
 0xabd   :  { %v3403_v9 = vpack.c.bf16 %v3351_v38, %v3351_v38  ;;  %v3957_v42 = vunpack.c.l.b16 %v3835_v62 }
 0xabf   :  { %v4019_v30 = vunpack.c.l.b16 %v3403_v9 }
 0xac1   :  { %v4020_v7 = vpack.c.b16 %v4019_v30, %v4018_v13 }
 0xac2   :  { %v3353_v11 = vpop.f32.mrf.mxu0 }
 0xac3   :  { %4032 = vmatpush.bf16.msra.mxu2 %v4020_v7  ;;  %v3354_v6 = vadd.f32 %v6628_v50, %v3353_v11 }
 0xac5   :  { %v3404_v28 = vpack.c.bf16 %v3354_v6, %v3354_v6 }
 0xac7   :  { %v4046_v15 = vunpack.c.l.b16 %v3404_v28 }
 0xaca   :  { %v3355_v60 = vpop.f32.mrf.mxu0 }
 0xacb   :  { %v3356_v47 = vadd.f32 %v6628_v50, %v3355_v60 }
 0xacd   :  { %v3405_v41 = vpack.c.bf16 %v3356_v47, %v3356_v47 }
 0xacf   :  { %v4047_v51 = vunpack.c.l.b16 %v3405_v41 }
 0xad1   :  { %v4048_v36 = vpack.c.b16 %v4047_v51, %v4046_v15 }
 0xad3   :  { %4060 = vmatpush.bf16.msra.mxu3 %v4048_v36 }
 0xb01   :  { %v3776_v32 = vpop.xlane.xlu1 %3775 }
 0xb02   :  { %4939 = vrcp.f32 %v3776_v32 }
 0xb08   :  { %v4940_v50 = vpop.eup %4939 }
 0xb09   :  { %v3820_v21 = vmul.f32 %v4940_v50, %v6667_v33 }
 0xb0b   :  { %v3836_v40 = vpack.c.bf16 %v3820_v21, %v3820_v21 }
 0xb0d   :  { %v3958_v23 = vunpack.c.l.b16 %v3836_v40 }
 0xb0e   :  { %v3866_v14 = vpop.f32.mrf.mxu0 }
 0xb0f   :  { %v3959_v54 = vpack.c.b16 %v3958_v23, %v3957_v42 }
 0xb11   :  { %4611 = vmatmul.msk.bf16.vlgmr.msra.gmra.mxu0 %vm610_vm2, %v3959_v54  ;;  %v3779_v4 = vpop.xlane.xlu2 %3778 }
 0xb12   :  { %4941 = vrcp.f32 %v3779_v4 }
 0xb13   :  { %v3782_v19 = vpop.xlane.xlu0 %3781 }
 0xb14   :  { %4943 = vrcp.f32 %v3782_v19 }
 0xb16   :  { %v3868_v38 = vpop.f32.mrf.mxu0 }
 0xb17   :  { %v4067_v30 = vpack.c.bf16 %v3868_v38, %v3866_v14  ;;  %v3894_v60 = vpop.f32.mrf.mxu1 }
 0xb18   :  { %v4942_v37 = vpop.eup %4941 }
 0xb19   :  { %v3821_v61 = vmul.f32 %v4942_v37, %v6682_v5  ;;  %v3788_v55 = vpop.xlane.xlu2 %3787 }
 0xb1a   :  { %v4944_v24 = vpop.eup %4943  ;;  %4945 = vrcp.f32 %v3788_v55 }
 0xb1b   :  { %v3837_v25 = vpack.c.bf16 %v3821_v61, %v3821_v61  ;;  %v3822_v33 = vmul.f32 %v4944_v24, %v6687_v52  ;;  %v3785_v13 = vpop.xlane.xlu1 %3784 }
 0xb1c   :  { %4947 = vrcp.f32 %v3785_v13 }
 0xb1d   :  { %v3838_v9 = vpack.c.bf16 %v3822_v33, %v3822_v33  ;;  %v3985_v7 = vunpack.c.l.b16 %v3837_v25 }
 0xb1f   :  { %v3986_v11 = vunpack.c.l.b16 %v3838_v9  ;;  %v3896_v1 = vpop.f32.mrf.mxu1  ;;  %v2084_v9 = vadd.f32 %v5981_v58, %v6090_v10 }
 0xb20   :  { %v4946_v6 = vpop.eup %4945  ;;  %v4068_v39 = vpack.c.bf16 %v3896_v1, %v3894_v60 }
 0xb21   :  { %4616 = vmatmul.msk.bf16.vlgmr.msrb.gmra.mxu0 %vm379_vm1, %v4067_v30  ;;  %v3987_v28 = vpack.c.b16 %v3986_v11, %v3985_v7  ;;  %v3824_v5 = vmul.f32 %v4946_v6, %v6694_v57  ;;  %v3791_v47 = vpop.xlane.xlu0 %3790  ;;  %v3130_v7 = vadd.f32 %v6397_v44, %v2084_v9  ;;  %v2089_v44 = vadd.f32 %v5990_v53, %v6100_v22 }
 0xb22   :  { %v4948_v15 = vpop.eup %4947  ;;  %4949 = vrcp.f32 %v3791_v47 }
 0xb23   :  { %v3840_v41 = vpack.c.bf16 %v3824_v5, %v3824_v5  ;;  %v3823_v51 = vmul.f32 %v4948_v15, %v6698_v29  ;;  %4612 = vmatmul.msk.bf16.vlgmr.msra.gmra.mxu1 %vm610_vm2, %v3987_v28 }
 0xb25   :  { %v3839_v52 = vpack.c.bf16 %v3823_v51, %v3823_v51  ;;  %v4014_v36 = vunpack.c.l.b16 %v3840_v41  ;;  %v3132_v51 = vadd.f32 %v6411_v34, %v2089_v44  ;;  %v2094_v34 = vadd.f32 %v5995_v56, %v6118_v0  ;;  %v6834_v0 = vld [vmem:[#allocation10_spill] sm:$0xff] }
 0xb26   :  { %v3922_v62 = vpop.f32.mrf.mxu2 }
 0xb27   :  { %v4013_v31 = vunpack.c.l.b16 %v3839_v52 }
 0xb28   :  { %v4950_v32 = vpop.eup %4949 }
 0xb29   :  { %v4015_v43 = vpack.c.b16 %v4014_v36, %v4013_v31  ;;  %v3794_v20 = vpop.xlane.xlu1 %3793  ;;  %v3825_v57 = vmul.f32 %v4950_v32, %v6704_v16 }
 0xb2a   :  { %4951 = vrcp.f32 %v3794_v20 }
 0xb2b   :  { %4613 = vmatmul.msk.bf16.vlgmr.msra.gmra.mxu2 %vm610_vm2, %v4015_v43  ;;  %v3841_v29 = vpack.c.bf16 %v3825_v57, %v3825_v57 }
 0xb2d   :  { %v4041_v42 = vunpack.c.l.b16 %v3841_v29 }
 0xb2e   :  { %v3924_v14 = vpop.f32.mrf.mxu2 }
 0xb2f   :  { %v4069_v4 = vpack.c.bf16 %v3924_v14, %v3922_v62 }
 0xb30   :  { %v4952_v50 = vpop.eup %4951 }
 0xb31   :  { %4617 = vmatmul.msk.bf16.gmra.mxu0 %vm379_vm1, %v4068_v39  ;;  %v3826_v21 = vmul.f32 %v4952_v50, %v6711_v49  ;;  %v6745_v49 = vld [vmem:[%s6822_s5] ss:$0 sm:$0xff]  ;;  %v3134_v39 = vadd.f32 %v6430_v2, %v2094_v34  ;;  %v6842_v34 = vld [vmem:[#allocation14_spill] sm:$0xff]  ;;  %s5003_s5 = smov [#allocation2]  }
 0xb32   :  { %v6835_v2 = vld [vmem:[#allocation5_spill] sm:$0xff]  ;;  %s4226_s26 = sshll.u32 %s5003_s5, 4  ;;  %s4227_s26 = int_to_ptr.vmem [resolvable:$true] %s4226_s26 }
 0xb33   :  { %v3842_v40 = vpack.c.bf16 %v3826_v21, %v3826_v21 }
 0xb35   :  { %v4042_v23 = vunpack.c.l.b16 %v3842_v40 }
 0xb37   :  { %v4043_v54 = vpack.c.b16 %v4042_v23, %v4041_v42 }
 0xb39   :  { %4614 = vmatmul.msk.bf16.vlgmr.msra.gmra.mxu3 %vm610_vm2, %v4043_v54  ;;  %v2099_v54 = vadd.f32 %v6835_v2, %v6834_v0 }
 0xb3c   :  { %v3950_v19 = vpop.f32.mrf.mxu3 }
 0xb41   :  { %4618 = vmatmul.msk.bf16.gmra.mxu0 %vm379_vm1, %v4069_v4  ;;  %v3136_v4 = vadd.f32 %v6457_v48, %v2099_v54 }
 0xb44   :  { %v3952_v16 = vpop.f32.mrf.mxu3 }
 0xb45   :  { %v4070_v37 = vpack.c.bf16 %v3952_v16, %v3950_v19 }
 0xb51   :  { %4619 = vmatmul.msk.bf16.gmra.mxu0 %vm379_vm1, %v4070_v37 }
 0xb8e   :  { %v3978_v61 = vpop.f32.mrf.mxu0 }
 0xb96   :  { %v3980_v55 = vpop.f32.mrf.mxu0 }
 0xb97   :  { %v4071_v24 = vpack.c.bf16 %v3980_v55, %v3978_v61 }
 0xb99   :  { %4620 = vmatmul.msk.bf16.gmra.mxu0 %vm379_vm1, %v4071_v24 }
 0xb9e   :  { %v4113_v25 = vpop.f32.mrf.mxu0 }
 0xb9f   :  { %v4153_v33 = vadd.f32 %v4113_v25, %v6395_v3  ;;  %v6836_v25 = vld [vmem:[#allocation11_spill] sm:$0xff] }
 0xba0   :  { %v4006_v13 = vpop.f32.mrf.mxu1 }
 0xba1   :  { %v4173_v38 = vadd.f32 %v6745_v49, %v4153_v33  ;;  %v6837_v33 = vld [vmem:[#allocation6_spill] sm:$0xff] }
 0xba3   :  { %v4189_v30 = vpack.c.bf16 %v4173_v38, %v4173_v38  ;;  %v2104_v38 = vadd.f32 %v6837_v33, %v6836_v25 }
 0xba5   :  { %4206 = vst.msk [vmem:[#allocation2] sm:$0xf] %vm4205_vm4, %v4189_v30  ;;  %v3138_v48 = vadd.f32 %v6473_v18, %v2104_v38 }
 0xba6   :  { %v4115_v11 = vpop.f32.mrf.mxu0 }
 0xba7   :  { %v4154_v6 = vadd.f32 %v4115_v11, %v3130_v7 }
 0xba8   :  { %v4008_v60 = vpop.f32.mrf.mxu1 }
 0xba9   :  { %v4174_v28 = vadd.f32 %v6745_v49, %v4154_v6  ;;  %v4072_v5 = vpack.c.bf16 %v4008_v60, %v4006_v13  ;;  %v6838_v60 = vld [vmem:[#allocation12_spill] sm:$0xff] }
 0xbab   :  { %v4190_v47 = vpack.c.bf16 %v4174_v28, %v4174_v28  ;;  %4621 = vmatmul.msk.bf16.gmra.mxu0 %vm379_vm1, %v4072_v5  ;;  %v6839_v5 = vld [vmem:[#allocation7_spill] sm:$0xff] }
 0xbad   :  { %4207 = vst.msk [vmem:[#allocation2 + $0x4] sm:$0xf] %vm4205_vm4, %v4190_v47  ;;  %v2109_v47 = vadd.f32 %v6839_v5, %v6838_v60 }
 0xbae   :  { %v4118_v3 = vpop.f32.mrf.mxu0  ;;  %v4034_v15 = vpop.f32.mrf.mxu2 }
 0xbaf   :  { %v4155_v58 = vadd.f32 %v4118_v3, %v6408_v17  ;;  %v3140_v18 = vadd.f32 %v6485_v8, %v2109_v47 }
 0xbb1   :  { %v4175_v10 = vadd.f32 %v6745_v49, %v4155_v58 }
 0xbb3   :  { %v4191_v41 = vpack.c.bf16 %v4175_v10, %v4175_v10 }
 0xbb5   :  { %4208 = vst.msk [vmem:[#allocation2 + $0x8] sm:$0xf] %vm4205_vm4, %v4191_v41 }
 0xbb6   :  { %v4120_v52 = vpop.f32.mrf.mxu0  ;;  %v4036_v36 = vpop.f32.mrf.mxu2 }
 0xbb7   :  { %v4156_v31 = vadd.f32 %v4120_v52, %v3132_v51  ;;  %v4073_v20 = vpack.c.bf16 %v4036_v36, %v4034_v15  ;;  %v6840_v52 = vld [vmem:[#allocation13_spill] sm:$0xff]  ;;  %v6841_v36 = vld [vmem:[#allocation8_spill] sm:$0xff] }
 0xbb9   :  { %v4176_v43 = vadd.f32 %v6745_v49, %v4156_v31  ;;  %v2114_v31 = vadd.f32 %v6841_v36, %v6840_v52 }
 0xbbb   :  { %v4192_v32 = vpack.c.bf16 %v4176_v43, %v4176_v43  ;;  %4622 = vmatmul.msk.bf16.gmra.mxu0 %vm379_vm1, %v4073_v20  ;;  %v3142_v8 = vadd.f32 %v6493_v35, %v2114_v31 }
 0xbbc   :  { %v4062_v17 = vpop.f32.mrf.mxu3 }
 0xbbd   :  { %4209 = vst.msk [vmem:[#allocation2 + $0xc] sm:$0xf] %vm4205_vm4, %v4192_v32 }
 0xbbe   :  { %v4123_v1 = vpop.f32.mrf.mxu0 }
 0xbbf   :  { %v4157_v53 = vadd.f32 %v4123_v1, %v6425_v59 }
 0xbc1   :  { %v4177_v22 = vadd.f32 %v6745_v49, %v4157_v53 }
 0xbc3   :  { %v4193_v57 = vpack.c.bf16 %v4177_v22, %v4177_v22 }
 0xbc4   :  { %v4064_v29 = vpop.f32.mrf.mxu3 }
 0xbc5   :  { %4210 = vst.msk [vmem:[#allocation2 + $0x10] sm:$0xf] %vm4205_vm4, %v4193_v57  ;;  %v4074_v40 = vpack.c.bf16 %v4064_v29, %v4062_v17  ;;  %v6843_v57 = vld [vmem:[#allocation9_spill] sm:$0xff] }
 0xbc6   :  { %v4125_v50 = vpop.f32.mrf.mxu0 }
 0xbc7   :  { %v4158_v62 = vadd.f32 %v4125_v50, %v3134_v39  ;;  %v2119_v39 = vadd.f32 %v6843_v57, %v6842_v34 }
 0xbc9   :  { %v4178_v21 = vadd.f32 %v6745_v49, %v4158_v62  ;;  %v3144_v35 = vadd.f32 %v6499_v63, %v2119_v39 }
 0xbcb   :  { %v4194_v42 = vpack.c.bf16 %v4178_v21, %v4178_v21  ;;  %4623 = vmatmul.msk.bf16.gmra.mxu0 %vm379_vm1, %v4074_v40 }
 0xbcd   :  { %4211 = vst.msk [vmem:[#allocation2 + $0x14] sm:$0xf] %vm4205_vm4, %v4194_v42 }
 0xbce   :  { %v4128_v59 = vpop.f32.mrf.mxu0 }
 0xbcf   :  { %v4159_v23 = vadd.f32 %v4128_v59, %v6437_v26 }
 0xbd1   :  { %v4179_v56 = vadd.f32 %v6745_v49, %v4159_v23 }
 0xbd3   :  { %v4195_v14 = vpack.c.bf16 %v4179_v56, %v4179_v56 }
 0xbd5   :  { %4212 = vst.msk [vmem:[#allocation2 + $0x18] sm:$0xf] %vm4205_vm4, %v4195_v14 }
 0xbd6   :  { %v4130_v19 = vpop.f32.mrf.mxu0 }
 0xbd7   :  { %v4160_v16 = vadd.f32 %v4130_v19, %v3136_v4 }
 0xbd9   :  { %v4180_v37 = vadd.f32 %v6745_v49, %v4160_v16 }
 0xbdb   :  { %v4196_v61 = vpack.c.bf16 %v4180_v37, %v4180_v37 }
 0xbdd   :  { %4213 = vst.msk [vmem:[#allocation2 + $0x1c] sm:$0xf] %vm4205_vm4, %v4196_v61 }
 0xc16   :  { %v4133_v55 = vpop.f32.mrf.mxu0 }
 0xc17   :  { %v4161_v26 = vadd.f32 %v4133_v55, %v6465_v27 }
 0xc19   :  { %v4181_v24 = vadd.f32 %v6745_v49, %v4161_v26 }
 0xc1b   :  { %v4197_v13 = vpack.c.bf16 %v4181_v24, %v4181_v24 }
 0xc1d   :  { %4214 = vst.msk [vmem:[#allocation2 + $0x20] sm:$0xf] %vm4205_vm4, %v4197_v13 }
 0xc1e   :  { %v4135_v9 = vpop.f32.mrf.mxu0 }
 0xc1f   :  { %v4162_v30 = vadd.f32 %v4135_v9, %v3138_v48 }
 0xc21   :  { %v4182_v7 = vadd.f32 %v6745_v49, %v4162_v30 }
 0xc23   :  { %v4198_v11 = vpack.c.bf16 %v4182_v7, %v4182_v7 }
 0xc25   :  { %4215 = vst.msk [vmem:[#allocation2 + $0x24] sm:$0xf] %vm4205_vm4, %v4198_v11 }
 0xc28   :  { %v4138_v6 = vpop.f32.mrf.mxu0 }
 0xc29   :  { %v4163_v27 = vadd.f32 %v4138_v6, %v6479_v45 }
 0xc2b   :  { %v4183_v28 = vadd.f32 %v6745_v49, %v4163_v27 }
 0xc2d   :  { %v4199_v3 = vpack.c.bf16 %v4183_v28, %v4183_v28 }
 0xc2f   :  { %4216 = vst.msk [vmem:[#allocation2 + $0x28] sm:$0xf] %vm4205_vm4, %v4199_v3 }
 0xc30   :  { %v4140_v15 = vpop.f32.mrf.mxu0 }
 0xc31   :  { %v4164_v58 = vadd.f32 %v4140_v15, %v3140_v18 }
 0xc33   :  { %v4184_v10 = vadd.f32 %v6745_v49, %v4164_v58 }
 0xc35   :  { %v4200_v44 = vpack.c.bf16 %v4184_v10, %v4184_v10 }
 0xc37   :  { %4217 = vst.msk [vmem:[#allocation2 + $0x2c] sm:$0xf] %vm4205_vm4, %v4200_v44 }
 0xc38   :  { %v4143_v41 = vpop.f32.mrf.mxu0 }
 0xc39   :  { %v4165_v45 = vadd.f32 %v4143_v41, %v6490_v12 }
 0xc3b   :  { %v4185_v51 = vadd.f32 %v6745_v49, %v4165_v45 }
 0xc3d   :  { %v4201_v43 = vpack.c.bf16 %v4185_v51, %v4185_v51 }
 0xc3f   :  { %4218 = vst.msk [vmem:[#allocation2 + $0x30] sm:$0xf] %vm4205_vm4, %v4201_v43 }
 0xc40   :  { %v4145_v20 = vpop.f32.mrf.mxu0 }
 0xc41   :  { %v4166_v32 = vadd.f32 %v4145_v20, %v3142_v8 }
 0xc43   :  { %v4186_v17 = vadd.f32 %v6745_v49, %v4166_v32 }
 0xc45   :  { %v4202_v1 = vpack.c.bf16 %v4186_v17, %v4186_v17 }
 0xc47   :  { %4219 = vst.msk [vmem:[#allocation2 + $0x34] sm:$0xf] %vm4205_vm4, %v4202_v1 }
 0xc48   :  { %v4148_v53 = vpop.f32.mrf.mxu0 }
 0xc49   :  { %v4167_v12 = vadd.f32 %v4148_v53, %v6497_v46 }
 0xc4b   :  { %v4187_v22 = vadd.f32 %v6745_v49, %v4167_v12 }
 0xc4d   :  { %v4203_v50 = vpack.c.bf16 %v4187_v22, %v4187_v22 }
 0xc4f   :  { %4220 = vst.msk [vmem:[#allocation2 + $0x38] sm:$0xf] %vm4205_vm4, %v4203_v50 }
 0xc50   :  { %v4150_v29 = vpop.f32.mrf.mxu0 }
 0xc51   :  { %v4168_v62 = vadd.f32 %v4150_v29, %v3144_v35 }
 0xc53   :  { %v4188_v46 = vadd.f32 %v6745_v49, %v4168_v62 }
 0xc55   :  { %v4204_v21 = vpack.c.bf16 %v4188_v46, %v4188_v46 }
 0xc57   :  { %4221 = vst.msk [vmem:[#allocation2 + $0x3c] sm:$0xf] %vm4205_vm4, %v4204_v21 }
 0xc58   :  { %4234 = dma.vmem_to_hbm [thread:$0]  %s4227_s26, 1024, %s4229_s29, [#allocation3], %s5004_s30, %s5004_s30, %s5005_s3  }
 0xc59   :  { %5001 = dma.done.wait [#allocation3], 1024  }
 0xc5a   :  { %5002 = vsyncadd [#allocation3], 4294966272 }
 0xc5b   :  { %4239 = vsyncpa [#allocation3], 1 }

</bundles_post_ra>
